<compile_context>
chip_gen: v5e
topology: v5e:2x2
jax: 0.10.0
libtpu: 0.0.40
codegen_flags: <defaults>
</compile_context>

<pallas_src>
import functools

import jax
import jax.numpy as jnp
from jax.experimental import pallas as pl
from jax.experimental.pallas import tpu as pltpu


def _build_banded_weight(w, H, W):
    """Fold the (kh, kw) taps (incl. H/W zero padding) into a banded matrix.

    w: (3, 3, 3, Cin, Cout) in (kd, kh, kw, ci, co) order (DHWIO layout).
    Returns (3, H*W*Cin, H*W*Cout): for each kd tap, a matrix B such that
    input-rows (D, H*W*Cin) @ B == conv-output-rows (D, H*W*Cout).
    """
    _, _, _, cin, cout = w.shape
    kh = jnp.arange(3)[:, None, None]
    hs = jnp.arange(H)[None, :, None]
    ho = jnp.arange(H)[None, None, :]
    ind_h = (hs == ho + kh - 1).astype(w.dtype)          # (3, H, H)
    kw = jnp.arange(3)[:, None, None]
    ws = jnp.arange(W)[None, :, None]
    wo = jnp.arange(W)[None, None, :]
    ind_w = (ws == wo + kw - 1).astype(w.dtype)          # (3, W, W)
    # B[kd, hs, ws, ci, ho, wo, co] = sum_{kh,kw} w[kd,kh,kw,ci,co]*indH*indW
    b = jnp.einsum('abcio,bsp,ctq->astipqo', w, ind_h, ind_w)
    return b.reshape(3, H * W * cin, H * W * cout)


def _conv_rows(x_ref, wb_ref, xpad_ref, *, D, PD):
    """3x3x3 conv (no bias) for one sample; returns rows (D, H*W*Cout) f32."""
    # Only the 1-deep D halo rows need to be zero; zero the two aligned
    # PD-row slabs around the payload instead of the whole scratch buffer.
    zeros = jnp.zeros((PD, xpad_ref.shape[1]), xpad_ref.dtype)
    xpad_ref[0:PD, :] = zeros
    xpad_ref[PD + D:PD + D + PD, :] = zeros
    xpad_ref[PD:PD + D, :] = x_ref[0]            # aligned full-width store
    acc = None
    for kd in range(3):                          # 3 matmuls: K=H*W*Cin, N=H*W*Cout
        start = PD + kd - 1
        slab = xpad_ref[start:start + D, :]
        part = jnp.dot(slab, wb_ref[kd], preferred_element_type=jnp.float32)
        acc = part if acc is None else acc + part
    return acc                                   # (D, H*W*Cout)


def _stats_kernel(x_ref, wb_ref, psum_ref, psq_ref, xpad_ref, *, D, PD):
    """Per-sample partial sums / sums-of-squares of the conv output."""
    y = _conv_rows(x_ref, wb_ref, xpad_ref, D=D, PD=PD)
    psum_ref[...] = y.sum(axis=0).reshape(psum_ref.shape)
    psq_ref[...] = (y * y).sum(axis=0).reshape(psq_ref.shape)


def _fwd_kernel(x_ref, wb_ref, scale_ref, shift_ref, o_ref, xpad_ref, *, D, PD):
    """Recompute conv, apply precomputed BN scale/shift, ELU, lane-dense store."""
    y = _conv_rows(x_ref, wb_ref, xpad_ref, D=D, PD=PD)
    z = y * scale_ref[...] + shift_ref[...]
    elu = jnp.where(z > 0, z, jnp.exp(jnp.minimum(z, 0.0)) - 1.0)
    o_ref[...] = elu.reshape(o_ref.shape)


def discriminator_input(x, w, b, gamma, beta, eps=1e-5):
    """x: (N, D, H, W, Cin) f32.  Returns NCDHW (N, Cout, D, H, W) f32."""
    del b  # conv bias cancels exactly under batch-stat BN (see header comment)
    N, D, H, W, Cin = x.shape
    Cout = w.shape[-1]
    hwc_in, hwc_out = H * W * Cin, H * W * Cout
    PD = 8                                       # sublane-aligned 1-deep D halo

    xf = x.reshape(N, D, hwc_in)                 # free (contiguous) reshape
    wb = _build_banded_weight(w, H, W)           # (3, hwc_in, hwc_out)

    x_spec = pl.BlockSpec((1, D, hwc_in), lambda n: (n, 0, 0))
    wb_spec = pl.BlockSpec((3, hwc_in, hwc_out), lambda n: (0, 0, 0))
    vec_spec = pl.BlockSpec((1, hwc_out), lambda n: (0, 0))
    scratch = [pltpu.VMEM((D + 2 * PD, hwc_in), jnp.float32)]
    params = pltpu.CompilerParams(dimension_semantics=("parallel",))

    # pass 1: per-sample partial statistics (parallel grid, no resident
    # accumulators, no conv-output round trip through HBM).
    psum, psq = pl.pallas_call(
        functools.partial(_stats_kernel, D=D, PD=PD),
        out_shape=(jax.ShapeDtypeStruct((N, 1, hwc_out), jnp.float32),
                   jax.ShapeDtypeStruct((N, 1, hwc_out), jnp.float32)),
        grid=(N,),
        in_specs=[x_spec, wb_spec],
        out_specs=(pl.BlockSpec((1, 1, hwc_out), lambda n: (n, 0, 0)),
                   pl.BlockSpec((1, 1, hwc_out), lambda n: (n, 0, 0))),
        scratch_shapes=scratch,
        compiler_params=params,
    )(xf, wb)

    # ContBatchNorm3d always normalizes with batch statistics (biased variance).
    # Statistics are of the bias-free conv output; the bias shifts the mean by
    # the same constant it adds to y, so (y - mean) — and the output — is
    # unchanged.
    cnt = float(N * D * H * W)
    s = psum.reshape(N, H * W, Cout).sum(axis=(0, 1))
    sq = psq.reshape(N, H * W, Cout).sum(axis=(0, 1))
    mean = s / cnt
    var = jnp.maximum(sq / cnt - mean * mean, 0.0)   # guard E[x^2]-E[x]^2 < 0
    scale_c = gamma * jax.lax.rsqrt(var + eps)
    shift_c = beta - mean * scale_c
    scale = jnp.tile(scale_c, H * W)[None]           # (1, hwc_out)
    shift = jnp.tile(shift_c, H * W)[None]

    # pass 2: conv (recomputed, cheap) + BN + ELU, lane-dense (512-wide) output.
    out = pl.pallas_call(
        functools.partial(_fwd_kernel, D=D, PD=PD),
        out_shape=jax.ShapeDtypeStruct((N, D, hwc_out), jnp.float32),
        grid=(N,),
        in_specs=[x_spec, wb_spec, vec_spec, vec_spec],
        out_specs=pl.BlockSpec((1, D, hwc_out), lambda n: (n, 0, 0)),
        scratch_shapes=scratch,
        compiler_params=params,
    )(xf, wb, scale, shift)

    # NDHWC -> NCDHW to match the PyTorch module's output layout.  At tiny W a
    # lane-sparse NCDHW store inside the kernel is worse than one XLA transpose.
    return jnp.transpose(out.reshape(N, D, H, W, Cout), (0, 4, 1, 2, 3))


def _reference(x, w, b, gamma, beta, eps=1e-5):
    y = jax.lax.conv_general_dilated(
        x, w, window_strides=(1, 1, 1), padding=((1, 1),) * 3,
        dimension_numbers=('NDHWC', 'DHWIO', 'NDHWC')) + b
    mean = y.mean(axis=(0, 1, 2, 3))
    var = y.var(axis=(0, 1, 2, 3))
    z = (y - mean) / jnp.sqrt(var + eps) * gamma + beta
    z = jnp.where(z > 0, z, jnp.exp(jnp.minimum(z, 0.0)) - 1.0)
    return jnp.transpose(z, (0, 4, 1, 2, 3))


if __name__ == "__main__":
    # TODO(synk): ELUCons with elu=False (PReLU) is not implemented; ELU path only.
    N, D, H, W, Cin, Cout = 2, 8, 8, 8, 4, 8
    key = jax.random.PRNGKey(0)
    k1, k2, k3, k4, k5 = jax.random.split(key, 5)
    x = jax.random.normal(k1, (N, D, H, W, Cin), jnp.float32)
    # conv weight kept in DHWIO (3,3,3,Cin,Cout); PyTorch stores (Cout,Cin,3,3,3)
    w = 0.1 * jax.random.normal(k2, (3, 3, 3, Cin, Cout), jnp.float32)
    b = 0.1 * jax.random.normal(k3, (Cout,), jnp.float32)
    gamma = 1.0 + 0.1 * jax.random.normal(k4, (Cout,), jnp.float32)
    beta = 0.1 * jax.random.normal(k5, (Cout,), jnp.float32)

    fn = jax.jit(discriminator_input)
    out = jax.block_until_ready(fn(x, w, b, gamma, beta))
    ref = _reference(x, w, b, gamma, beta)
    assert out.shape == (N, Cout, D, H, W)
    err = float(jnp.max(jnp.abs(out - ref)))
    assert err < 1e-3, err
    print("KERNEL_OK")
</pallas_src>

<mosaic_0001>
module attributes {stable_mosaic.version = 11 : i64} {
  func.func @_stats_kernel(%arg0: i32, %arg1: memref<1x8x256xf32, #tpu.memory_space<vmem>>, %arg2: memref<3x256x512xf32, #tpu.memory_space<vmem>>, %arg3: memref<1x1x512xf32, #tpu.memory_space<vmem>>, %arg4: memref<1x1x512xf32, #tpu.memory_space<vmem>>, %arg5: memref<24x256xf32, #tpu.memory_space<vmem>>) attributes {dimension_semantics = [#tpu.dimension_semantics<parallel>], iteration_bounds = array<i64: 2>, scalar_prefetch = 0 : i64, scratch_operands = 1 : i64, tpu.core_type = #tpu.core_type<tc>, window_params = [{transform_indices = @transform_0, window_bounds = array<i64: 1, 8, 256>}, {pipeline_mode = #tpu.pipeline_mode<synchronous>, transform_indices = @transform_1, window_bounds = array<i64: 3, 256, 512>}, {transform_indices = @transform_2, window_bounds = array<i64: 1, 1, 512>}, {transform_indices = @transform_3, window_bounds = array<i64: 1, 1, 512>}]} {
    %cst = arith.constant 0.000000e+00 : f32
    %0 = vector.broadcast %cst : f32 to vector<8x256xf32>
    %c0 = arith.constant 0 : index
    %c0_0 = arith.constant 0 : index
    %1 = vector.load %arg5[%c0, %c0_0] : memref<24x256xf32, #tpu.memory_space<vmem>>, vector<8x256xf32>
    tpu.vector_store %arg5[%c0, %c0_0], %0 {strides = array<i32>} : memref<24x256xf32, #tpu.memory_space<vmem>>, vector<8x256xf32>,
    %c16 = arith.constant 16 : index
    %c0_1 = arith.constant 0 : index
    %2 = vector.load %arg5[%c16, %c0_1] : memref<24x256xf32, #tpu.memory_space<vmem>>, vector<8x256xf32>
    tpu.vector_store %arg5[%c16, %c0_1], %0 {strides = array<i32>} : memref<24x256xf32, #tpu.memory_space<vmem>>, vector<8x256xf32>,
    %c0_2 = arith.constant 0 : index
    %c0_3 = arith.constant 0 : index
    %c0_4 = arith.constant 0 : index
    %3 = vector.load %arg1[%c0_2, %c0_3, %c0_4] : memref<1x8x256xf32, #tpu.memory_space<vmem>>, vector<1x8x256xf32>
    %4 = vector.shape_cast %3 : vector<1x8x256xf32> to vector<8x256xf32>
    %c8 = arith.constant 8 : index
    %c0_5 = arith.constant 0 : index
    %5 = vector.load %arg5[%c8, %c0_5] : memref<24x256xf32, #tpu.memory_space<vmem>>, vector<8x256xf32>
    tpu.vector_store %arg5[%c8, %c0_5], %4 {strides = array<i32>} : memref<24x256xf32, #tpu.memory_space<vmem>>, vector<8x256xf32>,
    %c7 = arith.constant 7 : index
    %c0_6 = arith.constant 0 : index
    %6 = vector.load %arg5[%c7, %c0_6] : memref<24x256xf32, #tpu.memory_space<vmem>>, vector<8x256xf32>
    %c0_7 = arith.constant 0 : index
    %c0_8 = arith.constant 0 : index
    %c0_9 = arith.constant 0 : index
    %7 = vector.load %arg2[%c0_7, %c0_8, %c0_9] : memref<3x256x512xf32, #tpu.memory_space<vmem>>, vector<1x256x512xf32>
    %8 = vector.shape_cast %7 : vector<1x256x512xf32> to vector<256x512xf32>
    %cst_10 = arith.constant dense<0.000000e+00> : vector<8x512xf32>
    %9 = tpu.matmul %6, %8, %cst_10 {dimension_numbers = #tpu.dot_dimension_numbers<[1], [0], [0], [1], [0, 0, 1, 1], [], []>} : vector<8x256xf32>, vector<256x512xf32>, vector<8x512xf32> -> vector<8x512xf32>
    %c8_11 = arith.constant 8 : index
    %c0_12 = arith.constant 0 : index
    %10 = vector.load %arg5[%c8_11, %c0_12] : memref<24x256xf32, #tpu.memory_space<vmem>>, vector<8x256xf32>
    %c1 = arith.constant 1 : index
    %c0_13 = arith.constant 0 : index
    %c0_14 = arith.constant 0 : index
    %11 = vector.load %arg2[%c1, %c0_13, %c0_14] : memref<3x256x512xf32, #tpu.memory_space<vmem>>, vector<1x256x512xf32>
    %12 = vector.shape_cast %11 : vector<1x256x512xf32> to vector<256x512xf32>
    %cst_15 = arith.constant dense<0.000000e+00> : vector<8x512xf32>
    %13 = tpu.matmul %10, %12, %cst_15 {dimension_numbers = #tpu.dot_dimension_numbers<[1], [0], [0], [1], [0, 0, 1, 1], [], []>} : vector<8x256xf32>, vector<256x512xf32>, vector<8x512xf32> -> vector<8x512xf32>
    %14 = arith.addf %9, %13 : vector<8x512xf32>
    %c9 = arith.constant 9 : index
    %c0_16 = arith.constant 0 : index
    %15 = vector.load %arg5[%c9, %c0_16] : memref<24x256xf32, #tpu.memory_space<vmem>>, vector<8x256xf32>
    %c2 = arith.constant 2 : index
    %c0_17 = arith.constant 0 : index
    %c0_18 = arith.constant 0 : index
    %16 = vector.load %arg2[%c2, %c0_17, %c0_18] : memref<3x256x512xf32, #tpu.memory_space<vmem>>, vector<1x256x512xf32>
    %17 = vector.shape_cast %16 : vector<1x256x512xf32> to vector<256x512xf32>
    %cst_19 = arith.constant dense<0.000000e+00> : vector<8x512xf32>
    %18 = tpu.matmul %15, %17, %cst_19 {dimension_numbers = #tpu.dot_dimension_numbers<[1], [0], [0], [1], [0, 0, 1, 1], [], []>} : vector<8x256xf32>, vector<256x512xf32>, vector<8x512xf32> -> vector<8x512xf32>
    %19 = arith.addf %14, %18 : vector<8x512xf32>
    %cst_20 = arith.constant dense<0.000000e+00> : vector<512xf32>
    %20 = vector.multi_reduction <add>, %19, %cst_20 [0] : vector<8x512xf32> to vector<512xf32>
    %21 = vector.shape_cast %20 : vector<512xf32> to vector<1x1x512xf32>
    %c0_21 = arith.constant 0 : index
    %c0_22 = arith.constant 0 : index
    %c0_23 = arith.constant 0 : index
    %22 = vector.load %arg3[%c0_21, %c0_22, %c0_23] : memref<1x1x512xf32, #tpu.memory_space<vmem>>, vector<1x1x512xf32>
    tpu.vector_store %arg3[%c0_21, %c0_22, %c0_23], %21 {strides = array<i32>} : memref<1x1x512xf32, #tpu.memory_space<vmem>>, vector<1x1x512xf32>,
    %23 = arith.mulf %19, %19 : vector<8x512xf32>
    %cst_24 = arith.constant dense<0.000000e+00> : vector<512xf32>
    %24 = vector.multi_reduction <add>, %23, %cst_24 [0] : vector<8x512xf32> to vector<512xf32>
    %25 = vector.shape_cast %24 : vector<512xf32> to vector<1x1x512xf32>
    %c0_25 = arith.constant 0 : index
    %c0_26 = arith.constant 0 : index
    %c0_27 = arith.constant 0 : index
    %26 = vector.load %arg4[%c0_25, %c0_26, %c0_27] : memref<1x1x512xf32, #tpu.memory_space<vmem>>, vector<1x1x512xf32>
    tpu.vector_store %arg4[%c0_25, %c0_26, %c0_27], %25 {strides = array<i32>} : memref<1x1x512xf32, #tpu.memory_space<vmem>>, vector<1x1x512xf32>,
    return
  }
  func.func @transform_0(%arg0: i32) -> (i32, i32, i32) {
    %c0_i32 = arith.constant 0 : i32
    %c0_i32_0 = arith.constant 0 : i32
    %c0_i32_1 = arith.constant 0 : i32
    return %arg0, %c0_i32, %c0_i32_0 : i32, i32, i32
  }
  func.func @transform_1(%arg0: i32) -> (i32, i32, i32) {
    %c0_i32 = arith.constant 0 : i32
    %c0_i32_0 = arith.constant 0 : i32
    %c0_i32_1 = arith.constant 0 : i32
    %c0_i32_2 = arith.constant 0 : i32
    return %c0_i32, %c0_i32_0, %c0_i32_1 : i32, i32, i32
  }
  func.func @transform_2(%arg0: i32) -> (i32, i32, i32) {
    %c0_i32 = arith.constant 0 : i32
    %c0_i32_0 = arith.constant 0 : i32
    %c0_i32_1 = arith.constant 0 : i32
    return %arg0, %c0_i32, %c0_i32_0 : i32, i32, i32
  }
  func.func @transform_3(%arg0: i32) -> (i32, i32, i32) {
    %c0_i32 = arith.constant 0 : i32
    %c0_i32_0 = arith.constant 0 : i32
    %c0_i32_1 = arith.constant 0 : i32
    return %arg0, %c0_i32, %c0_i32_0 : i32, i32, i32
  }
}

module attributes {stable_mosaic.version = 11 : i64} {
  func.func @_fwd_kernel(%arg0: i32, %arg1: memref<1x8x256xf32, #tpu.memory_space<vmem>>, %arg2: memref<3x256x512xf32, #tpu.memory_space<vmem>>, %arg3: memref<1x512xf32, #tpu.memory_space<vmem>>, %arg4: memref<1x512xf32, #tpu.memory_space<vmem>>, %arg5: memref<1x8x512xf32, #tpu.memory_space<vmem>>, %arg6: memref<24x256xf32, #tpu.memory_space<vmem>>) attributes {dimension_semantics = [#tpu.dimension_semantics<parallel>], iteration_bounds = array<i64: 2>, scalar_prefetch = 0 : i64, scratch_operands = 1 : i64, tpu.core_type = #tpu.core_type<tc>, window_params = [{transform_indices = @transform_0, window_bounds = array<i64: 1, 8, 256>}, {pipeline_mode = #tpu.pipeline_mode<synchronous>, transform_indices = @transform_1, window_bounds = array<i64: 3, 256, 512>}, {pipeline_mode = #tpu.pipeline_mode<synchronous>, transform_indices = @transform_2, window_bounds = array<i64: 1, 512>}, {pipeline_mode = #tpu.pipeline_mode<synchronous>, transform_indices = @transform_3, window_bounds = array<i64: 1, 512>}, {transform_indices = @transform_4, window_bounds = array<i64: 1, 8, 512>}]} {
    %cst = arith.constant 0.000000e+00 : f32
    %0 = vector.broadcast %cst : f32 to vector<8x256xf32>
    %c0 = arith.constant 0 : index
    %c0_0 = arith.constant 0 : index
    %1 = vector.load %arg6[%c0, %c0_0] : memref<24x256xf32, #tpu.memory_space<vmem>>, vector<8x256xf32>
    tpu.vector_store %arg6[%c0, %c0_0], %0 {strides = array<i32>} : memref<24x256xf32, #tpu.memory_space<vmem>>, vector<8x256xf32>,
    %c16 = arith.constant 16 : index
    %c0_1 = arith.constant 0 : index
    %2 = vector.load %arg6[%c16, %c0_1] : memref<24x256xf32, #tpu.memory_space<vmem>>, vector<8x256xf32>
    tpu.vector_store %arg6[%c16, %c0_1], %0 {strides = array<i32>} : memref<24x256xf32, #tpu.memory_space<vmem>>, vector<8x256xf32>,
    %c0_2 = arith.constant 0 : index
    %c0_3 = arith.constant 0 : index
    %c0_4 = arith.constant 0 : index
    %3 = vector.load %arg1[%c0_2, %c0_3, %c0_4] : memref<1x8x256xf32, #tpu.memory_space<vmem>>, vector<1x8x256xf32>
    %4 = vector.shape_cast %3 : vector<1x8x256xf32> to vector<8x256xf32>
    %c8 = arith.constant 8 : index
    %c0_5 = arith.constant 0 : index
    %5 = vector.load %arg6[%c8, %c0_5] : memref<24x256xf32, #tpu.memory_space<vmem>>, vector<8x256xf32>
    tpu.vector_store %arg6[%c8, %c0_5], %4 {strides = array<i32>} : memref<24x256xf32, #tpu.memory_space<vmem>>, vector<8x256xf32>,
    %c7 = arith.constant 7 : index
    %c0_6 = arith.constant 0 : index
    %6 = vector.load %arg6[%c7, %c0_6] : memref<24x256xf32, #tpu.memory_space<vmem>>, vector<8x256xf32>
    %c0_7 = arith.constant 0 : index
    %c0_8 = arith.constant 0 : index
    %c0_9 = arith.constant 0 : index
    %7 = vector.load %arg2[%c0_7, %c0_8, %c0_9] : memref<3x256x512xf32, #tpu.memory_space<vmem>>, vector<1x256x512xf32>
    %8 = vector.shape_cast %7 : vector<1x256x512xf32> to vector<256x512xf32>
    %cst_10 = arith.constant dense<0.000000e+00> : vector<8x512xf32>
    %9 = tpu.matmul %6, %8, %cst_10 {dimension_numbers = #tpu.dot_dimension_numbers<[1], [0], [0], [1], [0, 0, 1, 1], [], []>} : vector<8x256xf32>, vector<256x512xf32>, vector<8x512xf32> -> vector<8x512xf32>
    %c8_11 = arith.constant 8 : index
    %c0_12 = arith.constant 0 : index
    %10 = vector.load %arg6[%c8_11, %c0_12] : memref<24x256xf32, #tpu.memory_space<vmem>>, vector<8x256xf32>
    %c1 = arith.constant 1 : index
    %c0_13 = arith.constant 0 : index
    %c0_14 = arith.constant 0 : index
    %11 = vector.load %arg2[%c1, %c0_13, %c0_14] : memref<3x256x512xf32, #tpu.memory_space<vmem>>, vector<1x256x512xf32>
    %12 = vector.shape_cast %11 : vector<1x256x512xf32> to vector<256x512xf32>
    %cst_15 = arith.constant dense<0.000000e+00> : vector<8x512xf32>
    %13 = tpu.matmul %10, %12, %cst_15 {dimension_numbers = #tpu.dot_dimension_numbers<[1], [0], [0], [1], [0, 0, 1, 1], [], []>} : vector<8x256xf32>, vector<256x512xf32>, vector<8x512xf32> -> vector<8x512xf32>
    %14 = arith.addf %9, %13 : vector<8x512xf32>
    %c9 = arith.constant 9 : index
    %c0_16 = arith.constant 0 : index
    %15 = vector.load %arg6[%c9, %c0_16] : memref<24x256xf32, #tpu.memory_space<vmem>>, vector<8x256xf32>
    %c2 = arith.constant 2 : index
    %c0_17 = arith.constant 0 : index
    %c0_18 = arith.constant 0 : index
    %16 = vector.load %arg2[%c2, %c0_17, %c0_18] : memref<3x256x512xf32, #tpu.memory_space<vmem>>, vector<1x256x512xf32>
    %17 = vector.shape_cast %16 : vector<1x256x512xf32> to vector<256x512xf32>
    %cst_19 = arith.constant dense<0.000000e+00> : vector<8x512xf32>
    %18 = tpu.matmul %15, %17, %cst_19 {dimension_numbers = #tpu.dot_dimension_numbers<[1], [0], [0], [1], [0, 0, 1, 1], [], []>} : vector<8x256xf32>, vector<256x512xf32>, vector<8x512xf32> -> vector<8x512xf32>
    %19 = arith.addf %14, %18 : vector<8x512xf32>
    %c0_20 = arith.constant 0 : index
    %c0_21 = arith.constant 0 : index
    %20 = vector.load %arg3[%c0_20, %c0_21] : memref<1x512xf32, #tpu.memory_space<vmem>>, vector<1x512xf32>
    %21 = vector.broadcast %20 : vector<1x512xf32> to vector<8x512xf32>
    %22 = arith.mulf %19, %21 : vector<8x512xf32>
    %c0_22 = arith.constant 0 : index
    %c0_23 = arith.constant 0 : index
    %23 = vector.load %arg4[%c0_22, %c0_23] : memref<1x512xf32, #tpu.memory_space<vmem>>, vector<1x512xf32>
    %24 = vector.broadcast %23 : vector<1x512xf32> to vector<8x512xf32>
    %25 = arith.addf %22, %24 : vector<8x512xf32>
    %cst_24 = arith.constant 0.000000e+00 : f32
    %26 = vector.broadcast %cst_24 : f32 to vector<8x512xf32>
    %27 = arith.cmpf ogt, %25, %26 : vector<8x512xf32>
    %cst_25 = arith.constant 0.000000e+00 : f32
    %28 = vector.broadcast %cst_25 : f32 to vector<8x512xf32>
    %29 = arith.minimumf %25, %28 : vector<8x512xf32>
    %30 = math.exp %29 : vector<8x512xf32>
    %cst_26 = arith.constant 1.000000e+00 : f32
    %31 = vector.broadcast %cst_26 : f32 to vector<8x512xf32>
    %32 = arith.subf %30, %31 : vector<8x512xf32>
    %33 = arith.select %27, %25, %32 : vector<8x512xi1>, vector<8x512xf32>
    %34 = vector.shape_cast %33 : vector<8x512xf32> to vector<1x8x512xf32>
    %c0_27 = arith.constant 0 : index
    %c0_28 = arith.constant 0 : index
    %c0_29 = arith.constant 0 : index
    %35 = vector.load %arg5[%c0_27, %c0_28, %c0_29] : memref<1x8x512xf32, #tpu.memory_space<vmem>>, vector<1x8x512xf32>
    tpu.vector_store %arg5[%c0_27, %c0_28, %c0_29], %34 {strides = array<i32>} : memref<1x8x512xf32, #tpu.memory_space<vmem>>, vector<1x8x512xf32>,
    return
  }
  func.func @transform_0(%arg0: i32) -> (i32, i32, i32) {
    %c0_i32 = arith.constant 0 : i32
    %c0_i32_0 = arith.constant 0 : i32
    %c0_i32_1 = arith.constant 0 : i32
    return %arg0, %c0_i32, %c0_i32_0 : i32, i32, i32
  }
  func.func @transform_1(%arg0: i32) -> (i32, i32, i32) {
    %c0_i32 = arith.constant 0 : i32
    %c0_i32_0 = arith.constant 0 : i32
    %c0_i32_1 = arith.constant 0 : i32
    %c0_i32_2 = arith.constant 0 : i32
    return %c0_i32, %c0_i32_0, %c0_i32_1 : i32, i32, i32
  }
  func.func @transform_2(%arg0: i32) -> (i32, i32) {
    %c0_i32 = arith.constant 0 : i32
    %c0_i32_0 = arith.constant 0 : i32
    %c0_i32_1 = arith.constant 0 : i32
    return %c0_i32, %c0_i32_0 : i32, i32
  }
  func.func @transform_3(%arg0: i32) -> (i32, i32) {
    %c0_i32 = arith.constant 0 : i32
    %c0_i32_0 = arith.constant 0 : i32
    %c0_i32_1 = arith.constant 0 : i32
    return %c0_i32, %c0_i32_0 : i32, i32
  }
  func.func @transform_4(%arg0: i32) -> (i32, i32, i32) {
    %c0_i32 = arith.constant 0 : i32
    %c0_i32_0 = arith.constant 0 : i32
    %c0_i32_1 = arith.constant 0 : i32
    return %arg0, %c0_i32, %c0_i32_0 : i32, i32, i32
  }
}

</mosaic_0001>

<bundles_post_ra>
// kernel: tile.13
= control target key start
LH: loop header
LB: loop body
LE: loop exit
PB: predicated region body
PF: predicated region fallthrough
CT: control target
= control target key end

     0   :  { %s64_s0 = inlined_call_operand.vmem [shape: f32[8], index: 0, kind: input, shape index: {}]   ;;  %s65_s1 = inlined_call_operand.vmem [shape: f32[64,8], index: 1, kind: output, shape index: {}]  }
   0x1   :  { %v4_v0 = vld [vmem:[%s64_s0] ss:$0 sm:$0xff] }
   0x2   :  { %5 = vst [vmem:[%s65_s1] sm:$0xff] %v4_v0 }
   0x3   :  { %20 = vst [vmem:[%s65_s1 + $0x8] sm:$0xff] %v4_v0 }
   0x4   :  { %21 = vst [vmem:[%s65_s1 + $0x10] sm:$0xff] %v4_v0 }
   0x5   :  { %22 = vst [vmem:[%s65_s1 + $0x18] sm:$0xff] %v4_v0 }
   0x6   :  { %23 = vst [vmem:[%s65_s1 + $0x20] sm:$0xff] %v4_v0 }
   0x7   :  { %24 = vst [vmem:[%s65_s1 + $0x28] sm:$0xff] %v4_v0 }
   0x8   :  { %25 = vst [vmem:[%s65_s1 + $0x30] sm:$0xff] %v4_v0 }
   0x9   :  { %26 = vst [vmem:[%s65_s1 + $0x38] sm:$0xff] %v4_v0 }

// kernel: tile.14
= control target key start
LH: loop header
LB: loop body
LE: loop exit
PB: predicated region body
PF: predicated region fallthrough
CT: control target
= control target key end

     0   :  { %vm6_vm0 = vcmask 1043458   ;;  %s11_s6 = smov 3  ;;  %s14_s7 = smov 12  ;;  %vm8_vm1 = vcmask 64512   ;;  %vm20_vm2 = vcmask 1048512   ;;  %vm32_vm3 = vcmask 982912   ;;  %s411_s0 = inlined_call_operand.vmem [shape: f32[64,8], index: 0, kind: input, shape index: {}]   ;;  %s412_s1 = inlined_call_operand.vmem [shape: f32[1,512], index: 1, kind: output, shape index: {}]  }
   0x1   :  { %v214_v0 = vld [vmem:[%s411_s0 + $0xf] ss:$16 sm:%s11_s6]   ;;  %s35_s12 = smov 3  ;;  %s38_s15 = smov 12  ;;  %vm44_vm4 = vcmask 917312   ;;  %vm56_vm5 = vcmask 851712  }
   0x2   :  { %v215_v1 = vld [vmem:[%s411_s0 + $0xf] ss:$16 sm:%s14_s7]   ;;  %v218_v3 = vld [vmem:[%s411_s0 + $0xd] ss:$16 sm:%s35_s12]   ;;  %s262_s16 = smov 120   ;;  %s23_s19 = smov 3 }
   0x3   :  { %v17_v2 = vsel %vm6_vm0, %v215_v1, %v214_v0  ;;  %v219_v4 = vld [vmem:[%s411_s0 + $0xd] ss:$16 sm:%s38_s15]   ;;  %s26_s20 = smov 12  ;;  %v216_v6 = vld [vmem:[%s411_s0 + $0xe] ss:$16 sm:%s23_s19]   ;;  %s47_s23 = smov 3 }
   0x4   :  { %18 = vrot.lane.b32.xlu0 %v17_v2, %s262_s16  ;;  %v41_v5 = vsel %vm6_vm0, %v219_v4, %v218_v3  ;;  %s263_s24 = smov 104   ;;  %v217_v7 = vld [vmem:[%s411_s0 + $0xe] ss:$16 sm:%s26_s20]   ;;  %s50_s27 = smov 12  ;;  %vm68_vm6 = vcmask 786112   ;;  %vm80_vm7 = vcmask 720512  }
   0x5   :  { %42 = vrot.lane.b32.xlu1 %v41_v5, %s263_s24  ;;  %v220_v8 = vld [vmem:[%s411_s0 + $0xc] ss:$16 sm:%s47_s23]   ;;  %v29_v10 = vsel %vm6_vm0, %v217_v7, %v216_v6  ;;  %s83_s3 = smov 3  ;;  %s86_s4 = smov 12  ;;  %vm92_vm8 = vcmask 654912   ;;  %vm104_vm9 = vcmask 589312  }
   0x6   :  { %v221_v9 = vld [vmem:[%s411_s0 + $0xc] ss:$16 sm:%s50_s27]   ;;  %s264_s5 = smov 112   ;;  %s95_s6 = smov 3  ;;  %v226_v12 = vld [vmem:[%s411_s0 + $0x9] ss:$16 sm:%s83_s3]  }
   0x7   :  { %v53_v11 = vsel %vm6_vm0, %v221_v9, %v220_v8  ;;  %s98_s7 = smov 12  ;;  %v227_v13 = vld [vmem:[%s411_s0 + $0x9] ss:$16 sm:%s86_s4]   ;;  %s59_s12 = smov 3  ;;  %v228_v16 = vld [vmem:[%s411_s0 + $0x8] ss:$16 sm:%s95_s6]  }
   0x8   :  { %s62_s13 = smov 12  ;;  %s265_s14 = smov 96   ;;  %v222_v14 = vld [vmem:[%s411_s0 + $0xb] ss:$16 sm:%s59_s12]   ;;  %v229_v17 = vld [vmem:[%s411_s0 + $0x8] ss:$16 sm:%s98_s7]   ;;  %v89_v19 = vsel %vm6_vm0, %v227_v13, %v226_v12 }
   0x9   :  { %v223_v15 = vld [vmem:[%s411_s0 + $0xb] ss:$16 sm:%s62_s13]   ;;  %s266_s23 = smov 88   ;;  %s71_s24 = smov 3  ;;  %v101_v20 = vsel %vm6_vm0, %v229_v17, %v228_v16  ;;  %vm116_vm10 = vcmask 523712   ;;  %vm128_vm11 = vcmask 458112  }
   0xa   :  { %v65_v18 = vsel %vm6_vm0, %v223_v15, %v222_v14  ;;  %s119_s25 = smov 3  ;;  %s74_s26 = smov 12  ;;  %v224_v21 = vld [vmem:[%s411_s0 + $0xa] ss:$16 sm:%s71_s24]   ;;  %vm140_vm12 = vcmask 392512   ;;  %vm152_vm13 = vcmask 326912  }
   0xb   :  { %66 = vrot.lane.b32.xlu2 %v65_v18, %s266_s23  ;;  %s122_s27 = smov 12  ;;  %v225_v22 = vld [vmem:[%s411_s0 + $0xa] ss:$16 sm:%s74_s26]   ;;  %s267_s3 = smov 72   ;;  %vm164_vm14 = vcmask 261312   ;;  %vm176_vm15 = vcmask 195712  }
   0xc   :  { %30 = vrot.lane.b32.xlu0 %v29_v10, %s264_s5  ;;  %v232_v23 = vld [vmem:[%s411_s0 + $0x6] ss:$16 sm:%s119_s25]   ;;  %s131_s6 = smov 3  ;;  %s134_s7 = smov 12  ;;  %v77_v25 = vsel %vm6_vm0, %v225_v22, %v224_v21 }
   0xd   :  { %54 = vrot.lane.b32.xlu1 %v53_v11, %s265_s14  ;;  %s268_s8 = smov 64   ;;  %v233_v24 = vld [vmem:[%s411_s0 + $0x6] ss:$16 sm:%s122_s27]   ;;  %s107_s15 = smov 3 }
   0xe   :  { %v234_v26 = vld [vmem:[%s411_s0 + $0x5] ss:$16 sm:%s131_s6]   ;;  %s110_s16 = smov 12  ;;  %v125_v28 = vsel %vm6_vm0, %v233_v24, %v232_v23  ;;  %s269_s17 = smov 80   ;;  %v230_v30 = vld [vmem:[%s411_s0 + $0x7] ss:$16 sm:%s107_s15]  }
   0xf   :  { %v235_v27 = vld [vmem:[%s411_s0 + $0x5] ss:$16 sm:%s134_s7]   ;;  %s155_s18 = smov 3  ;;  %s158_s19 = smov 12  ;;  %v231_v31 = vld [vmem:[%s411_s0 + $0x7] ss:$16 sm:%s110_s16]  }
  0x10   :  { %v137_v29 = vsel %vm6_vm0, %v235_v27, %v234_v26  ;;  %s270_s24 = smov 48   ;;  %v238_v32 = vld [vmem:[%s411_s0 + $0x3] ss:$16 sm:%s155_s18]   ;;  %s167_s27 = smov 3  ;;  %v113_v34 = vsel %vm6_vm0, %v231_v31, %v230_v30 }
  0x11   :  { %s170_s28 = smov 12  ;;  %s271_s29 = smov 40   ;;  %v239_v33 = vld [vmem:[%s411_s0 + $0x3] ss:$16 sm:%s158_s19]   ;;  %v240_v35 = vld [vmem:[%s411_s0 + $0x2] ss:$16 sm:%s167_s27]  }
  0x12   :  { %v241_v36 = vld [vmem:[%s411_s0 + $0x2] ss:$16 sm:%s170_s28]   ;;  %s143_s7 = smov 3  ;;  %v161_v37 = vsel %vm6_vm0, %v239_v33, %v238_v32  ;;  %s272_s9 = smov 56  }
  0x13   :  { %78 = vrot.lane.b32.xlu2 %v77_v25, %s269_s17  ;;  %v173_v38 = vsel %vm6_vm0, %v241_v36, %v240_v35  ;;  %v236_v39 = vld [vmem:[%s411_s0 + $0x4] ss:$16 sm:%s143_s7]   ;;  %s273_s14 = smov 24   ;;  %s274_s15 = smov 16  }
  0x14   :  { %90 = vrot.lane.b32.xlu0 %v89_v19, %s267_s3  ;;  %s179_s16 = smov 3  ;;  %s182_s17 = smov 12 }
  0x15   :  { %102 = vrot.lane.b32.xlu1 %v101_v20, %s268_s8  ;;  %s146_s8 = smov 12  ;;  %s275_s18 = smov 32   ;;  %v242_v42 = vld [vmem:[%s411_s0 + $0x1] ss:$16 sm:%s179_s16]  }
  0x16   :  { %v237_v40 = vld [vmem:[%s411_s0 + $0x4] ss:$16 sm:%s146_s8]   ;;  %v243_v43 = vld [vmem:[%s411_s0 + $0x1] ss:$16 sm:%s182_s17]   ;;  %s276_s23 = smov 8   ;;  %s4_s25 = smov 12 }
  0x17   :  { %v149_v41 = vsel %vm6_vm0, %v237_v40, %v236_v39  ;;  %v185_v44 = vsel %vm6_vm0, %v243_v43, %v242_v42  ;;  %v5_v46 = vld [vmem:[%s411_s0] ss:$16 sm:%s4_s25]  }
  0x1b   :  { %114 = vrot.lane.b32.xlu2 %v113_v34, %s272_s9 }
  0x1c   :  { %126 = vrot.lane.b32.xlu0 %v125_v28, %s270_s24  ;;  %s2_s24 = smov 3 }
  0x1d   :  { %138 = vrot.lane.b32.xlu1 %v137_v29, %s271_s29  ;;  %v3_v45 = vld [vmem:[%s411_s0] ss:$16 sm:%s2_s24]  }
  0x1e   :  { %v7_v47 = vsel %vm6_vm0, %v5_v46, %v3_v45  ;;  %vm188_vm0 = vcmask 130112  }
  0x1f   :  { %9 = vst.msk [vmem:[#allocation0] ss:$8 sm:$0xf] %vm8_vm1, %v7_v47  }
  0x23   :  { %150 = vrot.lane.b32.xlu2 %v149_v41, %s275_s18 }
  0x24   :  { %162 = vrot.lane.b32.xlu0 %v161_v37, %s273_s14 }
  0x25   :  { %174 = vrot.lane.b32.xlu1 %v173_v38, %s274_s15 }
  0x2b   :  { %186 = vrot.lane.b32.xlu2 %v185_v44, %s276_s23 }
  0x65   :  { %v67_v48 = vpop.permute.xlu2 %66  }
  0x6d   :  { %v79_v49 = vpop.permute.xlu2 %78  }
  0x75   :  { %v115_v52 = vpop.permute.xlu2 %114  }
  0x76   :  { %v19_v50 = vpop.permute.xlu0 %18  }
  0x77   :  { %21 = vst.msk [vmem:[#allocation0] ss:$8 sm:$0xf] %vm20_vm2, %v19_v50   ;;  %v43_v51 = vpop.permute.xlu1 %42  }
  0x7d   :  { %v151_v55 = vpop.permute.xlu2 %150  }
  0x7e   :  { %v31_v53 = vpop.permute.xlu0 %30  }
  0x7f   :  { %33 = vst.msk [vmem:[#allocation0] ss:$8 sm:$0xf] %vm32_vm3, %v31_v53   ;;  %v55_v54 = vpop.permute.xlu1 %54  }
  0x80   :  { %45 = vst.msk [vmem:[#allocation0] ss:$8 sm:$0xf] %vm44_vm4, %v43_v51  }
  0x81   :  { %57 = vst.msk [vmem:[#allocation0] ss:$8 sm:$0xf] %vm56_vm5, %v55_v54  }
  0x82   :  { %69 = vst.msk [vmem:[#allocation0] ss:$8 sm:$0xf] %vm68_vm6, %v67_v48  }
  0x83   :  { %81 = vst.msk [vmem:[#allocation0] ss:$8 sm:$0xf] %vm80_vm7, %v79_v49  }
  0x85   :  { %v187_v58 = vpop.permute.xlu2 %186  }
  0x86   :  { %v91_v56 = vpop.permute.xlu0 %90  }
  0x87   :  { %93 = vst.msk [vmem:[#allocation0] ss:$8 sm:$0xf] %vm92_vm8, %v91_v56   ;;  %v103_v57 = vpop.permute.xlu1 %102  }
  0x88   :  { %105 = vst.msk [vmem:[#allocation0] ss:$8 sm:$0xf] %vm104_vm9, %v103_v57  }
  0x89   :  { %117 = vst.msk [vmem:[#allocation0] ss:$8 sm:$0xf] %vm116_vm10, %v115_v52  }
  0x8e   :  { %v127_v59 = vpop.permute.xlu0 %126  }
  0x8f   :  { %129 = vst.msk [vmem:[#allocation0] ss:$8 sm:$0xf] %vm128_vm11, %v127_v59   ;;  %v139_v60 = vpop.permute.xlu1 %138  }
  0x90   :  { %141 = vst.msk [vmem:[#allocation0] ss:$8 sm:$0xf] %vm140_vm12, %v139_v60  }
  0x91   :  { %153 = vst.msk [vmem:[#allocation0] ss:$8 sm:$0xf] %vm152_vm13, %v151_v55  }
  0x96   :  { %v163_v61 = vpop.permute.xlu0 %162  }
  0x97   :  { %165 = vst.msk [vmem:[#allocation0] ss:$8 sm:$0xf] %vm164_vm14, %v163_v61   ;;  %v175_v62 = vpop.permute.xlu1 %174  }
  0x98   :  { %177 = vst.msk [vmem:[#allocation0] ss:$8 sm:$0xf] %vm176_vm15, %v175_v62  }
  0x99   :  { %189 = vst.msk [vmem:[#allocation0] ss:$8 sm:$0xf] %vm188_vm0, %v187_v58  }
  0xa0   :  { %v192_v63 = vld [vmem:[#allocation0] sm:$0x1]  ;;  %v197_v0 = vld [vmem:[#allocation0 + $0x8] sm:$0x1]  ;;  %v203_v1 = vld [vmem:[#allocation0 + $0x10] sm:$0x1] }
  0xa1   :  { %195 = vst [vmem:[%s412_s1] sm:$0x1] %v192_v63  ;;  %v209_v2 = vld [vmem:[#allocation0 + $0x18] sm:$0x1] }
  0xa2   :  { %244 = vst [vmem:[%s412_s1 + $0x1] sm:$0x1] %v197_v0 }
  0xa3   :  { %245 = vst [vmem:[%s412_s1 + $0x2] sm:$0x1] %v203_v1 }
  0xa4   :  { %246 = vst [vmem:[%s412_s1 + $0x3] sm:$0x1] %v209_v2 }

// kernel: discriminator_input.2
= control target key start
LH: loop header
LB: loop body
LE: loop exit
PB: predicated region body
PF: predicated region fallthrough
CT: control target
= control target key end

     0   :  { %s1566_s12 = smov 0   ;;  %s2796_s0 = inlined_call_operand.vmem [shape: f32[2,8,256], index: 0, kind: input, shape index: {}]   ;;  %s2797_s1 = inlined_call_operand.vmem [shape: f32[3,256,512], index: 1, kind: input, shape index: {}]   ;;  %s2798_s2 = inlined_call_operand.vmem [shape: f32[2,1,512], index: 2, kind: output, shape index: {0}]   ;;  %s2799_s3 = inlined_call_operand.vmem [shape: f32[2,1,512], index: 3, kind: output, shape index: {1}]  }
   0x1 LB: > { %s1260_s13 = sadd.s32 4294967295, %s1543_s12   ;;  %p1264_p0 = scmp.ge.s32.totalorder %s1543_s12, 1  ;;  %s1543_s12 = sphi %s1566_s12, %s14_s12  }
   0x2   : > { %p140_p1 = scmp.lt.s32.totalorder %s1543_s12, 3 }
   0x4   : > { %p141_p2 = pnand %p1264_p0, %p140_p1 }
   0x5   : > { %p1762_p3 = scmp.lt.s32.totalorder (!%p141_p2), %s1260_s13, 1 }
   0x6   : > { %144 = sbr.rel (%p141_p2) target bundleno = 370 (0x172), region = 28 }
   0xb   : > { %v1329_v0 = vld [vmem:[%s2797_s1 + $0x5e0] sm:$0xff]  ;;  %v1330_v2 = vld [vmem:[%s2797_s1 + $0x5e8] sm:$0xff]  ;;  %s2802_s13 = smov (!%p1762_p3, %s1260_s13), 1  ;;  %vm615_vm0 = vcmask 1040384   ;;  %vm921_vm1 = vcmask 1046528   ;;  %vm1126_vm2 = vcmask 1042434  }
   0xc   : > { %v1393_v1 = vld [vmem:[%s2797_s1 + $0x7e0] sm:$0xff]  ;;  %451 = vmatpush.msra.mxu0 %v1329_v0  ;;  %v1394_v3 = vld [vmem:[%s2797_s1 + $0x7e8] sm:$0xff]  ;;  %491 = vmatpush.msra.mxu2 %v1330_v2  ;;  %v1331_v0 = vld [vmem:[%s2797_s1 + $0x5f0] sm:$0xff]  ;;  %s1527_s21 = sshll.u32 %s2802_s13, 4  ;;  %s1267_s10 = sshll.u32 %s2802_s13, 2  ;;  %vm1128_vm3 = vcmask 1041408  }
   0xd   : > { %471 = vmatpush.msra.mxu1 %v1393_v1  ;;  %v1325_v4 = vld [vmem:[%s2797_s1 + $0x5c0] sm:$0xff]  ;;  %511 = vmatpush.msra.mxu3 %v1394_v3  ;;  %v1326_v6 = vld [vmem:[%s2797_s1 + $0x5c8] sm:$0xff]  ;;  %v1395_v1 = vld [vmem:[%s2797_s1 + $0x7f0] sm:$0xff]  ;;  %s171_s9 = scalar_lea.vmem %s2796_s0, %s1527_s21  ;;  %s175_s15 = scalar_lea.vmem %s2798_s2, %s1267_s10 }
   0xe   : > { %v1389_v5 = vld [vmem:[%s2797_s1 + $0x7c0] sm:$0xff]  ;;  %v1390_v7 = vld [vmem:[%s2797_s1 + $0x7c8] sm:$0xff]  ;;  %452 = vmatpush.msra.mxu0 %v1325_v4  ;;  %492 = vmatpush.msra.mxu2 %v1326_v6  ;;  %v1332_v2 = vld [vmem:[%s2797_s1 + $0x5f8] sm:$0xff]  ;;  %s179_s17 = scalar_lea.vmem %s2799_s3, %s1267_s10 }
   0xf   : > { %v1321_v8 = vld [vmem:[%s2797_s1 + $0x5a0] sm:$0xff]  ;;  %472 = vmatpush.msra.mxu1 %v1389_v5  ;;  %v1322_v10 = vld [vmem:[%s2797_s1 + $0x5a8] sm:$0xff]  ;;  %512 = vmatpush.msra.mxu3 %v1390_v7  ;;  %v1396_v3 = vld [vmem:[%s2797_s1 + $0x7f8] sm:$0xff] }
  0x10   : > { %v1385_v9 = vld [vmem:[%s2797_s1 + $0x7a0] sm:$0xff]  ;;  %v1386_v11 = vld [vmem:[%s2797_s1 + $0x7a8] sm:$0xff]  ;;  %453 = vmatpush.msra.mxu0 %v1321_v8  ;;  %493 = vmatpush.msra.mxu2 %v1322_v10  ;;  %v1327_v4 = vld [vmem:[%s2797_s1 + $0x5d0] sm:$0xff] }
  0x11   : > { %v1317_v12 = vld [vmem:[%s2797_s1 + $0x580] sm:$0xff]  ;;  %473 = vmatpush.msra.mxu1 %v1385_v9  ;;  %v1318_v14 = vld [vmem:[%s2797_s1 + $0x588] sm:$0xff]  ;;  %513 = vmatpush.msra.mxu3 %v1386_v11  ;;  %v1391_v5 = vld [vmem:[%s2797_s1 + $0x7d0] sm:$0xff] }
  0x12   : > { %v1381_v13 = vld [vmem:[%s2797_s1 + $0x780] sm:$0xff]  ;;  %v1382_v15 = vld [vmem:[%s2797_s1 + $0x788] sm:$0xff]  ;;  %454 = vmatpush.msra.mxu0 %v1317_v12  ;;  %494 = vmatpush.msra.mxu2 %v1318_v14  ;;  %v1328_v6 = vld [vmem:[%s2797_s1 + $0x5d8] sm:$0xff] }
  0x13   : > { %v1313_v16 = vld [vmem:[%s2797_s1 + $0x560] sm:$0xff]  ;;  %474 = vmatpush.msra.mxu1 %v1381_v13  ;;  %v1314_v18 = vld [vmem:[%s2797_s1 + $0x568] sm:$0xff]  ;;  %514 = vmatpush.msra.mxu3 %v1382_v15  ;;  %v1392_v7 = vld [vmem:[%s2797_s1 + $0x7d8] sm:$0xff] }
  0x14   : > { %v1377_v17 = vld [vmem:[%s2797_s1 + $0x760] sm:$0xff]  ;;  %v1378_v19 = vld [vmem:[%s2797_s1 + $0x768] sm:$0xff]  ;;  %455 = vmatpush.msra.mxu0 %v1313_v16  ;;  %495 = vmatpush.msra.mxu2 %v1314_v18  ;;  %v1323_v8 = vld [vmem:[%s2797_s1 + $0x5b0] sm:$0xff] }
  0x15   : > { %v1309_v20 = vld [vmem:[%s2797_s1 + $0x540] sm:$0xff]  ;;  %475 = vmatpush.msra.mxu1 %v1377_v17  ;;  %v1310_v22 = vld [vmem:[%s2797_s1 + $0x548] sm:$0xff]  ;;  %515 = vmatpush.msra.mxu3 %v1378_v19  ;;  %v1387_v9 = vld [vmem:[%s2797_s1 + $0x7b0] sm:$0xff] }
  0x16   : > { %v1373_v21 = vld [vmem:[%s2797_s1 + $0x740] sm:$0xff]  ;;  %v1374_v23 = vld [vmem:[%s2797_s1 + $0x748] sm:$0xff]  ;;  %456 = vmatpush.msra.mxu0 %v1309_v20  ;;  %496 = vmatpush.msra.mxu2 %v1310_v22  ;;  %v1324_v10 = vld [vmem:[%s2797_s1 + $0x5b8] sm:$0xff] }
  0x17   : > { %v1305_v24 = vld [vmem:[%s2797_s1 + $0x520] sm:$0xff]  ;;  %476 = vmatpush.msra.mxu1 %v1373_v21  ;;  %v1306_v26 = vld [vmem:[%s2797_s1 + $0x528] sm:$0xff]  ;;  %516 = vmatpush.msra.mxu3 %v1374_v23  ;;  %v1388_v11 = vld [vmem:[%s2797_s1 + $0x7b8] sm:$0xff] }
  0x18   : > { %v1369_v25 = vld [vmem:[%s2797_s1 + $0x720] sm:$0xff]  ;;  %v1370_v27 = vld [vmem:[%s2797_s1 + $0x728] sm:$0xff]  ;;  %457 = vmatpush.msra.mxu0 %v1305_v24  ;;  %497 = vmatpush.msra.mxu2 %v1306_v26  ;;  %v1319_v12 = vld [vmem:[%s2797_s1 + $0x590] sm:$0xff] }
  0x19   : > { %v1301_v28 = vld [vmem:[%s2797_s1 + $0x500] sm:$0xff]  ;;  %477 = vmatpush.msra.mxu1 %v1369_v25  ;;  %v1302_v30 = vld [vmem:[%s2797_s1 + $0x508] sm:$0xff]  ;;  %517 = vmatpush.msra.mxu3 %v1370_v27  ;;  %v1383_v13 = vld [vmem:[%s2797_s1 + $0x790] sm:$0xff] }
  0x1a   : > { %v1365_v29 = vld [vmem:[%s2797_s1 + $0x700] sm:$0xff]  ;;  %v1366_v31 = vld [vmem:[%s2797_s1 + $0x708] sm:$0xff]  ;;  %458 = vmatpush.msra.mxu0 %v1301_v28  ;;  %498 = vmatpush.msra.mxu2 %v1302_v30  ;;  %v1320_v14 = vld [vmem:[%s2797_s1 + $0x598] sm:$0xff] }
  0x1b   : > { %v1297_v32 = vld [vmem:[%s2797_s1 + $0x4e0] sm:$0xff]  ;;  %478 = vmatpush.msra.mxu1 %v1365_v29  ;;  %v1298_v34 = vld [vmem:[%s2797_s1 + $0x4e8] sm:$0xff]  ;;  %518 = vmatpush.msra.mxu3 %v1366_v31  ;;  %v1384_v15 = vld [vmem:[%s2797_s1 + $0x798] sm:$0xff] }
  0x1c   : > { %v1361_v33 = vld [vmem:[%s2797_s1 + $0x6e0] sm:$0xff]  ;;  %v1362_v35 = vld [vmem:[%s2797_s1 + $0x6e8] sm:$0xff]  ;;  %459 = vmatpush.msra.mxu0 %v1297_v32  ;;  %499 = vmatpush.msra.mxu2 %v1298_v34  ;;  %v1315_v16 = vld [vmem:[%s2797_s1 + $0x570] sm:$0xff] }
  0x1d   : > { %v1293_v36 = vld [vmem:[%s2797_s1 + $0x4c0] sm:$0xff]  ;;  %479 = vmatpush.msra.mxu1 %v1361_v33  ;;  %v1294_v38 = vld [vmem:[%s2797_s1 + $0x4c8] sm:$0xff]  ;;  %519 = vmatpush.msra.mxu3 %v1362_v35  ;;  %v1379_v17 = vld [vmem:[%s2797_s1 + $0x770] sm:$0xff] }
  0x1e   : > { %v1357_v37 = vld [vmem:[%s2797_s1 + $0x6c0] sm:$0xff]  ;;  %v1358_v39 = vld [vmem:[%s2797_s1 + $0x6c8] sm:$0xff]  ;;  %460 = vmatpush.msra.mxu0 %v1293_v36  ;;  %500 = vmatpush.msra.mxu2 %v1294_v38  ;;  %v1316_v18 = vld [vmem:[%s2797_s1 + $0x578] sm:$0xff] }
  0x1f   : > { %v1289_v40 = vld [vmem:[%s2797_s1 + $0x4a0] sm:$0xff]  ;;  %480 = vmatpush.msra.mxu1 %v1357_v37  ;;  %v1290_v42 = vld [vmem:[%s2797_s1 + $0x4a8] sm:$0xff]  ;;  %520 = vmatpush.msra.mxu3 %v1358_v39  ;;  %v1380_v19 = vld [vmem:[%s2797_s1 + $0x778] sm:$0xff] }
  0x20   : > { %v1353_v41 = vld [vmem:[%s2797_s1 + $0x6a0] sm:$0xff]  ;;  %v1354_v43 = vld [vmem:[%s2797_s1 + $0x6a8] sm:$0xff]  ;;  %461 = vmatpush.msra.mxu0 %v1289_v40  ;;  %501 = vmatpush.msra.mxu2 %v1290_v42  ;;  %v1311_v20 = vld [vmem:[%s2797_s1 + $0x550] sm:$0xff] }
  0x21   : > { %v1285_v44 = vld [vmem:[%s2797_s1 + $0x480] sm:$0xff]  ;;  %481 = vmatpush.msra.mxu1 %v1353_v41  ;;  %v1286_v46 = vld [vmem:[%s2797_s1 + $0x488] sm:$0xff]  ;;  %521 = vmatpush.msra.mxu3 %v1354_v43  ;;  %v1375_v21 = vld [vmem:[%s2797_s1 + $0x750] sm:$0xff] }
  0x22   : > { %v1349_v45 = vld [vmem:[%s2797_s1 + $0x680] sm:$0xff]  ;;  %v1350_v47 = vld [vmem:[%s2797_s1 + $0x688] sm:$0xff]  ;;  %462 = vmatpush.msra.mxu0 %v1285_v44  ;;  %502 = vmatpush.msra.mxu2 %v1286_v46  ;;  %v1312_v22 = vld [vmem:[%s2797_s1 + $0x558] sm:$0xff] }
  0x23   : > { %v1281_v48 = vld [vmem:[%s2797_s1 + $0x460] sm:$0xff]  ;;  %482 = vmatpush.msra.mxu1 %v1349_v45  ;;  %v1282_v50 = vld [vmem:[%s2797_s1 + $0x468] sm:$0xff]  ;;  %522 = vmatpush.msra.mxu3 %v1350_v47  ;;  %v1376_v23 = vld [vmem:[%s2797_s1 + $0x758] sm:$0xff] }
  0x24   : > { %v1345_v49 = vld [vmem:[%s2797_s1 + $0x660] sm:$0xff]  ;;  %v1346_v51 = vld [vmem:[%s2797_s1 + $0x668] sm:$0xff]  ;;  %463 = vmatpush.msra.mxu0 %v1281_v48  ;;  %503 = vmatpush.msra.mxu2 %v1282_v50  ;;  %v1307_v24 = vld [vmem:[%s2797_s1 + $0x530] sm:$0xff] }
  0x25   : > { %v1277_v52 = vld [vmem:[%s2797_s1 + $0x440] sm:$0xff]  ;;  %483 = vmatpush.msra.mxu1 %v1345_v49  ;;  %v1278_v54 = vld [vmem:[%s2797_s1 + $0x448] sm:$0xff]  ;;  %523 = vmatpush.msra.mxu3 %v1346_v51  ;;  %v1371_v25 = vld [vmem:[%s2797_s1 + $0x730] sm:$0xff] }
  0x26   : > { %v1341_v53 = vld [vmem:[%s2797_s1 + $0x640] sm:$0xff]  ;;  %v1342_v55 = vld [vmem:[%s2797_s1 + $0x648] sm:$0xff]  ;;  %464 = vmatpush.msra.mxu0 %v1277_v52  ;;  %504 = vmatpush.msra.mxu2 %v1278_v54  ;;  %v1308_v27 = vld [vmem:[%s2797_s1 + $0x538] sm:$0xff] }
  0x27   : > { %v1273_v56 = vld [vmem:[%s2797_s1 + $0x420] sm:$0xff]  ;;  %484 = vmatpush.msra.mxu1 %v1341_v53  ;;  %v1274_v58 = vld [vmem:[%s2797_s1 + $0x428] sm:$0xff]  ;;  %524 = vmatpush.msra.mxu3 %v1342_v55  ;;  %v1372_v28 = vld [vmem:[%s2797_s1 + $0x738] sm:$0xff] }
  0x28   : > { %v1337_v57 = vld [vmem:[%s2797_s1 + $0x620] sm:$0xff]  ;;  %v1338_v59 = vld [vmem:[%s2797_s1 + $0x628] sm:$0xff]  ;;  %465 = vmatpush.msra.mxu0 %v1273_v56  ;;  %505 = vmatpush.msra.mxu2 %v1274_v58  ;;  %v1303_v30 = vld [vmem:[%s2797_s1 + $0x510] sm:$0xff] }
  0x29   : > { %v1269_v60 = vld [vmem:[%s2797_s1 + $0x400] sm:$0xff]  ;;  %485 = vmatpush.msra.mxu1 %v1337_v57  ;;  %v1270_v62 = vld [vmem:[%s2797_s1 + $0x408] sm:$0xff]  ;;  %525 = vmatpush.msra.mxu3 %v1338_v59  ;;  %v1367_v31 = vld [vmem:[%s2797_s1 + $0x710] sm:$0xff] }
  0x2a   : > { %v1333_v61 = vld [vmem:[%s2797_s1 + $0x600] sm:$0xff]  ;;  %v1334_v63 = vld [vmem:[%s2797_s1 + $0x608] sm:$0xff]  ;;  %466 = vmatpush.msra.mxu0 %v1269_v60  ;;  %506 = vmatpush.msra.mxu2 %v1270_v62  ;;  %v1304_v32 = vld [vmem:[%s2797_s1 + $0x518] sm:$0xff]  ;;  %v1545_v60 = vmov 0.0  }
  0x2b   : > { %486 = vmatpush.msra.mxu1 %v1333_v61  ;;  %526 = vmatpush.msra.mxu3 %v1334_v63  ;;  %v1860_v26 = vld [vmem:[%s171_s9] sm:$0xff]  ;;  %v1869_v29 = vld [vmem:[%s171_s9 + $0x8] sm:$0xff]  ;;  %v1368_v33 = vld [vmem:[%s2797_s1 + $0x718] sm:$0xff]  ;;  %180 = vst [vmem:[#allocation2 + $0x18] sm:$0xff] %v1545_v60 }
  0x2c   : > { %531 = vmatpush.msrb.mxu0 %v1331_v0  ;;  %571 = vmatpush.msrb.mxu2 %v1332_v2  ;;  %186 = vst [vmem:[#allocation2 + $0x28] sm:$0xff] %v1860_v26  ;;  %v1299_v34 = vld [vmem:[%s2797_s1 + $0x4f0] sm:$0xff]  ;;  %v1300_v36 = vld [vmem:[%s2797_s1 + $0x4f8] sm:$0xff] }
  0x2d   : > { %551 = vmatpush.msrb.mxu1 %v1395_v1  ;;  %591 = vmatpush.msrb.mxu3 %v1396_v3  ;;  %187 = vst [vmem:[#allocation2 + $0x10] sm:$0xff] %v1869_v29  ;;  %v1363_v35 = vld [vmem:[%s2797_s1 + $0x6f0] sm:$0xff]  ;;  %v1364_v37 = vld [vmem:[%s2797_s1 + $0x6f8] sm:$0xff]  ;;  %v252_v3 = vld [vmem:[%s2797_s1 + $0x1e0] sm:$0xff] }
  0x2e   : > { %532 = vmatpush.msrb.mxu0 %v1327_v4  ;;  %572 = vmatpush.msrb.mxu2 %v1328_v6  ;;  %v1295_v38 = vld [vmem:[%s2797_s1 + $0x4d0] sm:$0xff]  ;;  %v1296_v40 = vld [vmem:[%s2797_s1 + $0x4d8] sm:$0xff]  ;;  %181 = vst [vmem:[#allocation2 + $0x20] sm:$0xff] %v1545_v60  ;;  %v316_v4 = vld [vmem:[%s2797_s1 + $0x3e0] sm:$0xff] }
  0x2f   : > { %552 = vmatpush.msrb.mxu1 %v1391_v5  ;;  %592 = vmatpush.msrb.mxu3 %v1392_v7  ;;  %v1359_v39 = vld [vmem:[%s2797_s1 + $0x6d0] sm:$0xff]  ;;  %v1360_v41 = vld [vmem:[%s2797_s1 + $0x6d8] sm:$0xff]  ;;  %182 = vst [vmem:[#allocation2 + $0x8] sm:$0xff] %v1545_v60  ;;  %v253_v5 = vld [vmem:[%s2797_s1 + $0x1e8] sm:$0xff] }
  0x30   : > { %533 = vmatpush.msrb.mxu0 %v1323_v8  ;;  %573 = vmatpush.msrb.mxu2 %v1324_v10  ;;  %v1291_v42 = vld [vmem:[%s2797_s1 + $0x4b0] sm:$0xff]  ;;  %v1292_v44 = vld [vmem:[%s2797_s1 + $0x4b8] sm:$0xff]  ;;  %183 = vst [vmem:[#allocation2] sm:$0xff] %v1545_v60  ;;  %v317_v6 = vld [vmem:[%s2797_s1 + $0x3e8] sm:$0xff] }
  0x31   : > { %553 = vmatpush.msrb.mxu1 %v1387_v9  ;;  %593 = vmatpush.msrb.mxu3 %v1388_v11  ;;  %v1355_v43 = vld [vmem:[%s2797_s1 + $0x6b0] sm:$0xff]  ;;  %v1356_v45 = vld [vmem:[%s2797_s1 + $0x6b8] sm:$0xff]  ;;  %v248_v7 = vld [vmem:[%s2797_s1 + $0x1c0] sm:$0xff] }
  0x32   : > { %534 = vmatpush.msrb.mxu0 %v1319_v12  ;;  %574 = vmatpush.msrb.mxu2 %v1320_v14  ;;  %v1287_v46 = vld [vmem:[%s2797_s1 + $0x490] sm:$0xff]  ;;  %v1288_v48 = vld [vmem:[%s2797_s1 + $0x498] sm:$0xff]  ;;  %v312_v8 = vld [vmem:[%s2797_s1 + $0x3c0] sm:$0xff] }
  0x33   : > { %554 = vmatpush.msrb.mxu1 %v1383_v13  ;;  %594 = vmatpush.msrb.mxu3 %v1384_v15  ;;  %v1351_v47 = vld [vmem:[%s2797_s1 + $0x690] sm:$0xff]  ;;  %v1352_v49 = vld [vmem:[%s2797_s1 + $0x698] sm:$0xff]  ;;  %v249_v9 = vld [vmem:[%s2797_s1 + $0x1c8] sm:$0xff] }
  0x34   : > { %535 = vmatpush.msrb.mxu0 %v1315_v16  ;;  %575 = vmatpush.msrb.mxu2 %v1316_v18  ;;  %v1283_v50 = vld [vmem:[%s2797_s1 + $0x470] sm:$0xff]  ;;  %v1284_v52 = vld [vmem:[%s2797_s1 + $0x478] sm:$0xff]  ;;  %v313_v10 = vld [vmem:[%s2797_s1 + $0x3c8] sm:$0xff] }
  0x35   : > { %555 = vmatpush.msrb.mxu1 %v1379_v17  ;;  %595 = vmatpush.msrb.mxu3 %v1380_v19  ;;  %v1347_v51 = vld [vmem:[%s2797_s1 + $0x670] sm:$0xff]  ;;  %v1348_v53 = vld [vmem:[%s2797_s1 + $0x678] sm:$0xff]  ;;  %v244_v11 = vld [vmem:[%s2797_s1 + $0x1a0] sm:$0xff] }
  0x36   : > { %536 = vmatpush.msrb.mxu0 %v1311_v20  ;;  %576 = vmatpush.msrb.mxu2 %v1312_v22  ;;  %v1279_v54 = vld [vmem:[%s2797_s1 + $0x450] sm:$0xff]  ;;  %v1280_v56 = vld [vmem:[%s2797_s1 + $0x458] sm:$0xff]  ;;  %v308_v12 = vld [vmem:[%s2797_s1 + $0x3a0] sm:$0xff] }
  0x37   : > { %556 = vmatpush.msrb.mxu1 %v1375_v21  ;;  %596 = vmatpush.msrb.mxu3 %v1376_v23  ;;  %v1343_v55 = vld [vmem:[%s2797_s1 + $0x650] sm:$0xff]  ;;  %v1344_v57 = vld [vmem:[%s2797_s1 + $0x658] sm:$0xff]  ;;  %v245_v13 = vld [vmem:[%s2797_s1 + $0x1a8] sm:$0xff] }
  0x38   : > { %537 = vmatpush.msrb.mxu0 %v1307_v24  ;;  %577 = vmatpush.msrb.mxu2 %v1308_v27  ;;  %v1275_v58 = vld [vmem:[%s2797_s1 + $0x430] sm:$0xff]  ;;  %v1276_v61 = vld [vmem:[%s2797_s1 + $0x438] sm:$0xff]  ;;  %v309_v14 = vld [vmem:[%s2797_s1 + $0x3a8] sm:$0xff] }
  0x39   : > { %557 = vmatpush.msrb.mxu1 %v1371_v25  ;;  %597 = vmatpush.msrb.mxu3 %v1372_v28  ;;  %v1339_v59 = vld [vmem:[%s2797_s1 + $0x630] sm:$0xff]  ;;  %v1340_v62 = vld [vmem:[%s2797_s1 + $0x638] sm:$0xff]  ;;  %v240_v15 = vld [vmem:[%s2797_s1 + $0x180] sm:$0xff] }
  0x3a   : > { %538 = vmatpush.msrb.mxu0 %v1303_v30  ;;  %578 = vmatpush.msrb.mxu2 %v1304_v32  ;;  %v1271_v63 = vld [vmem:[%s2797_s1 + $0x410] sm:$0xff]  ;;  %v1272_v1 = vld [vmem:[%s2797_s1 + $0x418] sm:$0xff]  ;;  %v304_v16 = vld [vmem:[%s2797_s1 + $0x380] sm:$0xff] }
  0x3b   : > { %558 = vmatpush.msrb.mxu1 %v1367_v31  ;;  %598 = vmatpush.msrb.mxu3 %v1368_v33  ;;  %v1335_v0 = vld [vmem:[%s2797_s1 + $0x610] sm:$0xff]  ;;  %v1336_v2 = vld [vmem:[%s2797_s1 + $0x618] sm:$0xff]  ;;  %v241_v17 = vld [vmem:[%s2797_s1 + $0x188] sm:$0xff] }
  0x3c   : > { %539 = vmatpush.msrb.mxu0 %v1299_v34  ;;  %579 = vmatpush.msrb.mxu2 %v1300_v36  ;;  %v305_v18 = vld [vmem:[%s2797_s1 + $0x388] sm:$0xff]  ;;  %v236_v19 = vld [vmem:[%s2797_s1 + $0x160] sm:$0xff] }
  0x3d   : > { %559 = vmatpush.msrb.mxu1 %v1363_v35  ;;  %599 = vmatpush.msrb.mxu3 %v1364_v37  ;;  %v300_v20 = vld [vmem:[%s2797_s1 + $0x360] sm:$0xff]  ;;  %v237_v21 = vld [vmem:[%s2797_s1 + $0x168] sm:$0xff] }
  0x3e   : > { %540 = vmatpush.msrb.mxu0 %v1295_v38  ;;  %580 = vmatpush.msrb.mxu2 %v1296_v40  ;;  %v301_v22 = vld [vmem:[%s2797_s1 + $0x368] sm:$0xff]  ;;  %v232_v23 = vld [vmem:[%s2797_s1 + $0x140] sm:$0xff] }
  0x3f   : > { %560 = vmatpush.msrb.mxu1 %v1359_v39  ;;  %600 = vmatpush.msrb.mxu3 %v1360_v41  ;;  %v296_v24 = vld [vmem:[%s2797_s1 + $0x340] sm:$0xff]  ;;  %v233_v25 = vld [vmem:[%s2797_s1 + $0x148] sm:$0xff] }
  0x40   : > { %541 = vmatpush.msrb.mxu0 %v1291_v42  ;;  %581 = vmatpush.msrb.mxu2 %v1292_v44  ;;  %v297_v27 = vld [vmem:[%s2797_s1 + $0x348] sm:$0xff]  ;;  %v228_v28 = vld [vmem:[%s2797_s1 + $0x120] sm:$0xff] }
  0x41   : > { %561 = vmatpush.msrb.mxu1 %v1355_v43  ;;  %601 = vmatpush.msrb.mxu3 %v1356_v45  ;;  %v292_v30 = vld [vmem:[%s2797_s1 + $0x320] sm:$0xff]  ;;  %v229_v31 = vld [vmem:[%s2797_s1 + $0x128] sm:$0xff] }
  0x42   : > { %542 = vmatpush.msrb.mxu0 %v1287_v46  ;;  %582 = vmatpush.msrb.mxu2 %v1288_v48  ;;  %v293_v32 = vld [vmem:[%s2797_s1 + $0x328] sm:$0xff]  ;;  %v224_v33 = vld [vmem:[%s2797_s1 + $0x100] sm:$0xff] }
  0x43   : > { %562 = vmatpush.msrb.mxu1 %v1351_v47  ;;  %602 = vmatpush.msrb.mxu3 %v1352_v49  ;;  %v288_v34 = vld [vmem:[%s2797_s1 + $0x300] sm:$0xff]  ;;  %v225_v35 = vld [vmem:[%s2797_s1 + $0x108] sm:$0xff] }
  0x44   : > { %543 = vmatpush.msrb.mxu0 %v1283_v50  ;;  %583 = vmatpush.msrb.mxu2 %v1284_v52  ;;  %v289_v36 = vld [vmem:[%s2797_s1 + $0x308] sm:$0xff]  ;;  %v220_v37 = vld [vmem:[%s2797_s1 + $0xe0] sm:$0xff] }
  0x45   : > { %563 = vmatpush.msrb.mxu1 %v1347_v51  ;;  %603 = vmatpush.msrb.mxu3 %v1348_v53  ;;  %v284_v38 = vld [vmem:[%s2797_s1 + $0x2e0] sm:$0xff]  ;;  %v221_v39 = vld [vmem:[%s2797_s1 + $0xe8] sm:$0xff] }
  0x46   : > { %544 = vmatpush.msrb.mxu0 %v1279_v54  ;;  %584 = vmatpush.msrb.mxu2 %v1280_v56  ;;  %v285_v40 = vld [vmem:[%s2797_s1 + $0x2e8] sm:$0xff]  ;;  %v216_v41 = vld [vmem:[%s2797_s1 + $0xc0] sm:$0xff] }
  0x47   : > { %564 = vmatpush.msrb.mxu1 %v1343_v55  ;;  %604 = vmatpush.msrb.mxu3 %v1344_v57  ;;  %v280_v42 = vld [vmem:[%s2797_s1 + $0x2c0] sm:$0xff]  ;;  %v217_v43 = vld [vmem:[%s2797_s1 + $0xc8] sm:$0xff]  ;;  %v188_v57 = vld [vmem:[#allocation2 + $0x18] sm:$0x80] }
  0x48   : > { %545 = vmatpush.msrb.mxu0 %v1275_v58  ;;  %585 = vmatpush.msrb.mxu2 %v1276_v61  ;;  %v281_v44 = vld [vmem:[%s2797_s1 + $0x2c8] sm:$0xff]  ;;  %v212_v45 = vld [vmem:[%s2797_s1 + $0xa0] sm:$0xff] }
  0x49   : > { %565 = vmatpush.msrb.mxu1 %v1339_v59  ;;  %605 = vmatpush.msrb.mxu3 %v1340_v62  ;;  %v276_v46 = vld [vmem:[%s2797_s1 + $0x2a0] sm:$0xff]  ;;  %v213_v47 = vld [vmem:[%s2797_s1 + $0xa8] sm:$0xff] }
  0x4a   : > { %546 = vmatpush.msrb.mxu0 %v1271_v63  ;;  %586 = vmatpush.msrb.mxu2 %v1272_v1  ;;  %v277_v48 = vld [vmem:[%s2797_s1 + $0x2a8] sm:$0xff]  ;;  %v208_v49 = vld [vmem:[%s2797_s1 + $0x80] sm:$0xff] }
  0x4b   : > { %566 = vmatpush.msrb.mxu1 %v1335_v0  ;;  %606 = vmatpush.msrb.mxu3 %v1336_v2  ;;  %v272_v50 = vld [vmem:[%s2797_s1 + $0x280] sm:$0xff]  ;;  %v209_v51 = vld [vmem:[%s2797_s1 + $0x88] sm:$0xff]  ;;  %v616_v0 = vrot.slane %v188_v57, 7  ;;  %v215_v57 = vld [vmem:[%s2797_s1 + $0xb8] sm:$0xff] }
  0x4c   : > { %467 = vmatmul.f32.vlgmr.msra.gmra.mxu0 %v1860_v26  ;;  %487 = vmatmul.f32.vlgmr.msra.gmra.mxu1 %v1869_v29  ;;  %v273_v52 = vld [vmem:[%s2797_s1 + $0x288] sm:$0xff]  ;;  %v204_v53 = vld [vmem:[%s2797_s1 + $0x60] sm:$0xff] }
  0x4d   : > { %507 = vmatmul.f32.vlgmr.msra.gmra.mxu2 %v1860_v26  ;;  %527 = vmatmul.f32.vlgmr.msra.gmra.mxu3 %v1869_v29  ;;  %v268_v54 = vld [vmem:[%s2797_s1 + $0x260] sm:$0xff]  ;;  %v205_v55 = vld [vmem:[%s2797_s1 + $0x68] sm:$0xff] }
  0x4e   : > { %624 = vmatpush.msra.mxu0 %v252_v3  ;;  %644 = vmatpush.msra.mxu1 %v316_v4  ;;  %v269_v56 = vld [vmem:[%s2797_s1 + $0x268] sm:$0xff]  ;;  %v200_v59 = vld [vmem:[%s2797_s1 + $0x40] sm:$0xff]  ;;  %v191_v3 = vld [vmem:[#allocation2 + $0x10] sm:$0x7f] }
  0x4f   : > { %664 = vmatpush.msra.mxu2 %v253_v5  ;;  %684 = vmatpush.msra.mxu3 %v317_v6  ;;  %v190_v58 = vld [vmem:[#allocation2 + $0x28] sm:$0x7f]  ;;  %v264_v60 = vld [vmem:[%s2797_s1 + $0x240] sm:$0xff] }
  0x50   : > { %625 = vmatpush.msra.mxu0 %v248_v7  ;;  %645 = vmatpush.msra.mxu1 %v312_v8  ;;  %v201_v61 = vld [vmem:[%s2797_s1 + $0x48] sm:$0xff]  ;;  %v196_v62 = vld [vmem:[%s2797_s1 + $0x20] sm:$0xff]  ;;  %v617_v1 = vrot.slane %v190_v58, 7  ;;  %v279_v58 = vld [vmem:[%s2797_s1 + $0x2b8] sm:$0xff] }
  0x51   : > { %665 = vmatpush.msra.mxu2 %v249_v9  ;;  %685 = vmatpush.msra.mxu3 %v313_v10  ;;  %v260_v63 = vld [vmem:[%s2797_s1 + $0x220] sm:$0xff]  ;;  %v197_v4 = vld [vmem:[%s2797_s1 + $0x28] sm:$0xff]  ;;  %v620_v10 = vrot.slane %v191_v3, 7  ;;  %v266_v3 = vld [vmem:[%s2797_s1 + $0x250] sm:$0xff] }
  0x52   : > { %626 = vmatpush.msra.mxu0 %v244_v11  ;;  %646 = vmatpush.msra.mxu1 %v308_v12  ;;  %v189_v2 = vld [vmem:[#allocation2 + $0x20] sm:$0x80]  ;;  %v261_v5 = vld [vmem:[%s2797_s1 + $0x228] sm:$0xff]  ;;  %v2181_v11 = vsel %vm615_vm0, %v616_v0, %v617_v1  ;;  %v254_v12 = vld [vmem:[%s2797_s1 + $0x1f0] sm:$0xff] }
  0x53   : > { %666 = vmatpush.msra.mxu2 %v245_v13  ;;  %686 = vmatpush.msra.mxu3 %v309_v14  ;;  %v256_v6 = vld [vmem:[%s2797_s1 + $0x200] sm:$0xff]  ;;  %v193_v7 = vld [vmem:[%s2797_s1 + $0x8] sm:$0xff]  ;;  %v619_v9 = vrot.slane %v189_v2, 7  ;;  %v318_v13 = vld [vmem:[%s2797_s1 + $0x3f0] sm:$0xff] }
  0x54   : > { %627 = vmatpush.msra.mxu0 %v240_v15  ;;  %647 = vmatpush.msra.mxu1 %v304_v16  ;;  %v257_v8 = vld [vmem:[%s2797_s1 + $0x208] sm:$0xff]  ;;  %v255_v14 = vld [vmem:[%s2797_s1 + $0x1f8] sm:$0xff]  ;;  %v202_v2 = vld [vmem:[%s2797_s1 + $0x50] sm:$0xff] }
  0x55   : > { %667 = vmatpush.msra.mxu2 %v241_v17  ;;  %687 = vmatpush.msra.mxu3 %v305_v18  ;;  %v319_v15 = vld [vmem:[%s2797_s1 + $0x3f8] sm:$0xff]  ;;  %v2198_v16 = vsel %vm615_vm0, %v619_v9, %v620_v10  ;;  %v250_v17 = vld [vmem:[%s2797_s1 + $0x1d0] sm:$0xff] }
  0x56   : > { %628 = vmatpush.msra.mxu0 %v236_v19  ;;  %648 = vmatpush.msra.mxu1 %v300_v20  ;;  %v314_v18 = vld [vmem:[%s2797_s1 + $0x3d0] sm:$0xff]  ;;  %v251_v19 = vld [vmem:[%s2797_s1 + $0x1d8] sm:$0xff] }
  0x57   : > { %668 = vmatpush.msra.mxu2 %v237_v21  ;;  %688 = vmatpush.msra.mxu3 %v301_v22  ;;  %v315_v20 = vld [vmem:[%s2797_s1 + $0x3d8] sm:$0xff]  ;;  %v246_v21 = vld [vmem:[%s2797_s1 + $0x1b0] sm:$0xff] }
  0x58   : > { %629 = vmatpush.msra.mxu0 %v232_v23  ;;  %649 = vmatpush.msra.mxu1 %v296_v24  ;;  %v310_v22 = vld [vmem:[%s2797_s1 + $0x3b0] sm:$0xff]  ;;  %v247_v23 = vld [vmem:[%s2797_s1 + $0x1b8] sm:$0xff] }
  0x59   : > { %669 = vmatpush.msra.mxu2 %v233_v25  ;;  %689 = vmatpush.msra.mxu3 %v297_v27  ;;  %v311_v24 = vld [vmem:[%s2797_s1 + $0x3b8] sm:$0xff]  ;;  %v242_v25 = vld [vmem:[%s2797_s1 + $0x190] sm:$0xff] }
  0x5a   : > { %630 = vmatpush.msra.mxu0 %v228_v28  ;;  %650 = vmatpush.msra.mxu1 %v292_v30  ;;  %v306_v27 = vld [vmem:[%s2797_s1 + $0x390] sm:$0xff]  ;;  %v243_v28 = vld [vmem:[%s2797_s1 + $0x198] sm:$0xff] }
  0x5b   : > { %670 = vmatpush.msra.mxu2 %v229_v31  ;;  %690 = vmatpush.msra.mxu3 %v293_v32  ;;  %v307_v30 = vld [vmem:[%s2797_s1 + $0x398] sm:$0xff]  ;;  %v238_v31 = vld [vmem:[%s2797_s1 + $0x170] sm:$0xff] }
  0x5c   : > { %631 = vmatpush.msra.mxu0 %v224_v33  ;;  %651 = vmatpush.msra.mxu1 %v288_v34  ;;  %v302_v32 = vld [vmem:[%s2797_s1 + $0x370] sm:$0xff]  ;;  %v239_v33 = vld [vmem:[%s2797_s1 + $0x178] sm:$0xff] }
  0x5d   : > { %671 = vmatpush.msra.mxu2 %v225_v35  ;;  %691 = vmatpush.msra.mxu3 %v289_v36  ;;  %v303_v34 = vld [vmem:[%s2797_s1 + $0x378] sm:$0xff]  ;;  %v234_v35 = vld [vmem:[%s2797_s1 + $0x150] sm:$0xff] }
  0x5e   : > { %632 = vmatpush.msra.mxu0 %v220_v37  ;;  %652 = vmatpush.msra.mxu1 %v284_v38  ;;  %v298_v36 = vld [vmem:[%s2797_s1 + $0x350] sm:$0xff]  ;;  %v235_v37 = vld [vmem:[%s2797_s1 + $0x158] sm:$0xff] }
  0x5f   : > { %672 = vmatpush.msra.mxu2 %v221_v39  ;;  %692 = vmatpush.msra.mxu3 %v285_v40  ;;  %v299_v38 = vld [vmem:[%s2797_s1 + $0x358] sm:$0xff]  ;;  %v230_v39 = vld [vmem:[%s2797_s1 + $0x130] sm:$0xff] }
  0x60   : > { %633 = vmatpush.msra.mxu0 %v216_v41  ;;  %653 = vmatpush.msra.mxu1 %v280_v42  ;;  %v294_v40 = vld [vmem:[%s2797_s1 + $0x330] sm:$0xff]  ;;  %v231_v41 = vld [vmem:[%s2797_s1 + $0x138] sm:$0xff] }
  0x61   : > { %673 = vmatpush.msra.mxu2 %v217_v43  ;;  %693 = vmatpush.msra.mxu3 %v281_v44  ;;  %v295_v42 = vld [vmem:[%s2797_s1 + $0x338] sm:$0xff]  ;;  %v226_v43 = vld [vmem:[%s2797_s1 + $0x110] sm:$0xff] }
  0x62   : > { %634 = vmatpush.msra.mxu0 %v212_v45  ;;  %654 = vmatpush.msra.mxu1 %v276_v46  ;;  %v290_v44 = vld [vmem:[%s2797_s1 + $0x310] sm:$0xff]  ;;  %v227_v45 = vld [vmem:[%s2797_s1 + $0x118] sm:$0xff] }
  0x63   : > { %674 = vmatpush.msra.mxu2 %v213_v47  ;;  %694 = vmatpush.msra.mxu3 %v277_v48  ;;  %v291_v46 = vld [vmem:[%s2797_s1 + $0x318] sm:$0xff]  ;;  %v222_v47 = vld [vmem:[%s2797_s1 + $0xf0] sm:$0xff] }
  0x64   : > { %635 = vmatpush.msra.mxu0 %v208_v49  ;;  %655 = vmatpush.msra.mxu1 %v272_v50  ;;  %v286_v48 = vld [vmem:[%s2797_s1 + $0x2f0] sm:$0xff]  ;;  %v223_v49 = vld [vmem:[%s2797_s1 + $0xf8] sm:$0xff] }
  0x65   : > { %675 = vmatpush.msra.mxu2 %v209_v51  ;;  %695 = vmatpush.msra.mxu3 %v273_v52  ;;  %v287_v50 = vld [vmem:[%s2797_s1 + $0x2f8] sm:$0xff]  ;;  %v218_v51 = vld [vmem:[%s2797_s1 + $0xd0] sm:$0xff] }
  0x66   : > { %547 = vmatmul.f32.vlgmr.msrb.gmra.mxu0 %v1860_v26  ;;  %587 = vmatmul.f32.vlgmr.msrb.gmra.mxu2 %v1860_v26  ;;  %v265_v26 = vld [vmem:[%s2797_s1 + $0x248] sm:$0xff]  ;;  %v282_v52 = vld [vmem:[%s2797_s1 + $0x2d0] sm:$0xff]  ;;  %v207_v0 = vld [vmem:[%s2797_s1 + $0x78] sm:$0xff] }
  0x67   : > { %636 = vmatpush.msra.mxu0 %v204_v53  ;;  %656 = vmatpush.msra.mxu1 %v268_v54  ;;  %v219_v53 = vld [vmem:[%s2797_s1 + $0xd8] sm:$0xff]  ;;  %v194_v9 = vld [vmem:[%s2797_s1 + $0x10] sm:$0xff] }
  0x68   : > { %676 = vmatpush.msra.mxu2 %v205_v55  ;;  %696 = vmatpush.msra.mxu3 %v269_v56  ;;  %v283_v54 = vld [vmem:[%s2797_s1 + $0x2d8] sm:$0xff]  ;;  %v214_v55 = vld [vmem:[%s2797_s1 + $0xb0] sm:$0xff] }
  0x69   : > { %567 = vmatmul.f32.vlgmr.msrb.gmra.mxu1 %v1869_v29  ;;  %607 = vmatmul.f32.vlgmr.msrb.gmra.mxu3 %v1869_v29  ;;  %v192_v29 = vld [vmem:[%s2797_s1] sm:$0xff]  ;;  %v278_v56 = vld [vmem:[%s2797_s1 + $0x2b0] sm:$0xff]  ;;  %v271_v1 = vld [vmem:[%s2797_s1 + $0x278] sm:$0xff] }
  0x6a   : > { %637 = vmatpush.msra.mxu0 %v200_v59  ;;  %657 = vmatpush.msra.mxu1 %v264_v60  ;;  %v210_v59 = vld [vmem:[%s2797_s1 + $0x90] sm:$0xff] }
  0x6b   : > { %677 = vmatpush.msra.mxu2 %v201_v61  ;;  %697 = vmatpush.msra.mxu3 %v265_v26  ;;  %v274_v60 = vld [vmem:[%s2797_s1 + $0x290] sm:$0xff]  ;;  %v211_v61 = vld [vmem:[%s2797_s1 + $0x98] sm:$0xff] }
  0x6c   : > { %638 = vmatpush.msra.mxu0 %v196_v62  ;;  %658 = vmatpush.msra.mxu1 %v260_v63  ;;  %v275_v26 = vld [vmem:[%s2797_s1 + $0x298] sm:$0xff]  ;;  %v206_v62 = vld [vmem:[%s2797_s1 + $0x70] sm:$0xff] }
  0x6d   : > { %678 = vmatpush.msra.mxu2 %v197_v4  ;;  %698 = vmatpush.msra.mxu3 %v261_v5  ;;  %v270_v63 = vld [vmem:[%s2797_s1 + $0x270] sm:$0xff]  ;;  %v203_v4 = vld [vmem:[%s2797_s1 + $0x58] sm:$0xff] }
  0x6e   : > { %639 = vmatpush.msra.mxu0 %v192_v29  ;;  %659 = vmatpush.msra.mxu1 %v256_v6  ;;  %v267_v5 = vld [vmem:[%s2797_s1 + $0x258] sm:$0xff]  ;;  %v198_v29 = vld [vmem:[%s2797_s1 + $0x30] sm:$0xff] }
  0x6f   : > { %679 = vmatpush.msra.mxu2 %v193_v7  ;;  %699 = vmatpush.msra.mxu3 %v257_v8  ;;  %v262_v6 = vld [vmem:[%s2797_s1 + $0x230] sm:$0xff]  ;;  %v199_v7 = vld [vmem:[%s2797_s1 + $0x38] sm:$0xff] }
  0x70   : > { %640 = vmatmul.f32.vlgmr.msra.gmra.mxu0 %v2181_v11  ;;  %680 = vmatmul.f32.vlgmr.msra.gmra.mxu2 %v2181_v11  ;;  %v263_v8 = vld [vmem:[%s2797_s1 + $0x238] sm:$0xff]  ;;  %v258_v10 = vld [vmem:[%s2797_s1 + $0x210] sm:$0xff] }
  0x71   : > { %704 = vmatpush.msrb.mxu0 %v254_v12  ;;  %724 = vmatpush.msrb.mxu1 %v318_v13  ;;  %v195_v12 = vld [vmem:[%s2797_s1 + $0x18] sm:$0xff] }
  0x72   : > { %744 = vmatpush.msrb.mxu2 %v255_v14  ;;  %764 = vmatpush.msrb.mxu3 %v319_v15  ;;  %v259_v13 = vld [vmem:[%s2797_s1 + $0x218] sm:$0xff]  ;;  %v1457_v14 = vld [vmem:[%s2797_s1 + $0x9e0] sm:$0xff] }
  0x73   : > { %660 = vmatmul.f32.vlgmr.msra.gmra.mxu1 %v2198_v16  ;;  %700 = vmatmul.f32.vlgmr.msra.gmra.mxu3 %v2198_v16  ;;  %v1521_v15 = vld [vmem:[%s2797_s1 + $0xbe0] sm:$0xff] }
  0x74   : > { %705 = vmatpush.msrb.mxu0 %v250_v17  ;;  %725 = vmatpush.msrb.mxu1 %v314_v18  ;;  %v1458_v17 = vld [vmem:[%s2797_s1 + $0x9e8] sm:$0xff] }
  0x75   : > { %745 = vmatpush.msrb.mxu2 %v251_v19  ;;  %765 = vmatpush.msrb.mxu3 %v315_v20  ;;  %v1522_v18 = vld [vmem:[%s2797_s1 + $0xbe8] sm:$0xff]  ;;  %v1453_v19 = vld [vmem:[%s2797_s1 + $0x9c0] sm:$0xff] }
  0x76   : > { %706 = vmatpush.msrb.mxu0 %v246_v21  ;;  %726 = vmatpush.msrb.mxu1 %v310_v22  ;;  %v1517_v20 = vld [vmem:[%s2797_s1 + $0xbc0] sm:$0xff]  ;;  %v1454_v21 = vld [vmem:[%s2797_s1 + $0x9c8] sm:$0xff] }
  0x77   : > { %746 = vmatpush.msrb.mxu2 %v247_v23  ;;  %766 = vmatpush.msrb.mxu3 %v311_v24  ;;  %v1449_v22 = vld [vmem:[%s2797_s1 + $0x9a0] sm:$0xff]  ;;  %v1450_v24 = vld [vmem:[%s2797_s1 + $0x9a8] sm:$0xff] }
  0x78   : > { %707 = vmatpush.msrb.mxu0 %v242_v25  ;;  %727 = vmatpush.msrb.mxu1 %v306_v27  ;;  %v1513_v23 = vld [vmem:[%s2797_s1 + $0xba0] sm:$0xff]  ;;  %v1514_v25 = vld [vmem:[%s2797_s1 + $0xba8] sm:$0xff] }
  0x79   : > { %747 = vmatpush.msrb.mxu2 %v243_v28  ;;  %767 = vmatpush.msrb.mxu3 %v307_v30  ;;  %v1509_v27 = vld [vmem:[%s2797_s1 + $0xb80] sm:$0xff]  ;;  %v1446_v28 = vld [vmem:[%s2797_s1 + $0x988] sm:$0xff] }
  0x7a   : > { %708 = vmatpush.msrb.mxu0 %v238_v31  ;;  %728 = vmatpush.msrb.mxu1 %v302_v32  ;;  %v1510_v30 = vld [vmem:[%s2797_s1 + $0xb88] sm:$0xff]  ;;  %v1441_v31 = vld [vmem:[%s2797_s1 + $0x960] sm:$0xff] }
  0x7b   : > { %748 = vmatpush.msrb.mxu2 %v239_v33  ;;  %768 = vmatpush.msrb.mxu3 %v303_v34  ;;  %v1505_v32 = vld [vmem:[%s2797_s1 + $0xb60] sm:$0xff]  ;;  %v1442_v33 = vld [vmem:[%s2797_s1 + $0x968] sm:$0xff] }
  0x7c   : > { %709 = vmatpush.msrb.mxu0 %v234_v35  ;;  %729 = vmatpush.msrb.mxu1 %v298_v36  ;;  %v1506_v34 = vld [vmem:[%s2797_s1 + $0xb68] sm:$0xff]  ;;  %v1437_v35 = vld [vmem:[%s2797_s1 + $0x940] sm:$0xff] }
  0x7d   : > { %749 = vmatpush.msrb.mxu2 %v235_v37  ;;  %769 = vmatpush.msrb.mxu3 %v299_v38  ;;  %v1501_v36 = vld [vmem:[%s2797_s1 + $0xb40] sm:$0xff]  ;;  %v1438_v37 = vld [vmem:[%s2797_s1 + $0x948] sm:$0xff] }
  0x7e   : > { %710 = vmatpush.msrb.mxu0 %v230_v39  ;;  %730 = vmatpush.msrb.mxu1 %v294_v40  ;;  %v1502_v38 = vld [vmem:[%s2797_s1 + $0xb48] sm:$0xff]  ;;  %v1433_v39 = vld [vmem:[%s2797_s1 + $0x920] sm:$0xff] }
  0x7f   : > { %750 = vmatpush.msrb.mxu2 %v231_v41  ;;  %770 = vmatpush.msrb.mxu3 %v295_v42  ;;  %v1497_v40 = vld [vmem:[%s2797_s1 + $0xb20] sm:$0xff]  ;;  %v1434_v41 = vld [vmem:[%s2797_s1 + $0x928] sm:$0xff] }
  0x80   : > { %711 = vmatpush.msrb.mxu0 %v226_v43  ;;  %731 = vmatpush.msrb.mxu1 %v290_v44  ;;  %v1498_v42 = vld [vmem:[%s2797_s1 + $0xb28] sm:$0xff]  ;;  %v1429_v43 = vld [vmem:[%s2797_s1 + $0x900] sm:$0xff] }
  0x81   : > { %751 = vmatpush.msrb.mxu2 %v227_v45  ;;  %771 = vmatpush.msrb.mxu3 %v291_v46  ;;  %v1493_v44 = vld [vmem:[%s2797_s1 + $0xb00] sm:$0xff]  ;;  %v1430_v45 = vld [vmem:[%s2797_s1 + $0x908] sm:$0xff] }
  0x82   : > { %712 = vmatpush.msrb.mxu0 %v222_v47  ;;  %732 = vmatpush.msrb.mxu1 %v286_v48  ;;  %v1494_v46 = vld [vmem:[%s2797_s1 + $0xb08] sm:$0xff]  ;;  %v1425_v47 = vld [vmem:[%s2797_s1 + $0x8e0] sm:$0xff] }
  0x83   : > { %752 = vmatpush.msrb.mxu2 %v223_v49  ;;  %772 = vmatpush.msrb.mxu3 %v287_v50  ;;  %v1489_v48 = vld [vmem:[%s2797_s1 + $0xae0] sm:$0xff]  ;;  %v1426_v49 = vld [vmem:[%s2797_s1 + $0x8e8] sm:$0xff] }
  0x84   : > { %713 = vmatpush.msrb.mxu0 %v218_v51  ;;  %733 = vmatpush.msrb.mxu1 %v282_v52  ;;  %v1490_v50 = vld [vmem:[%s2797_s1 + $0xae8] sm:$0xff]  ;;  %v1421_v51 = vld [vmem:[%s2797_s1 + $0x8c0] sm:$0xff] }
  0x85   : > { %753 = vmatpush.msrb.mxu2 %v219_v53  ;;  %773 = vmatpush.msrb.mxu3 %v283_v54  ;;  %v1485_v52 = vld [vmem:[%s2797_s1 + $0xac0] sm:$0xff]  ;;  %v1422_v53 = vld [vmem:[%s2797_s1 + $0x8c8] sm:$0xff] }
  0x86   : > { %714 = vmatpush.msrb.mxu0 %v214_v55  ;;  %734 = vmatpush.msrb.mxu1 %v278_v56  ;;  %v1486_v54 = vld [vmem:[%s2797_s1 + $0xac8] sm:$0xff]  ;;  %v1417_v55 = vld [vmem:[%s2797_s1 + $0x8a0] sm:$0xff] }
  0x87   : > { %754 = vmatpush.msrb.mxu2 %v215_v57  ;;  %774 = vmatpush.msrb.mxu3 %v279_v58  ;;  %v1481_v56 = vld [vmem:[%s2797_s1 + $0xaa0] sm:$0xff]  ;;  %v1418_v57 = vld [vmem:[%s2797_s1 + $0x8a8] sm:$0xff] }
  0x88   : > { %715 = vmatpush.msrb.mxu0 %v210_v59  ;;  %735 = vmatpush.msrb.mxu1 %v274_v60  ;;  %v1482_v58 = vld [vmem:[%s2797_s1 + $0xaa8] sm:$0xff]  ;;  %v1413_v59 = vld [vmem:[%s2797_s1 + $0x880] sm:$0xff] }
  0x89   : > { %755 = vmatpush.msrb.mxu2 %v211_v61  ;;  %775 = vmatpush.msrb.mxu3 %v275_v26  ;;  %v1477_v60 = vld [vmem:[%s2797_s1 + $0xa80] sm:$0xff]  ;;  %v1414_v61 = vld [vmem:[%s2797_s1 + $0x888] sm:$0xff] }
  0x8a   : > { %716 = vmatpush.msrb.mxu0 %v206_v62  ;;  %736 = vmatpush.msrb.mxu1 %v270_v63  ;;  %v1478_v26 = vld [vmem:[%s2797_s1 + $0xa88] sm:$0xff]  ;;  %v1409_v62 = vld [vmem:[%s2797_s1 + $0x860] sm:$0xff] }
  0x8b   : > { %756 = vmatpush.msrb.mxu2 %v207_v0  ;;  %776 = vmatpush.msrb.mxu3 %v271_v1  ;;  %v1473_v63 = vld [vmem:[%s2797_s1 + $0xa60] sm:$0xff]  ;;  %v1410_v0 = vld [vmem:[%s2797_s1 + $0x868] sm:$0xff] }
  0x8c   : > { %717 = vmatpush.msrb.mxu0 %v202_v2  ;;  %737 = vmatpush.msrb.mxu1 %v266_v3  ;;  %v1474_v1 = vld [vmem:[%s2797_s1 + $0xa68] sm:$0xff] }
  0x8d   : > { %757 = vmatpush.msrb.mxu2 %v203_v4  ;;  %777 = vmatpush.msrb.mxu3 %v267_v5  ;;  %v784_v2 = vld [vmem:[#allocation2 + $0x28] sm:$0xfe]  ;;  %v786_v3 = vld [vmem:[#allocation2 + $0x8] sm:$0x1]  ;;  %v785_v4 = vld [vmem:[#allocation2 + $0x10] sm:$0xfe] }
  0x8e   : > { %718 = vmatpush.msrb.mxu0 %v198_v29  ;;  %738 = vmatpush.msrb.mxu1 %v262_v6  ;;  %v787_v5 = vld [vmem:[#allocation2] sm:$0x1] }
  0x8f   : > { %758 = vmatpush.msrb.mxu2 %v199_v7  ;;  %778 = vmatpush.msrb.mxu3 %v263_v8  ;;  %v1405_v29 = vld [vmem:[%s2797_s1 + $0x840] sm:$0xff]  ;;  %v1406_v7 = vld [vmem:[%s2797_s1 + $0x848] sm:$0xff] }
  0x90   : > { %719 = vmatpush.msrb.mxu0 %v194_v9  ;;  %739 = vmatpush.msrb.mxu1 %v258_v10  ;;  %v1469_v6 = vld [vmem:[%s2797_s1 + $0xa40] sm:$0xff]  ;;  %v1470_v8 = vld [vmem:[%s2797_s1 + $0xa48] sm:$0xff] }
  0x91   : > { %759 = vmatpush.msrb.mxu2 %v195_v12  ;;  %779 = vmatpush.msrb.mxu3 %v259_v13  ;;  %v1401_v9 = vld [vmem:[%s2797_s1 + $0x820] sm:$0xff]  ;;  %v922_v12 = vrot.slane %v784_v2, 1  ;;  %v923_v13 = vrot.slane %v786_v3, 1  ;;  %v1420_v2 = vld [vmem:[%s2797_s1 + $0x8b8] sm:$0xff] }
  0x92   : > { %720 = vmatmul.f32.vlgmr.msrb.gmra.mxu0 %v2181_v11  ;;  %760 = vmatmul.f32.vlgmr.msrb.gmra.mxu2 %v2181_v11  ;;  %v1518_v11 = vld [vmem:[%s2797_s1 + $0xbc8] sm:$0xff]  ;;  %v1465_v10 = vld [vmem:[%s2797_s1 + $0xa20] sm:$0xff]  ;;  %v1484_v3 = vld [vmem:[%s2797_s1 + $0xab8] sm:$0xff] }
  0x93   : > { %930 = vmatpush.msra.mxu0 %v1457_v14  ;;  %950 = vmatpush.msra.mxu1 %v1521_v15  ;;  %v925_v14 = vrot.slane %v785_v4, 1  ;;  %v926_v15 = vrot.slane %v787_v5, 1  ;;  %v1415_v4 = vld [vmem:[%s2797_s1 + $0x890] sm:$0xff] }
  0x94   : > { %970 = vmatpush.msra.mxu2 %v1458_v17  ;;  %990 = vmatpush.msra.mxu3 %v1522_v18  ;;  %v1402_v17 = vld [vmem:[%s2797_s1 + $0x828] sm:$0xff]  ;;  %v1479_v5 = vld [vmem:[%s2797_s1 + $0xa90] sm:$0xff] }
  0x95   : > { %740 = vmatmul.f32.vlgmr.msrb.gmra.mxu1 %v2198_v16  ;;  %780 = vmatmul.f32.vlgmr.msrb.gmra.mxu3 %v2198_v16  ;;  %v1445_v16 = vld [vmem:[%s2797_s1 + $0x980] sm:$0xff]  ;;  %v1466_v18 = vld [vmem:[%s2797_s1 + $0xa28] sm:$0xff] }
  0x96   : > { %931 = vmatpush.msra.mxu0 %v1453_v19  ;;  %951 = vmatpush.msra.mxu1 %v1517_v20  ;;  %v1397_v19 = vld [vmem:[%s2797_s1 + $0x800] sm:$0xff] }
  0x97   : > { %971 = vmatpush.msra.mxu2 %v1454_v21  ;;  %991 = vmatpush.msra.mxu3 %v1518_v11  ;;  %v1461_v20 = vld [vmem:[%s2797_s1 + $0xa00] sm:$0xff]  ;;  %v1398_v21 = vld [vmem:[%s2797_s1 + $0x808] sm:$0xff] }
  0x98   : > { %932 = vmatpush.msra.mxu0 %v1449_v22  ;;  %952 = vmatpush.msra.mxu1 %v1513_v23  ;;  %v1462_v11 = vld [vmem:[%s2797_s1 + $0xa08] sm:$0xff]  ;;  %v2578_v22 = vsel %vm921_vm1, %v922_v12, %v923_v13  ;;  %v2580_v23 = vsel %vm921_vm1, %v925_v14, %v926_v15  ;;  %v1407_v12 = vld [vmem:[%s2797_s1 + $0x850] sm:$0xff]  ;;  %v1408_v14 = vld [vmem:[%s2797_s1 + $0x858] sm:$0xff] }
  0x99   : > { %972 = vmatpush.msra.mxu2 %v1450_v24  ;;  %992 = vmatpush.msra.mxu3 %v1514_v25  ;;  %v1459_v24 = vld [vmem:[%s2797_s1 + $0x9f0] sm:$0xff]  ;;  %v1472_v15 = vld [vmem:[%s2797_s1 + $0xa58] sm:$0xff] }
  0x9a   : > { %933 = vmatpush.msra.mxu0 %v1445_v16  ;;  %953 = vmatpush.msra.mxu1 %v1509_v27  ;;  %v1523_v25 = vld [vmem:[%s2797_s1 + $0xbf0] sm:$0xff]  ;;  %v1460_v16 = vld [vmem:[%s2797_s1 + $0x9f8] sm:$0xff] }
  0x9b   : > { %973 = vmatpush.msra.mxu2 %v1446_v28  ;;  %993 = vmatpush.msra.mxu3 %v1510_v30  ;;  %v1524_v27 = vld [vmem:[%s2797_s1 + $0xbf8] sm:$0xff]  ;;  %v1455_v28 = vld [vmem:[%s2797_s1 + $0x9d0] sm:$0xff] }
  0x9c   : > { %934 = vmatpush.msra.mxu0 %v1441_v31  ;;  %954 = vmatpush.msra.mxu1 %v1505_v32  ;;  %v1519_v30 = vld [vmem:[%s2797_s1 + $0xbd0] sm:$0xff]  ;;  %v1456_v31 = vld [vmem:[%s2797_s1 + $0x9d8] sm:$0xff] }
  0x9d   : > { %974 = vmatpush.msra.mxu2 %v1442_v33  ;;  %994 = vmatpush.msra.mxu3 %v1506_v34  ;;  %v1520_v32 = vld [vmem:[%s2797_s1 + $0xbd8] sm:$0xff]  ;;  %v1451_v33 = vld [vmem:[%s2797_s1 + $0x9b0] sm:$0xff] }
  0x9e   : > { %935 = vmatpush.msra.mxu0 %v1437_v35  ;;  %955 = vmatpush.msra.mxu1 %v1501_v36  ;;  %v1515_v34 = vld [vmem:[%s2797_s1 + $0xbb0] sm:$0xff]  ;;  %v1452_v35 = vld [vmem:[%s2797_s1 + $0x9b8] sm:$0xff] }
  0x9f   : > { %975 = vmatpush.msra.mxu2 %v1438_v37  ;;  %995 = vmatpush.msra.mxu3 %v1502_v38  ;;  %v1516_v36 = vld [vmem:[%s2797_s1 + $0xbb8] sm:$0xff]  ;;  %v1447_v37 = vld [vmem:[%s2797_s1 + $0x990] sm:$0xff] }
  0xa0   : > { %936 = vmatpush.msra.mxu0 %v1433_v39  ;;  %956 = vmatpush.msra.mxu1 %v1497_v40  ;;  %v1511_v38 = vld [vmem:[%s2797_s1 + $0xb90] sm:$0xff]  ;;  %v1448_v39 = vld [vmem:[%s2797_s1 + $0x998] sm:$0xff] }
  0xa1   : > { %976 = vmatpush.msra.mxu2 %v1434_v41  ;;  %996 = vmatpush.msra.mxu3 %v1498_v42  ;;  %v1512_v40 = vld [vmem:[%s2797_s1 + $0xb98] sm:$0xff]  ;;  %v1443_v41 = vld [vmem:[%s2797_s1 + $0x970] sm:$0xff] }
  0xa2   : > { %937 = vmatpush.msra.mxu0 %v1429_v43  ;;  %957 = vmatpush.msra.mxu1 %v1493_v44  ;;  %v1507_v42 = vld [vmem:[%s2797_s1 + $0xb70] sm:$0xff]  ;;  %v1444_v43 = vld [vmem:[%s2797_s1 + $0x978] sm:$0xff] }
  0xa3   : > { %977 = vmatpush.msra.mxu2 %v1430_v45  ;;  %997 = vmatpush.msra.mxu3 %v1494_v46  ;;  %v1508_v44 = vld [vmem:[%s2797_s1 + $0xb78] sm:$0xff]  ;;  %v1439_v45 = vld [vmem:[%s2797_s1 + $0x950] sm:$0xff] }
  0xa4   : > { %938 = vmatpush.msra.mxu0 %v1425_v47  ;;  %958 = vmatpush.msra.mxu1 %v1489_v48  ;;  %v1503_v46 = vld [vmem:[%s2797_s1 + $0xb50] sm:$0xff]  ;;  %v1440_v47 = vld [vmem:[%s2797_s1 + $0x958] sm:$0xff] }
  0xa5   : > { %978 = vmatpush.msra.mxu2 %v1426_v49  ;;  %998 = vmatpush.msra.mxu3 %v1490_v50  ;;  %v1504_v48 = vld [vmem:[%s2797_s1 + $0xb58] sm:$0xff]  ;;  %v1435_v49 = vld [vmem:[%s2797_s1 + $0x930] sm:$0xff] }
  0xa6   : > { %939 = vmatpush.msra.mxu0 %v1421_v51  ;;  %959 = vmatpush.msra.mxu1 %v1485_v52  ;;  %v1499_v50 = vld [vmem:[%s2797_s1 + $0xb30] sm:$0xff]  ;;  %v1436_v51 = vld [vmem:[%s2797_s1 + $0x938] sm:$0xff] }
  0xa7   : > { %979 = vmatpush.msra.mxu2 %v1422_v53  ;;  %999 = vmatpush.msra.mxu3 %v1486_v54  ;;  %v1500_v52 = vld [vmem:[%s2797_s1 + $0xb38] sm:$0xff]  ;;  %v1431_v53 = vld [vmem:[%s2797_s1 + $0x910] sm:$0xff] }
  0xa8   : > { %940 = vmatpush.msra.mxu0 %v1417_v55  ;;  %960 = vmatpush.msra.mxu1 %v1481_v56  ;;  %v1495_v54 = vld [vmem:[%s2797_s1 + $0xb10] sm:$0xff]  ;;  %v1432_v55 = vld [vmem:[%s2797_s1 + $0x918] sm:$0xff] }
  0xa9   : > { %980 = vmatpush.msra.mxu2 %v1418_v57  ;;  %1000 = vmatpush.msra.mxu3 %v1482_v58  ;;  %v1496_v56 = vld [vmem:[%s2797_s1 + $0xb18] sm:$0xff]  ;;  %v1427_v57 = vld [vmem:[%s2797_s1 + $0x8f0] sm:$0xff] }
  0xaa   : > { %941 = vmatpush.msra.mxu0 %v1413_v59  ;;  %961 = vmatpush.msra.mxu1 %v1477_v60  ;;  %v1491_v58 = vld [vmem:[%s2797_s1 + $0xaf0] sm:$0xff]  ;;  %v1428_v59 = vld [vmem:[%s2797_s1 + $0x8f8] sm:$0xff] }
  0xab   : > { %981 = vmatpush.msra.mxu2 %v1414_v61  ;;  %1001 = vmatpush.msra.mxu3 %v1478_v26  ;;  %v1492_v60 = vld [vmem:[%s2797_s1 + $0xaf8] sm:$0xff]  ;;  %v1423_v61 = vld [vmem:[%s2797_s1 + $0x8d0] sm:$0xff] }
  0xac   : > { %942 = vmatpush.msra.mxu0 %v1409_v62  ;;  %962 = vmatpush.msra.mxu1 %v1473_v63  ;;  %v1487_v26 = vld [vmem:[%s2797_s1 + $0xad0] sm:$0xff]  ;;  %v1424_v62 = vld [vmem:[%s2797_s1 + $0x8d8] sm:$0xff] }
  0xad   : > { %982 = vmatpush.msra.mxu2 %v1410_v0  ;;  %1002 = vmatpush.msra.mxu3 %v1474_v1  ;;  %v1488_v63 = vld [vmem:[%s2797_s1 + $0xad8] sm:$0xff]  ;;  %v1419_v0 = vld [vmem:[%s2797_s1 + $0x8b0] sm:$0xff] }
  0xae   : > { %943 = vmatpush.msra.mxu0 %v1405_v29  ;;  %963 = vmatpush.msra.mxu1 %v1469_v6  ;;  %v1483_v1 = vld [vmem:[%s2797_s1 + $0xab0] sm:$0xff]  ;;  %v1416_v29 = vld [vmem:[%s2797_s1 + $0x898] sm:$0xff] }
  0xaf   : > { %983 = vmatpush.msra.mxu2 %v1406_v7  ;;  %1003 = vmatpush.msra.mxu3 %v1470_v8  ;;  %v1480_v6 = vld [vmem:[%s2797_s1 + $0xa98] sm:$0xff]  ;;  %v1411_v7 = vld [vmem:[%s2797_s1 + $0x870] sm:$0xff] }
  0xb0   : > { %944 = vmatpush.msra.mxu0 %v1401_v9  ;;  %964 = vmatpush.msra.mxu1 %v1465_v10  ;;  %v1475_v8 = vld [vmem:[%s2797_s1 + $0xa70] sm:$0xff]  ;;  %v1412_v9 = vld [vmem:[%s2797_s1 + $0x878] sm:$0xff] }
  0xb1   : > { %984 = vmatpush.msra.mxu2 %v1402_v17  ;;  %1004 = vmatpush.msra.mxu3 %v1466_v18  ;;  %v1476_v10 = vld [vmem:[%s2797_s1 + $0xa78] sm:$0xff]  ;;  %v1471_v13 = vld [vmem:[%s2797_s1 + $0xa50] sm:$0xff] }
  0xb2   : > { %945 = vmatpush.msra.mxu0 %v1397_v19  ;;  %965 = vmatpush.msra.mxu1 %v1461_v20  ;;  %v1403_v17 = vld [vmem:[%s2797_s1 + $0x830] sm:$0xff]  ;;  %v1404_v19 = vld [vmem:[%s2797_s1 + $0x838] sm:$0xff] }
  0xb3   : > { %985 = vmatpush.msra.mxu2 %v1398_v21  ;;  %1005 = vmatpush.msra.mxu3 %v1462_v11  ;;  %v1467_v18 = vld [vmem:[%s2797_s1 + $0xa30] sm:$0xff]  ;;  %v1468_v20 = vld [vmem:[%s2797_s1 + $0xa38] sm:$0xff] }
  0xb4   : > { %946 = vmatmul.f32.vlgmr.msra.gmra.mxu0 %v2578_v22  ;;  %966 = vmatmul.f32.vlgmr.msra.gmra.mxu1 %v2580_v23  ;;  %v1399_v21 = vld [vmem:[%s2797_s1 + $0x810] sm:$0xff] }
  0xb5   : > { %986 = vmatmul.f32.vlgmr.msra.gmra.mxu2 %v2578_v22  ;;  %1006 = vmatmul.f32.vlgmr.msra.gmra.mxu3 %v2580_v23  ;;  %v1463_v11 = vld [vmem:[%s2797_s1 + $0xa10] sm:$0xff] }
  0xb6   : > { %1010 = vmatpush.msrb.mxu0 %v1459_v24  ;;  %1030 = vmatpush.msrb.mxu1 %v1523_v25  ;;  %v1400_v24 = vld [vmem:[%s2797_s1 + $0x818] sm:$0xff] }
  0xb7   : > { %1050 = vmatpush.msrb.mxu2 %v1460_v16  ;;  %1070 = vmatpush.msrb.mxu3 %v1524_v27  ;;  %v1464_v25 = vld [vmem:[%s2797_s1 + $0xa18] sm:$0xff] }
  0xb8   : > { %1011 = vmatpush.msrb.mxu0 %v1455_v28  ;;  %1031 = vmatpush.msrb.mxu1 %v1519_v30 }
  0xb9   : > { %1051 = vmatpush.msrb.mxu2 %v1456_v31  ;;  %1071 = vmatpush.msrb.mxu3 %v1520_v32 }
  0xba   : > { %1012 = vmatpush.msrb.mxu0 %v1451_v33  ;;  %1032 = vmatpush.msrb.mxu1 %v1515_v34 }
  0xbb   : > { %1052 = vmatpush.msrb.mxu2 %v1452_v35  ;;  %1072 = vmatpush.msrb.mxu3 %v1516_v36 }
  0xbc   : > { %1013 = vmatpush.msrb.mxu0 %v1447_v37  ;;  %1033 = vmatpush.msrb.mxu1 %v1511_v38 }
  0xbd   : > { %1053 = vmatpush.msrb.mxu2 %v1448_v39  ;;  %1073 = vmatpush.msrb.mxu3 %v1512_v40 }
  0xbe   : > { %1014 = vmatpush.msrb.mxu0 %v1443_v41  ;;  %1034 = vmatpush.msrb.mxu1 %v1507_v42 }
  0xbf   : > { %1054 = vmatpush.msrb.mxu2 %v1444_v43  ;;  %1074 = vmatpush.msrb.mxu3 %v1508_v44 }
  0xc0   : > { %1015 = vmatpush.msrb.mxu0 %v1439_v45  ;;  %1035 = vmatpush.msrb.mxu1 %v1503_v46 }
  0xc1   : > { %1055 = vmatpush.msrb.mxu2 %v1440_v47  ;;  %1075 = vmatpush.msrb.mxu3 %v1504_v48 }
  0xc2   : > { %1016 = vmatpush.msrb.mxu0 %v1435_v49  ;;  %1036 = vmatpush.msrb.mxu1 %v1499_v50 }
  0xc3   : > { %1056 = vmatpush.msrb.mxu2 %v1436_v51  ;;  %1076 = vmatpush.msrb.mxu3 %v1500_v52 }
  0xc4   : > { %1017 = vmatpush.msrb.mxu0 %v1431_v53  ;;  %1037 = vmatpush.msrb.mxu1 %v1495_v54 }
  0xc5   : > { %1057 = vmatpush.msrb.mxu2 %v1432_v55  ;;  %1077 = vmatpush.msrb.mxu3 %v1496_v56 }
  0xc6   : > { %1018 = vmatpush.msrb.mxu0 %v1427_v57  ;;  %1038 = vmatpush.msrb.mxu1 %v1491_v58 }
  0xc7   : > { %1058 = vmatpush.msrb.mxu2 %v1428_v59  ;;  %1078 = vmatpush.msrb.mxu3 %v1492_v60 }
  0xc8   : > { %1019 = vmatpush.msrb.mxu0 %v1423_v61  ;;  %1039 = vmatpush.msrb.mxu1 %v1487_v26 }
  0xc9   : > { %1059 = vmatpush.msrb.mxu2 %v1424_v62  ;;  %1079 = vmatpush.msrb.mxu3 %v1488_v63  ;;  %v468_v28 = vpop.f32.mrf.mxu0  ;;  %v488_v30 = vpop.f32.mrf.mxu1 }
  0xca   : > { %1020 = vmatpush.msrb.mxu0 %v1419_v0  ;;  %1040 = vmatpush.msrb.mxu1 %v1483_v1  ;;  %v489_v46 = vadd.f32 %v488_v30, %v468_v28 }
  0xcb   : > { %1060 = vmatpush.msrb.mxu2 %v1420_v2  ;;  %1080 = vmatpush.msrb.mxu3 %v1484_v3 }
  0xcc   : > { %1021 = vmatpush.msrb.mxu0 %v1415_v4  ;;  %1041 = vmatpush.msrb.mxu1 %v1479_v5 }
  0xcd   : > { %1061 = vmatpush.msrb.mxu2 %v1416_v29  ;;  %1081 = vmatpush.msrb.mxu3 %v1480_v6 }
  0xce   : > { %1022 = vmatpush.msrb.mxu0 %v1411_v7  ;;  %1042 = vmatpush.msrb.mxu1 %v1475_v8 }
  0xcf   : > { %1062 = vmatpush.msrb.mxu2 %v1412_v9  ;;  %1082 = vmatpush.msrb.mxu3 %v1476_v10 }
  0xd0   : > { %1023 = vmatpush.msrb.mxu0 %v1407_v12  ;;  %1043 = vmatpush.msrb.mxu1 %v1471_v13  ;;  %v508_v16 = vpop.f32.mrf.mxu2  ;;  %v528_v27 = vpop.f32.mrf.mxu3 }
  0xd1   : > { %1063 = vmatpush.msrb.mxu2 %v1408_v14  ;;  %1083 = vmatpush.msrb.mxu3 %v1472_v15  ;;  %v529_v43 = vadd.f32 %v528_v27, %v508_v16 }
  0xd2   : > { %1024 = vmatpush.msrb.mxu0 %v1403_v17  ;;  %1044 = vmatpush.msrb.mxu1 %v1467_v18 }
  0xd3   : > { %1064 = vmatpush.msrb.mxu2 %v1404_v19  ;;  %1084 = vmatpush.msrb.mxu3 %v1468_v20 }
  0xd4   : > { %1025 = vmatpush.msrb.mxu0 %v1399_v21  ;;  %1045 = vmatpush.msrb.mxu1 %v1463_v11 }
  0xd5   : > { %1065 = vmatpush.msrb.mxu2 %v1400_v24  ;;  %1085 = vmatpush.msrb.mxu3 %v1464_v25 }
  0xd6   : > { %1026 = vmatmul.f32.vlgmr.msrb.gmra.mxu0 %v2578_v22  ;;  %1046 = vmatmul.f32.vlgmr.msrb.gmra.mxu1 %v2580_v23 }
  0xd7   : > { %1066 = vmatmul.f32.vlgmr.msrb.gmra.mxu2 %v2578_v22  ;;  %1086 = vmatmul.f32.vlgmr.msrb.gmra.mxu3 %v2580_v23 }
  0xe3   : > { %v548_v33 = vpop.f32.mrf.mxu0 }
  0xe6   : > { %v568_v34 = vpop.f32.mrf.mxu1 }
  0xe7   : > { %v569_v53 = vadd.f32 %v568_v34, %v548_v33 }
  0xe9   : > { %v588_v31 = vpop.f32.mrf.mxu2 }
  0xec   : > { %v608_v32 = vpop.f32.mrf.mxu3 }
  0xed   : > { %v641_v37 = vpop.f32.mrf.mxu0  ;;  %v609_v0 = vadd.f32 %v608_v32, %v588_v31 }
  0xee   : > { %v642_v50 = vadd.f32 %v641_v37, %v489_v46 }
  0xf0   : > { %v661_v38 = vpop.f32.mrf.mxu1 }
  0xf1   : > { %v662_v54 = vadd.f32 %v661_v38, %v642_v50 }
  0xf3   : > { %v681_v35 = vpop.f32.mrf.mxu2 }
  0xf4   : > { %v682_v23 = vadd.f32 %v681_v35, %v529_v43 }
  0xf6   : > { %v701_v36 = vpop.f32.mrf.mxu3 }
  0xf7   : > { %v702_v47 = vadd.f32 %v701_v36, %v682_v23 }
 0x10f   : > { %v721_v41 = vpop.f32.mrf.mxu0 }
 0x110   : > { %v722_v56 = vadd.f32 %v721_v41, %v569_v53 }
 0x112   : > { %v741_v42 = vpop.f32.mrf.mxu1 }
 0x113   : > { %v742_v26 = vadd.f32 %v741_v42, %v722_v56 }
 0x115   : > { %v761_v39 = vpop.f32.mrf.mxu2 }
 0x116   : > { %v762_v5 = vadd.f32 %v761_v39, %v609_v0 }
 0x118   : > { %v781_v40 = vpop.f32.mrf.mxu3 }
 0x119   : > { %v782_v17 = vadd.f32 %v781_v40, %v762_v5 }
 0x131   : > { %v947_v48 = vpop.f32.mrf.mxu0  ;;  %v967_v49 = vpop.f32.mrf.mxu1 }
 0x132   : > { %v968_v52 = vadd.f32 %v967_v49, %v947_v48 }
 0x134   : > { %v1090_v57 = vadd.f32 %v968_v52, %v662_v54 }
 0x136   : > { %v1136_v62 = vmul.f32 %v1090_v57, %v1090_v57  ;;  %v1094_v2 = vrot.slane %v1090_v57, 4 }
 0x138   : > { %v987_v22 = vpop.f32.mrf.mxu2  ;;  %v1007_v44 = vpop.f32.mrf.mxu3  ;;  %v1140_v29 = vrot.slane %v1136_v62, 4  ;;  %v1095_v9 = vadd.f32 %v1094_v2, %v1090_v57 }
 0x139   : > { %v1008_v45 = vadd.f32 %v1007_v44, %v987_v22 }
 0x13a   : > { %v1141_v19 = vadd.f32 %v1140_v29, %v1136_v62  ;;  %v1096_v25 = vrot.slane %v1095_v9, 2 }
 0x13b   : > { %v1091_v51 = vadd.f32 %v1008_v45, %v702_v47 }
 0x13c   : > { %v1142_v32 = vrot.slane %v1141_v19, 2  ;;  %v1097_v37 = vadd.f32 %v1096_v25, %v1095_v9 }
 0x13d   : > { %v1137_v55 = vmul.f32 %v1091_v51, %v1091_v51  ;;  %v1100_v58 = vrot.slane %v1091_v51, 4 }
 0x13e   : > { %v1143_v42 = vadd.f32 %v1142_v32, %v1141_v19  ;;  %v1098_v45 = vrot.slane %v1097_v37, 1 }
 0x13f   : > { %v1146_v59 = vrot.slane %v1137_v55, 4  ;;  %v1101_v1 = vadd.f32 %v1100_v58, %v1091_v51  ;;  %v1131_v51 = vlaneseq }
 0x140   : > { %v1144_v50 = vrot.slane %v1143_v42, 1  ;;  %v1099_v56 = vadd.f32 %v1098_v45, %v1097_v37 }
 0x141   : > { %v1147_v3 = vadd.f32 %v1146_v59, %v1137_v55  ;;  %v1102_v8 = vrot.slane %v1101_v1, 2  ;;  %vm1133_vm4 = vcmp.lt.s32.totalorder %v1131_v51, 512 }
 0x143   : > { %v1148_v10 = vrot.slane %v1147_v3, 2  ;;  %v1103_v11 = vadd.f32 %v1102_v8, %v1101_v1 }
 0x145   : > { %v1149_v16 = vadd.f32 %v1148_v10, %v1147_v3  ;;  %v1104_v33 = vrot.slane %v1103_v11, 1 }
 0x147   : > { %v1150_v38 = vrot.slane %v1149_v16, 1  ;;  %v1105_v43 = vadd.f32 %v1104_v33, %v1103_v11 }
 0x149   : > { %v1151_v46 = vadd.f32 %v1150_v38, %v1149_v16  ;;  %v1122_v52 = vrot.slane %v1105_v43, 7 }
 0x14b   : > { %v1168_v57 = vrot.slane %v1151_v46, 7 }
 0x153   : > { %v1027_v60 = vpop.f32.mrf.mxu0  ;;  %v1047_v61 = vpop.f32.mrf.mxu1 }
 0x154   : > { %v1048_v63 = vadd.f32 %v1047_v61, %v1027_v60  ;;  %v1145_v61 = vadd.f32 %v1144_v50, %v1143_v42 }
 0x156   : > { %v1092_v4 = vadd.f32 %v1048_v63, %v742_v26  ;;  %v1125_v26 = vsel %vm615_vm0, %v1099_v56, %v1122_v52  ;;  %v1171_v2 = vsel %vm615_vm0, %v1145_v61, %v1168_v57 }
 0x158   : > { %v1106_v6 = vrot.slane %v1092_v4, 4  ;;  %v1138_v7 = vmul.f32 %v1092_v4, %v1092_v4 }
 0x15a   : > { %v1107_v12 = vadd.f32 %v1106_v6, %v1092_v4  ;;  %v1152_v13 = vrot.slane %v1138_v7, 4  ;;  %v1067_v14 = vpop.f32.mrf.mxu2  ;;  %v1087_v15 = vpop.f32.mrf.mxu3 }
 0x15b   : > { %v1088_v18 = vadd.f32 %v1087_v15, %v1067_v14 }
 0x15c   : > { %v1108_v20 = vrot.slane %v1107_v12, 2  ;;  %v1153_v21 = vadd.f32 %v1152_v13, %v1138_v7 }
 0x15d   : > { %v1093_v24 = vadd.f32 %v1088_v18, %v782_v17 }
 0x15e   : > { %v1154_v27 = vrot.slane %v1153_v21, 2  ;;  %v1109_v28 = vadd.f32 %v1108_v20, %v1107_v12 }
 0x15f   : > { %v1112_v30 = vrot.slane %v1093_v24, 4  ;;  %v1139_v31 = vmul.f32 %v1093_v24, %v1093_v24 }
 0x160   : > { %v1155_v34 = vadd.f32 %v1154_v27, %v1153_v21  ;;  %v1110_v39 = vrot.slane %v1109_v28, 1 }
 0x161   : > { %v1113_v35 = vadd.f32 %v1112_v30, %v1093_v24  ;;  %v1158_v36 = vrot.slane %v1139_v31, 4 }
 0x162   : > { %v1156_v22 = vrot.slane %v1155_v34, 1  ;;  %v1111_v47 = vadd.f32 %v1110_v39, %v1109_v28 }
 0x163   : > { %v1114_v40 = vrot.slane %v1113_v35, 2  ;;  %v1159_v41 = vadd.f32 %v1158_v36, %v1139_v31 }
 0x164   : > { %v1157_v53 = vadd.f32 %v1156_v22, %v1155_v34  ;;  %v1123_v58 = vrot.slane %v1111_v47, 6 }
 0x165   : > { %v1115_v44 = vadd.f32 %v1114_v40, %v1113_v35  ;;  %v1160_v23 = vrot.slane %v1159_v41, 2 }
 0x166   : > { %v1169_v62 = vrot.slane %v1157_v53, 6 }
 0x167   : > { %v1116_v48 = vrot.slane %v1115_v44, 1  ;;  %v1161_v49 = vadd.f32 %v1160_v23, %v1159_v41 }
 0x169   : > { %v1117_v54 = vadd.f32 %v1116_v48, %v1115_v44  ;;  %v1162_v55 = vrot.slane %v1161_v49, 1 }
 0x16b   : > { %v1124_v59 = vrot.slane %v1117_v54, 5  ;;  %v1163_v60 = vadd.f32 %v1162_v55, %v1161_v49 }
 0x16d   : > { %v1127_v63 = vsel %vm1126_vm2, %v1123_v58, %v1124_v59  ;;  %v1170_v0 = vrot.slane %v1163_v60, 5 }
 0x16e   : > { %v1129_v1 = vsel %vm1128_vm3, %v1125_v26, %v1127_v63 }
 0x16f   : > { %1135 = vst.msk [vmem:[%s175_s15] sm:$0xf] %vm1133_vm4, %v1129_v1  ;;  %v1172_v3 = vsel %vm1126_vm2, %v1169_v62, %v1170_v0 }
 0x170   : > { %v1173_v4 = vsel %vm1128_vm3, %v1171_v2, %v1172_v3 }
 0x171   : > { %1175 = vst.msk [vmem:[%s179_s17] sm:$0xf] %vm1133_vm4, %v1173_v4 }
 0x172 PF: > { %s14_s12 = sadd.s32 1, %s1543_s12  }
 0x173   : > { %p11_p4 = scmp.ge.s32.totalorder %s14_s12, 4  }
 0x175   :  { %13 = sbr.rel (!%p11_p4) target bundleno = 1 (0x1), region = 72 }

// kernel: discriminator_input.3
= control target key start
LH: loop header
LB: loop body
LE: loop exit
PB: predicated region body
PF: predicated region fallthrough
CT: control target
= control target key end

     0   :  { %s1547_s15 = smov 0   ;;  %s2788_s0 = inlined_call_operand.vmem [shape: f32[2,8,256], index: 0, kind: input, shape index: {}]   ;;  %s2789_s1 = inlined_call_operand.vmem [shape: f32[3,256,512], index: 1, kind: input, shape index: {}]   ;;  %s2790_s2 = inlined_call_operand.vmem [shape: f32[1,512], index: 2, kind: input, shape index: {}]   ;;  %s2791_s3 = inlined_call_operand.vmem [shape: f32[1,512], index: 3, kind: input, shape index: {}]   ;;  %s2792_s4 = inlined_call_operand.vmem [shape: f32[2,8,512], index: 4, kind: output, shape index: {}]  }
   0x1 LB: > { %s1223_s16 = sadd.s32 4294967295, %s1519_s15   ;;  %p1227_p0 = scmp.ge.s32.totalorder %s1519_s15, 1  ;;  %s1519_s15 = sphi %s1547_s15, %s14_s15  }
   0x2   : > { %p162_p1 = scmp.lt.s32.totalorder %s1519_s15, 3 }
   0x4   : > { %p163_p2 = pnand %p1227_p0, %p162_p1 }
   0x5   : > { %p1743_p3 = scmp.lt.s32.totalorder (!%p163_p2), %s1223_s16, 1 }
   0x6   : > { %166 = sbr.rel (%p163_p2) target bundleno = 370 (0x172), region = 36 }
   0xb   : > { %v1292_v0 = vld [vmem:[%s2789_s1 + $0x5e0] sm:$0xff]  ;;  %v1293_v2 = vld [vmem:[%s2789_s1 + $0x5e8] sm:$0xff]  ;;  %s2795_s16 = smov (!%p1743_p3, %s1223_s16), 1  ;;  %vm633_vm0 = vcmask 1040384   ;;  %vm939_vm1 = vcmask 1046528  }
   0xc   : > { %v1356_v1 = vld [vmem:[%s2789_s1 + $0x7e0] sm:$0xff]  ;;  %469 = vmatpush.msra.mxu0 %v1292_v0  ;;  %v1357_v3 = vld [vmem:[%s2789_s1 + $0x7e8] sm:$0xff]  ;;  %509 = vmatpush.msra.mxu2 %v1293_v2  ;;  %v1294_v0 = vld [vmem:[%s2789_s1 + $0x5f0] sm:$0xff]  ;;  %s1494_s30 = sshll.u32 %s2795_s16, 4  ;;  %s1495_s26 = sshll.u32 %s2795_s16, 5 }
   0xd   : > { %489 = vmatpush.msra.mxu1 %v1356_v1  ;;  %v1288_v4 = vld [vmem:[%s2789_s1 + $0x5c0] sm:$0xff]  ;;  %529 = vmatpush.msra.mxu3 %v1357_v3  ;;  %v1289_v6 = vld [vmem:[%s2789_s1 + $0x5c8] sm:$0xff]  ;;  %v1358_v1 = vld [vmem:[%s2789_s1 + $0x7f0] sm:$0xff]  ;;  %s192_s21 = scalar_lea.vmem %s2788_s0, %s1494_s30  ;;  %s2777_s29 = scalar_lea.vmem %s2792_s4, %s1495_s26 }
   0xe   : > { %v1352_v5 = vld [vmem:[%s2789_s1 + $0x7c0] sm:$0xff]  ;;  %v1353_v7 = vld [vmem:[%s2789_s1 + $0x7c8] sm:$0xff]  ;;  %470 = vmatpush.msra.mxu0 %v1288_v4  ;;  %510 = vmatpush.msra.mxu2 %v1289_v6  ;;  %v1295_v2 = vld [vmem:[%s2789_s1 + $0x5f8] sm:$0xff] }
   0xf   : > { %v1284_v8 = vld [vmem:[%s2789_s1 + $0x5a0] sm:$0xff]  ;;  %490 = vmatpush.msra.mxu1 %v1352_v5  ;;  %v1285_v10 = vld [vmem:[%s2789_s1 + $0x5a8] sm:$0xff]  ;;  %530 = vmatpush.msra.mxu3 %v1353_v7  ;;  %v1359_v3 = vld [vmem:[%s2789_s1 + $0x7f8] sm:$0xff] }
  0x10   : > { %v1348_v9 = vld [vmem:[%s2789_s1 + $0x7a0] sm:$0xff]  ;;  %v1349_v11 = vld [vmem:[%s2789_s1 + $0x7a8] sm:$0xff]  ;;  %471 = vmatpush.msra.mxu0 %v1284_v8  ;;  %511 = vmatpush.msra.mxu2 %v1285_v10  ;;  %v1290_v4 = vld [vmem:[%s2789_s1 + $0x5d0] sm:$0xff] }
  0x11   : > { %v1280_v12 = vld [vmem:[%s2789_s1 + $0x580] sm:$0xff]  ;;  %491 = vmatpush.msra.mxu1 %v1348_v9  ;;  %v1281_v14 = vld [vmem:[%s2789_s1 + $0x588] sm:$0xff]  ;;  %531 = vmatpush.msra.mxu3 %v1349_v11  ;;  %v1354_v5 = vld [vmem:[%s2789_s1 + $0x7d0] sm:$0xff] }
  0x12   : > { %v1344_v13 = vld [vmem:[%s2789_s1 + $0x780] sm:$0xff]  ;;  %v1345_v15 = vld [vmem:[%s2789_s1 + $0x788] sm:$0xff]  ;;  %472 = vmatpush.msra.mxu0 %v1280_v12  ;;  %512 = vmatpush.msra.mxu2 %v1281_v14  ;;  %v1291_v6 = vld [vmem:[%s2789_s1 + $0x5d8] sm:$0xff] }
  0x13   : > { %v1276_v16 = vld [vmem:[%s2789_s1 + $0x560] sm:$0xff]  ;;  %492 = vmatpush.msra.mxu1 %v1344_v13  ;;  %v1277_v18 = vld [vmem:[%s2789_s1 + $0x568] sm:$0xff]  ;;  %532 = vmatpush.msra.mxu3 %v1345_v15  ;;  %v1355_v7 = vld [vmem:[%s2789_s1 + $0x7d8] sm:$0xff] }
  0x14   : > { %v1340_v17 = vld [vmem:[%s2789_s1 + $0x760] sm:$0xff]  ;;  %v1341_v19 = vld [vmem:[%s2789_s1 + $0x768] sm:$0xff]  ;;  %473 = vmatpush.msra.mxu0 %v1276_v16  ;;  %513 = vmatpush.msra.mxu2 %v1277_v18  ;;  %v1286_v8 = vld [vmem:[%s2789_s1 + $0x5b0] sm:$0xff] }
  0x15   : > { %v1272_v20 = vld [vmem:[%s2789_s1 + $0x540] sm:$0xff]  ;;  %493 = vmatpush.msra.mxu1 %v1340_v17  ;;  %v1273_v22 = vld [vmem:[%s2789_s1 + $0x548] sm:$0xff]  ;;  %533 = vmatpush.msra.mxu3 %v1341_v19  ;;  %v1350_v9 = vld [vmem:[%s2789_s1 + $0x7b0] sm:$0xff] }
  0x16   : > { %v1336_v21 = vld [vmem:[%s2789_s1 + $0x740] sm:$0xff]  ;;  %v1337_v23 = vld [vmem:[%s2789_s1 + $0x748] sm:$0xff]  ;;  %474 = vmatpush.msra.mxu0 %v1272_v20  ;;  %514 = vmatpush.msra.mxu2 %v1273_v22  ;;  %v1287_v10 = vld [vmem:[%s2789_s1 + $0x5b8] sm:$0xff] }
  0x17   : > { %v1268_v24 = vld [vmem:[%s2789_s1 + $0x520] sm:$0xff]  ;;  %494 = vmatpush.msra.mxu1 %v1336_v21  ;;  %v1269_v26 = vld [vmem:[%s2789_s1 + $0x528] sm:$0xff]  ;;  %534 = vmatpush.msra.mxu3 %v1337_v23  ;;  %v1351_v11 = vld [vmem:[%s2789_s1 + $0x7b8] sm:$0xff] }
  0x18   : > { %v1332_v25 = vld [vmem:[%s2789_s1 + $0x720] sm:$0xff]  ;;  %v1333_v27 = vld [vmem:[%s2789_s1 + $0x728] sm:$0xff]  ;;  %475 = vmatpush.msra.mxu0 %v1268_v24  ;;  %515 = vmatpush.msra.mxu2 %v1269_v26  ;;  %v1282_v12 = vld [vmem:[%s2789_s1 + $0x590] sm:$0xff] }
  0x19   : > { %v1264_v28 = vld [vmem:[%s2789_s1 + $0x500] sm:$0xff]  ;;  %495 = vmatpush.msra.mxu1 %v1332_v25  ;;  %v1265_v30 = vld [vmem:[%s2789_s1 + $0x508] sm:$0xff]  ;;  %535 = vmatpush.msra.mxu3 %v1333_v27  ;;  %v1346_v13 = vld [vmem:[%s2789_s1 + $0x790] sm:$0xff] }
  0x1a   : > { %v1328_v29 = vld [vmem:[%s2789_s1 + $0x700] sm:$0xff]  ;;  %v1329_v31 = vld [vmem:[%s2789_s1 + $0x708] sm:$0xff]  ;;  %476 = vmatpush.msra.mxu0 %v1264_v28  ;;  %516 = vmatpush.msra.mxu2 %v1265_v30  ;;  %v1283_v14 = vld [vmem:[%s2789_s1 + $0x598] sm:$0xff] }
  0x1b   : > { %v1260_v32 = vld [vmem:[%s2789_s1 + $0x4e0] sm:$0xff]  ;;  %496 = vmatpush.msra.mxu1 %v1328_v29  ;;  %v1261_v34 = vld [vmem:[%s2789_s1 + $0x4e8] sm:$0xff]  ;;  %536 = vmatpush.msra.mxu3 %v1329_v31  ;;  %v1347_v15 = vld [vmem:[%s2789_s1 + $0x798] sm:$0xff] }
  0x1c   : > { %v1324_v33 = vld [vmem:[%s2789_s1 + $0x6e0] sm:$0xff]  ;;  %v1325_v35 = vld [vmem:[%s2789_s1 + $0x6e8] sm:$0xff]  ;;  %477 = vmatpush.msra.mxu0 %v1260_v32  ;;  %517 = vmatpush.msra.mxu2 %v1261_v34  ;;  %v1278_v16 = vld [vmem:[%s2789_s1 + $0x570] sm:$0xff] }
  0x1d   : > { %v1256_v36 = vld [vmem:[%s2789_s1 + $0x4c0] sm:$0xff]  ;;  %497 = vmatpush.msra.mxu1 %v1324_v33  ;;  %v1257_v38 = vld [vmem:[%s2789_s1 + $0x4c8] sm:$0xff]  ;;  %537 = vmatpush.msra.mxu3 %v1325_v35  ;;  %v1342_v17 = vld [vmem:[%s2789_s1 + $0x770] sm:$0xff] }
  0x1e   : > { %v1320_v37 = vld [vmem:[%s2789_s1 + $0x6c0] sm:$0xff]  ;;  %v1321_v39 = vld [vmem:[%s2789_s1 + $0x6c8] sm:$0xff]  ;;  %478 = vmatpush.msra.mxu0 %v1256_v36  ;;  %518 = vmatpush.msra.mxu2 %v1257_v38  ;;  %v1279_v18 = vld [vmem:[%s2789_s1 + $0x578] sm:$0xff] }
  0x1f   : > { %v1252_v40 = vld [vmem:[%s2789_s1 + $0x4a0] sm:$0xff]  ;;  %498 = vmatpush.msra.mxu1 %v1320_v37  ;;  %v1253_v42 = vld [vmem:[%s2789_s1 + $0x4a8] sm:$0xff]  ;;  %538 = vmatpush.msra.mxu3 %v1321_v39  ;;  %v1343_v19 = vld [vmem:[%s2789_s1 + $0x778] sm:$0xff] }
  0x20   : > { %v1316_v41 = vld [vmem:[%s2789_s1 + $0x6a0] sm:$0xff]  ;;  %v1317_v43 = vld [vmem:[%s2789_s1 + $0x6a8] sm:$0xff]  ;;  %479 = vmatpush.msra.mxu0 %v1252_v40  ;;  %519 = vmatpush.msra.mxu2 %v1253_v42  ;;  %v1274_v20 = vld [vmem:[%s2789_s1 + $0x550] sm:$0xff] }
  0x21   : > { %v1248_v44 = vld [vmem:[%s2789_s1 + $0x480] sm:$0xff]  ;;  %499 = vmatpush.msra.mxu1 %v1316_v41  ;;  %v1249_v46 = vld [vmem:[%s2789_s1 + $0x488] sm:$0xff]  ;;  %539 = vmatpush.msra.mxu3 %v1317_v43  ;;  %v1338_v21 = vld [vmem:[%s2789_s1 + $0x750] sm:$0xff] }
  0x22   : > { %v1312_v45 = vld [vmem:[%s2789_s1 + $0x680] sm:$0xff]  ;;  %v1313_v47 = vld [vmem:[%s2789_s1 + $0x688] sm:$0xff]  ;;  %480 = vmatpush.msra.mxu0 %v1248_v44  ;;  %520 = vmatpush.msra.mxu2 %v1249_v46  ;;  %v1275_v22 = vld [vmem:[%s2789_s1 + $0x558] sm:$0xff] }
  0x23   : > { %v1244_v48 = vld [vmem:[%s2789_s1 + $0x460] sm:$0xff]  ;;  %500 = vmatpush.msra.mxu1 %v1312_v45  ;;  %v1245_v50 = vld [vmem:[%s2789_s1 + $0x468] sm:$0xff]  ;;  %540 = vmatpush.msra.mxu3 %v1313_v47  ;;  %v1339_v23 = vld [vmem:[%s2789_s1 + $0x758] sm:$0xff] }
  0x24   : > { %v1308_v49 = vld [vmem:[%s2789_s1 + $0x660] sm:$0xff]  ;;  %v1309_v51 = vld [vmem:[%s2789_s1 + $0x668] sm:$0xff]  ;;  %481 = vmatpush.msra.mxu0 %v1244_v48  ;;  %521 = vmatpush.msra.mxu2 %v1245_v50  ;;  %v1270_v24 = vld [vmem:[%s2789_s1 + $0x530] sm:$0xff] }
  0x25   : > { %v1240_v52 = vld [vmem:[%s2789_s1 + $0x440] sm:$0xff]  ;;  %501 = vmatpush.msra.mxu1 %v1308_v49  ;;  %v1241_v54 = vld [vmem:[%s2789_s1 + $0x448] sm:$0xff]  ;;  %541 = vmatpush.msra.mxu3 %v1309_v51  ;;  %v1334_v25 = vld [vmem:[%s2789_s1 + $0x730] sm:$0xff] }
  0x26   : > { %v1304_v53 = vld [vmem:[%s2789_s1 + $0x640] sm:$0xff]  ;;  %v1305_v55 = vld [vmem:[%s2789_s1 + $0x648] sm:$0xff]  ;;  %482 = vmatpush.msra.mxu0 %v1240_v52  ;;  %522 = vmatpush.msra.mxu2 %v1241_v54  ;;  %v1271_v27 = vld [vmem:[%s2789_s1 + $0x538] sm:$0xff] }
  0x27   : > { %v1236_v56 = vld [vmem:[%s2789_s1 + $0x420] sm:$0xff]  ;;  %502 = vmatpush.msra.mxu1 %v1304_v53  ;;  %v1237_v58 = vld [vmem:[%s2789_s1 + $0x428] sm:$0xff]  ;;  %542 = vmatpush.msra.mxu3 %v1305_v55  ;;  %v1335_v28 = vld [vmem:[%s2789_s1 + $0x738] sm:$0xff] }
  0x28   : > { %v1300_v57 = vld [vmem:[%s2789_s1 + $0x620] sm:$0xff]  ;;  %v1301_v59 = vld [vmem:[%s2789_s1 + $0x628] sm:$0xff]  ;;  %483 = vmatpush.msra.mxu0 %v1236_v56  ;;  %523 = vmatpush.msra.mxu2 %v1237_v58  ;;  %v1266_v30 = vld [vmem:[%s2789_s1 + $0x510] sm:$0xff] }
  0x29   : > { %v1232_v60 = vld [vmem:[%s2789_s1 + $0x400] sm:$0xff]  ;;  %503 = vmatpush.msra.mxu1 %v1300_v57  ;;  %v1233_v62 = vld [vmem:[%s2789_s1 + $0x408] sm:$0xff]  ;;  %543 = vmatpush.msra.mxu3 %v1301_v59  ;;  %v1330_v31 = vld [vmem:[%s2789_s1 + $0x710] sm:$0xff] }
  0x2a   : > { %v1296_v61 = vld [vmem:[%s2789_s1 + $0x600] sm:$0xff]  ;;  %v1297_v63 = vld [vmem:[%s2789_s1 + $0x608] sm:$0xff]  ;;  %484 = vmatpush.msra.mxu0 %v1232_v60  ;;  %524 = vmatpush.msra.mxu2 %v1233_v62  ;;  %v1267_v32 = vld [vmem:[%s2789_s1 + $0x518] sm:$0xff]  ;;  %v1521_v60 = vmov 0.0  }
  0x2b   : > { %504 = vmatpush.msra.mxu1 %v1296_v61  ;;  %544 = vmatpush.msra.mxu3 %v1297_v63  ;;  %v1841_v26 = vld [vmem:[%s192_s21] sm:$0xff]  ;;  %v1850_v29 = vld [vmem:[%s192_s21 + $0x8] sm:$0xff]  ;;  %v1331_v33 = vld [vmem:[%s2789_s1 + $0x718] sm:$0xff]  ;;  %198 = vst [vmem:[#allocation2 + $0x18] sm:$0xff] %v1521_v60 }
  0x2c   : > { %549 = vmatpush.msrb.mxu0 %v1294_v0  ;;  %589 = vmatpush.msrb.mxu2 %v1295_v2  ;;  %204 = vst [vmem:[#allocation2 + $0x28] sm:$0xff] %v1841_v26  ;;  %v1262_v34 = vld [vmem:[%s2789_s1 + $0x4f0] sm:$0xff]  ;;  %v1263_v36 = vld [vmem:[%s2789_s1 + $0x4f8] sm:$0xff] }
  0x2d   : > { %569 = vmatpush.msrb.mxu1 %v1358_v1  ;;  %609 = vmatpush.msrb.mxu3 %v1359_v3  ;;  %205 = vst [vmem:[#allocation2 + $0x10] sm:$0xff] %v1850_v29  ;;  %v1326_v35 = vld [vmem:[%s2789_s1 + $0x6f0] sm:$0xff]  ;;  %v1327_v37 = vld [vmem:[%s2789_s1 + $0x6f8] sm:$0xff]  ;;  %v270_v3 = vld [vmem:[%s2789_s1 + $0x1e0] sm:$0xff] }
  0x2e   : > { %550 = vmatpush.msrb.mxu0 %v1290_v4  ;;  %590 = vmatpush.msrb.mxu2 %v1291_v6  ;;  %v1258_v38 = vld [vmem:[%s2789_s1 + $0x4d0] sm:$0xff]  ;;  %v1259_v40 = vld [vmem:[%s2789_s1 + $0x4d8] sm:$0xff]  ;;  %199 = vst [vmem:[#allocation2 + $0x20] sm:$0xff] %v1521_v60  ;;  %v334_v4 = vld [vmem:[%s2789_s1 + $0x3e0] sm:$0xff] }
  0x2f   : > { %570 = vmatpush.msrb.mxu1 %v1354_v5  ;;  %610 = vmatpush.msrb.mxu3 %v1355_v7  ;;  %v1322_v39 = vld [vmem:[%s2789_s1 + $0x6d0] sm:$0xff]  ;;  %v1323_v41 = vld [vmem:[%s2789_s1 + $0x6d8] sm:$0xff]  ;;  %200 = vst [vmem:[#allocation2 + $0x8] sm:$0xff] %v1521_v60  ;;  %v271_v5 = vld [vmem:[%s2789_s1 + $0x1e8] sm:$0xff] }
  0x30   : > { %551 = vmatpush.msrb.mxu0 %v1286_v8  ;;  %591 = vmatpush.msrb.mxu2 %v1287_v10  ;;  %v1254_v42 = vld [vmem:[%s2789_s1 + $0x4b0] sm:$0xff]  ;;  %v1255_v44 = vld [vmem:[%s2789_s1 + $0x4b8] sm:$0xff]  ;;  %201 = vst [vmem:[#allocation2] sm:$0xff] %v1521_v60  ;;  %v335_v6 = vld [vmem:[%s2789_s1 + $0x3e8] sm:$0xff] }
  0x31   : > { %571 = vmatpush.msrb.mxu1 %v1350_v9  ;;  %611 = vmatpush.msrb.mxu3 %v1351_v11  ;;  %v1318_v43 = vld [vmem:[%s2789_s1 + $0x6b0] sm:$0xff]  ;;  %v1319_v45 = vld [vmem:[%s2789_s1 + $0x6b8] sm:$0xff]  ;;  %v266_v7 = vld [vmem:[%s2789_s1 + $0x1c0] sm:$0xff] }
  0x32   : > { %552 = vmatpush.msrb.mxu0 %v1282_v12  ;;  %592 = vmatpush.msrb.mxu2 %v1283_v14  ;;  %v1250_v46 = vld [vmem:[%s2789_s1 + $0x490] sm:$0xff]  ;;  %v1251_v48 = vld [vmem:[%s2789_s1 + $0x498] sm:$0xff]  ;;  %v330_v8 = vld [vmem:[%s2789_s1 + $0x3c0] sm:$0xff] }
  0x33   : > { %572 = vmatpush.msrb.mxu1 %v1346_v13  ;;  %612 = vmatpush.msrb.mxu3 %v1347_v15  ;;  %v1314_v47 = vld [vmem:[%s2789_s1 + $0x690] sm:$0xff]  ;;  %v1315_v49 = vld [vmem:[%s2789_s1 + $0x698] sm:$0xff]  ;;  %v267_v9 = vld [vmem:[%s2789_s1 + $0x1c8] sm:$0xff] }
  0x34   : > { %553 = vmatpush.msrb.mxu0 %v1278_v16  ;;  %593 = vmatpush.msrb.mxu2 %v1279_v18  ;;  %v1246_v50 = vld [vmem:[%s2789_s1 + $0x470] sm:$0xff]  ;;  %v1247_v52 = vld [vmem:[%s2789_s1 + $0x478] sm:$0xff]  ;;  %v331_v10 = vld [vmem:[%s2789_s1 + $0x3c8] sm:$0xff] }
  0x35   : > { %573 = vmatpush.msrb.mxu1 %v1342_v17  ;;  %613 = vmatpush.msrb.mxu3 %v1343_v19  ;;  %v1310_v51 = vld [vmem:[%s2789_s1 + $0x670] sm:$0xff]  ;;  %v1311_v53 = vld [vmem:[%s2789_s1 + $0x678] sm:$0xff]  ;;  %v262_v11 = vld [vmem:[%s2789_s1 + $0x1a0] sm:$0xff] }
  0x36   : > { %554 = vmatpush.msrb.mxu0 %v1274_v20  ;;  %594 = vmatpush.msrb.mxu2 %v1275_v22  ;;  %v1242_v54 = vld [vmem:[%s2789_s1 + $0x450] sm:$0xff]  ;;  %v1243_v56 = vld [vmem:[%s2789_s1 + $0x458] sm:$0xff]  ;;  %v326_v12 = vld [vmem:[%s2789_s1 + $0x3a0] sm:$0xff] }
  0x37   : > { %574 = vmatpush.msrb.mxu1 %v1338_v21  ;;  %614 = vmatpush.msrb.mxu3 %v1339_v23  ;;  %v1306_v55 = vld [vmem:[%s2789_s1 + $0x650] sm:$0xff]  ;;  %v1307_v57 = vld [vmem:[%s2789_s1 + $0x658] sm:$0xff]  ;;  %v263_v13 = vld [vmem:[%s2789_s1 + $0x1a8] sm:$0xff] }
  0x38   : > { %555 = vmatpush.msrb.mxu0 %v1270_v24  ;;  %595 = vmatpush.msrb.mxu2 %v1271_v27  ;;  %v1238_v58 = vld [vmem:[%s2789_s1 + $0x430] sm:$0xff]  ;;  %v1239_v61 = vld [vmem:[%s2789_s1 + $0x438] sm:$0xff]  ;;  %v327_v14 = vld [vmem:[%s2789_s1 + $0x3a8] sm:$0xff] }
  0x39   : > { %575 = vmatpush.msrb.mxu1 %v1334_v25  ;;  %615 = vmatpush.msrb.mxu3 %v1335_v28  ;;  %v1302_v59 = vld [vmem:[%s2789_s1 + $0x630] sm:$0xff]  ;;  %v1303_v62 = vld [vmem:[%s2789_s1 + $0x638] sm:$0xff]  ;;  %v258_v15 = vld [vmem:[%s2789_s1 + $0x180] sm:$0xff] }
  0x3a   : > { %556 = vmatpush.msrb.mxu0 %v1266_v30  ;;  %596 = vmatpush.msrb.mxu2 %v1267_v32  ;;  %v1234_v63 = vld [vmem:[%s2789_s1 + $0x410] sm:$0xff]  ;;  %v1235_v1 = vld [vmem:[%s2789_s1 + $0x418] sm:$0xff]  ;;  %v322_v16 = vld [vmem:[%s2789_s1 + $0x380] sm:$0xff] }
  0x3b   : > { %576 = vmatpush.msrb.mxu1 %v1330_v31  ;;  %616 = vmatpush.msrb.mxu3 %v1331_v33  ;;  %v1298_v0 = vld [vmem:[%s2789_s1 + $0x610] sm:$0xff]  ;;  %v1299_v2 = vld [vmem:[%s2789_s1 + $0x618] sm:$0xff]  ;;  %v259_v17 = vld [vmem:[%s2789_s1 + $0x188] sm:$0xff] }
  0x3c   : > { %557 = vmatpush.msrb.mxu0 %v1262_v34  ;;  %597 = vmatpush.msrb.mxu2 %v1263_v36  ;;  %v323_v18 = vld [vmem:[%s2789_s1 + $0x388] sm:$0xff]  ;;  %v254_v19 = vld [vmem:[%s2789_s1 + $0x160] sm:$0xff] }
  0x3d   : > { %577 = vmatpush.msrb.mxu1 %v1326_v35  ;;  %617 = vmatpush.msrb.mxu3 %v1327_v37  ;;  %v318_v20 = vld [vmem:[%s2789_s1 + $0x360] sm:$0xff]  ;;  %v255_v21 = vld [vmem:[%s2789_s1 + $0x168] sm:$0xff] }
  0x3e   : > { %558 = vmatpush.msrb.mxu0 %v1258_v38  ;;  %598 = vmatpush.msrb.mxu2 %v1259_v40  ;;  %v319_v22 = vld [vmem:[%s2789_s1 + $0x368] sm:$0xff]  ;;  %v250_v23 = vld [vmem:[%s2789_s1 + $0x140] sm:$0xff] }
  0x3f   : > { %578 = vmatpush.msrb.mxu1 %v1322_v39  ;;  %618 = vmatpush.msrb.mxu3 %v1323_v41  ;;  %v314_v24 = vld [vmem:[%s2789_s1 + $0x340] sm:$0xff]  ;;  %v251_v25 = vld [vmem:[%s2789_s1 + $0x148] sm:$0xff] }
  0x40   : > { %559 = vmatpush.msrb.mxu0 %v1254_v42  ;;  %599 = vmatpush.msrb.mxu2 %v1255_v44  ;;  %v315_v27 = vld [vmem:[%s2789_s1 + $0x348] sm:$0xff]  ;;  %v246_v28 = vld [vmem:[%s2789_s1 + $0x120] sm:$0xff] }
  0x41   : > { %579 = vmatpush.msrb.mxu1 %v1318_v43  ;;  %619 = vmatpush.msrb.mxu3 %v1319_v45  ;;  %v310_v30 = vld [vmem:[%s2789_s1 + $0x320] sm:$0xff]  ;;  %v247_v31 = vld [vmem:[%s2789_s1 + $0x128] sm:$0xff] }
  0x42   : > { %560 = vmatpush.msrb.mxu0 %v1250_v46  ;;  %600 = vmatpush.msrb.mxu2 %v1251_v48  ;;  %v311_v32 = vld [vmem:[%s2789_s1 + $0x328] sm:$0xff]  ;;  %v242_v33 = vld [vmem:[%s2789_s1 + $0x100] sm:$0xff] }
  0x43   : > { %580 = vmatpush.msrb.mxu1 %v1314_v47  ;;  %620 = vmatpush.msrb.mxu3 %v1315_v49  ;;  %v306_v34 = vld [vmem:[%s2789_s1 + $0x300] sm:$0xff]  ;;  %v243_v35 = vld [vmem:[%s2789_s1 + $0x108] sm:$0xff] }
  0x44   : > { %561 = vmatpush.msrb.mxu0 %v1246_v50  ;;  %601 = vmatpush.msrb.mxu2 %v1247_v52  ;;  %v307_v36 = vld [vmem:[%s2789_s1 + $0x308] sm:$0xff]  ;;  %v238_v37 = vld [vmem:[%s2789_s1 + $0xe0] sm:$0xff] }
  0x45   : > { %581 = vmatpush.msrb.mxu1 %v1310_v51  ;;  %621 = vmatpush.msrb.mxu3 %v1311_v53  ;;  %v302_v38 = vld [vmem:[%s2789_s1 + $0x2e0] sm:$0xff]  ;;  %v239_v39 = vld [vmem:[%s2789_s1 + $0xe8] sm:$0xff] }
  0x46   : > { %562 = vmatpush.msrb.mxu0 %v1242_v54  ;;  %602 = vmatpush.msrb.mxu2 %v1243_v56  ;;  %v303_v40 = vld [vmem:[%s2789_s1 + $0x2e8] sm:$0xff]  ;;  %v234_v41 = vld [vmem:[%s2789_s1 + $0xc0] sm:$0xff] }
  0x47   : > { %582 = vmatpush.msrb.mxu1 %v1306_v55  ;;  %622 = vmatpush.msrb.mxu3 %v1307_v57  ;;  %v298_v42 = vld [vmem:[%s2789_s1 + $0x2c0] sm:$0xff]  ;;  %v235_v43 = vld [vmem:[%s2789_s1 + $0xc8] sm:$0xff]  ;;  %v206_v57 = vld [vmem:[#allocation2 + $0x18] sm:$0x80] }
  0x48   : > { %563 = vmatpush.msrb.mxu0 %v1238_v58  ;;  %603 = vmatpush.msrb.mxu2 %v1239_v61  ;;  %v299_v44 = vld [vmem:[%s2789_s1 + $0x2c8] sm:$0xff]  ;;  %v230_v45 = vld [vmem:[%s2789_s1 + $0xa0] sm:$0xff] }
  0x49   : > { %583 = vmatpush.msrb.mxu1 %v1302_v59  ;;  %623 = vmatpush.msrb.mxu3 %v1303_v62  ;;  %v294_v46 = vld [vmem:[%s2789_s1 + $0x2a0] sm:$0xff]  ;;  %v231_v47 = vld [vmem:[%s2789_s1 + $0xa8] sm:$0xff] }
  0x4a   : > { %564 = vmatpush.msrb.mxu0 %v1234_v63  ;;  %604 = vmatpush.msrb.mxu2 %v1235_v1  ;;  %v295_v48 = vld [vmem:[%s2789_s1 + $0x2a8] sm:$0xff]  ;;  %v226_v49 = vld [vmem:[%s2789_s1 + $0x80] sm:$0xff] }
  0x4b   : > { %584 = vmatpush.msrb.mxu1 %v1298_v0  ;;  %624 = vmatpush.msrb.mxu3 %v1299_v2  ;;  %v290_v50 = vld [vmem:[%s2789_s1 + $0x280] sm:$0xff]  ;;  %v227_v51 = vld [vmem:[%s2789_s1 + $0x88] sm:$0xff]  ;;  %v634_v0 = vrot.slane %v206_v57, 7  ;;  %v233_v57 = vld [vmem:[%s2789_s1 + $0xb8] sm:$0xff] }
  0x4c   : > { %485 = vmatmul.f32.vlgmr.msra.gmra.mxu0 %v1841_v26  ;;  %505 = vmatmul.f32.vlgmr.msra.gmra.mxu1 %v1850_v29  ;;  %v291_v52 = vld [vmem:[%s2789_s1 + $0x288] sm:$0xff]  ;;  %v222_v53 = vld [vmem:[%s2789_s1 + $0x60] sm:$0xff] }
  0x4d   : > { %525 = vmatmul.f32.vlgmr.msra.gmra.mxu2 %v1841_v26  ;;  %545 = vmatmul.f32.vlgmr.msra.gmra.mxu3 %v1850_v29  ;;  %v286_v54 = vld [vmem:[%s2789_s1 + $0x260] sm:$0xff]  ;;  %v223_v55 = vld [vmem:[%s2789_s1 + $0x68] sm:$0xff] }
  0x4e   : > { %642 = vmatpush.msra.mxu0 %v270_v3  ;;  %662 = vmatpush.msra.mxu1 %v334_v4  ;;  %v287_v56 = vld [vmem:[%s2789_s1 + $0x268] sm:$0xff]  ;;  %v218_v59 = vld [vmem:[%s2789_s1 + $0x40] sm:$0xff]  ;;  %v209_v3 = vld [vmem:[#allocation2 + $0x10] sm:$0x7f] }
  0x4f   : > { %682 = vmatpush.msra.mxu2 %v271_v5  ;;  %702 = vmatpush.msra.mxu3 %v335_v6  ;;  %v208_v58 = vld [vmem:[#allocation2 + $0x28] sm:$0x7f]  ;;  %v282_v60 = vld [vmem:[%s2789_s1 + $0x240] sm:$0xff] }
  0x50   : > { %643 = vmatpush.msra.mxu0 %v266_v7  ;;  %663 = vmatpush.msra.mxu1 %v330_v8  ;;  %v219_v61 = vld [vmem:[%s2789_s1 + $0x48] sm:$0xff]  ;;  %v214_v62 = vld [vmem:[%s2789_s1 + $0x20] sm:$0xff]  ;;  %v635_v1 = vrot.slane %v208_v58, 7  ;;  %v297_v58 = vld [vmem:[%s2789_s1 + $0x2b8] sm:$0xff] }
  0x51   : > { %683 = vmatpush.msra.mxu2 %v267_v9  ;;  %703 = vmatpush.msra.mxu3 %v331_v10  ;;  %v278_v63 = vld [vmem:[%s2789_s1 + $0x220] sm:$0xff]  ;;  %v215_v4 = vld [vmem:[%s2789_s1 + $0x28] sm:$0xff]  ;;  %v638_v10 = vrot.slane %v209_v3, 7  ;;  %v284_v3 = vld [vmem:[%s2789_s1 + $0x250] sm:$0xff] }
  0x52   : > { %644 = vmatpush.msra.mxu0 %v262_v11  ;;  %664 = vmatpush.msra.mxu1 %v326_v12  ;;  %v207_v2 = vld [vmem:[#allocation2 + $0x20] sm:$0x80]  ;;  %v279_v5 = vld [vmem:[%s2789_s1 + $0x228] sm:$0xff]  ;;  %v2162_v11 = vsel %vm633_vm0, %v634_v0, %v635_v1  ;;  %v272_v12 = vld [vmem:[%s2789_s1 + $0x1f0] sm:$0xff] }
  0x53   : > { %684 = vmatpush.msra.mxu2 %v263_v13  ;;  %704 = vmatpush.msra.mxu3 %v327_v14  ;;  %v274_v6 = vld [vmem:[%s2789_s1 + $0x200] sm:$0xff]  ;;  %v211_v7 = vld [vmem:[%s2789_s1 + $0x8] sm:$0xff]  ;;  %v637_v9 = vrot.slane %v207_v2, 7  ;;  %v336_v13 = vld [vmem:[%s2789_s1 + $0x3f0] sm:$0xff] }
  0x54   : > { %645 = vmatpush.msra.mxu0 %v258_v15  ;;  %665 = vmatpush.msra.mxu1 %v322_v16  ;;  %v275_v8 = vld [vmem:[%s2789_s1 + $0x208] sm:$0xff]  ;;  %v273_v14 = vld [vmem:[%s2789_s1 + $0x1f8] sm:$0xff]  ;;  %v220_v2 = vld [vmem:[%s2789_s1 + $0x50] sm:$0xff] }
  0x55   : > { %685 = vmatpush.msra.mxu2 %v259_v17  ;;  %705 = vmatpush.msra.mxu3 %v323_v18  ;;  %v337_v15 = vld [vmem:[%s2789_s1 + $0x3f8] sm:$0xff]  ;;  %v2179_v16 = vsel %vm633_vm0, %v637_v9, %v638_v10  ;;  %v268_v17 = vld [vmem:[%s2789_s1 + $0x1d0] sm:$0xff] }
  0x56   : > { %646 = vmatpush.msra.mxu0 %v254_v19  ;;  %666 = vmatpush.msra.mxu1 %v318_v20  ;;  %v332_v18 = vld [vmem:[%s2789_s1 + $0x3d0] sm:$0xff]  ;;  %v269_v19 = vld [vmem:[%s2789_s1 + $0x1d8] sm:$0xff] }
  0x57   : > { %686 = vmatpush.msra.mxu2 %v255_v21  ;;  %706 = vmatpush.msra.mxu3 %v319_v22  ;;  %v333_v20 = vld [vmem:[%s2789_s1 + $0x3d8] sm:$0xff]  ;;  %v264_v21 = vld [vmem:[%s2789_s1 + $0x1b0] sm:$0xff] }
  0x58   : > { %647 = vmatpush.msra.mxu0 %v250_v23  ;;  %667 = vmatpush.msra.mxu1 %v314_v24  ;;  %v328_v22 = vld [vmem:[%s2789_s1 + $0x3b0] sm:$0xff]  ;;  %v265_v23 = vld [vmem:[%s2789_s1 + $0x1b8] sm:$0xff] }
  0x59   : > { %687 = vmatpush.msra.mxu2 %v251_v25  ;;  %707 = vmatpush.msra.mxu3 %v315_v27  ;;  %v329_v24 = vld [vmem:[%s2789_s1 + $0x3b8] sm:$0xff]  ;;  %v260_v25 = vld [vmem:[%s2789_s1 + $0x190] sm:$0xff] }
  0x5a   : > { %648 = vmatpush.msra.mxu0 %v246_v28  ;;  %668 = vmatpush.msra.mxu1 %v310_v30  ;;  %v324_v27 = vld [vmem:[%s2789_s1 + $0x390] sm:$0xff]  ;;  %v261_v28 = vld [vmem:[%s2789_s1 + $0x198] sm:$0xff] }
  0x5b   : > { %688 = vmatpush.msra.mxu2 %v247_v31  ;;  %708 = vmatpush.msra.mxu3 %v311_v32  ;;  %v325_v30 = vld [vmem:[%s2789_s1 + $0x398] sm:$0xff]  ;;  %v256_v31 = vld [vmem:[%s2789_s1 + $0x170] sm:$0xff] }
  0x5c   : > { %649 = vmatpush.msra.mxu0 %v242_v33  ;;  %669 = vmatpush.msra.mxu1 %v306_v34  ;;  %v320_v32 = vld [vmem:[%s2789_s1 + $0x370] sm:$0xff]  ;;  %v257_v33 = vld [vmem:[%s2789_s1 + $0x178] sm:$0xff] }
  0x5d   : > { %689 = vmatpush.msra.mxu2 %v243_v35  ;;  %709 = vmatpush.msra.mxu3 %v307_v36  ;;  %v321_v34 = vld [vmem:[%s2789_s1 + $0x378] sm:$0xff]  ;;  %v252_v35 = vld [vmem:[%s2789_s1 + $0x150] sm:$0xff] }
  0x5e   : > { %650 = vmatpush.msra.mxu0 %v238_v37  ;;  %670 = vmatpush.msra.mxu1 %v302_v38  ;;  %v316_v36 = vld [vmem:[%s2789_s1 + $0x350] sm:$0xff]  ;;  %v253_v37 = vld [vmem:[%s2789_s1 + $0x158] sm:$0xff] }
  0x5f   : > { %690 = vmatpush.msra.mxu2 %v239_v39  ;;  %710 = vmatpush.msra.mxu3 %v303_v40  ;;  %v317_v38 = vld [vmem:[%s2789_s1 + $0x358] sm:$0xff]  ;;  %v248_v39 = vld [vmem:[%s2789_s1 + $0x130] sm:$0xff] }
  0x60   : > { %651 = vmatpush.msra.mxu0 %v234_v41  ;;  %671 = vmatpush.msra.mxu1 %v298_v42  ;;  %v312_v40 = vld [vmem:[%s2789_s1 + $0x330] sm:$0xff]  ;;  %v249_v41 = vld [vmem:[%s2789_s1 + $0x138] sm:$0xff] }
  0x61   : > { %691 = vmatpush.msra.mxu2 %v235_v43  ;;  %711 = vmatpush.msra.mxu3 %v299_v44  ;;  %v313_v42 = vld [vmem:[%s2789_s1 + $0x338] sm:$0xff]  ;;  %v244_v43 = vld [vmem:[%s2789_s1 + $0x110] sm:$0xff] }
  0x62   : > { %652 = vmatpush.msra.mxu0 %v230_v45  ;;  %672 = vmatpush.msra.mxu1 %v294_v46  ;;  %v308_v44 = vld [vmem:[%s2789_s1 + $0x310] sm:$0xff]  ;;  %v245_v45 = vld [vmem:[%s2789_s1 + $0x118] sm:$0xff] }
  0x63   : > { %692 = vmatpush.msra.mxu2 %v231_v47  ;;  %712 = vmatpush.msra.mxu3 %v295_v48  ;;  %v309_v46 = vld [vmem:[%s2789_s1 + $0x318] sm:$0xff]  ;;  %v240_v47 = vld [vmem:[%s2789_s1 + $0xf0] sm:$0xff] }
  0x64   : > { %653 = vmatpush.msra.mxu0 %v226_v49  ;;  %673 = vmatpush.msra.mxu1 %v290_v50  ;;  %v304_v48 = vld [vmem:[%s2789_s1 + $0x2f0] sm:$0xff]  ;;  %v241_v49 = vld [vmem:[%s2789_s1 + $0xf8] sm:$0xff] }
  0x65   : > { %693 = vmatpush.msra.mxu2 %v227_v51  ;;  %713 = vmatpush.msra.mxu3 %v291_v52  ;;  %v305_v50 = vld [vmem:[%s2789_s1 + $0x2f8] sm:$0xff]  ;;  %v236_v51 = vld [vmem:[%s2789_s1 + $0xd0] sm:$0xff] }
  0x66   : > { %565 = vmatmul.f32.vlgmr.msrb.gmra.mxu0 %v1841_v26  ;;  %605 = vmatmul.f32.vlgmr.msrb.gmra.mxu2 %v1841_v26  ;;  %v283_v26 = vld [vmem:[%s2789_s1 + $0x248] sm:$0xff]  ;;  %v300_v52 = vld [vmem:[%s2789_s1 + $0x2d0] sm:$0xff]  ;;  %v225_v0 = vld [vmem:[%s2789_s1 + $0x78] sm:$0xff] }
  0x67   : > { %654 = vmatpush.msra.mxu0 %v222_v53  ;;  %674 = vmatpush.msra.mxu1 %v286_v54  ;;  %v237_v53 = vld [vmem:[%s2789_s1 + $0xd8] sm:$0xff]  ;;  %v212_v9 = vld [vmem:[%s2789_s1 + $0x10] sm:$0xff] }
  0x68   : > { %694 = vmatpush.msra.mxu2 %v223_v55  ;;  %714 = vmatpush.msra.mxu3 %v287_v56  ;;  %v301_v54 = vld [vmem:[%s2789_s1 + $0x2d8] sm:$0xff]  ;;  %v232_v55 = vld [vmem:[%s2789_s1 + $0xb0] sm:$0xff] }
  0x69   : > { %585 = vmatmul.f32.vlgmr.msrb.gmra.mxu1 %v1850_v29  ;;  %625 = vmatmul.f32.vlgmr.msrb.gmra.mxu3 %v1850_v29  ;;  %v210_v29 = vld [vmem:[%s2789_s1] sm:$0xff]  ;;  %v296_v56 = vld [vmem:[%s2789_s1 + $0x2b0] sm:$0xff]  ;;  %v289_v1 = vld [vmem:[%s2789_s1 + $0x278] sm:$0xff] }
  0x6a   : > { %655 = vmatpush.msra.mxu0 %v218_v59  ;;  %675 = vmatpush.msra.mxu1 %v282_v60  ;;  %v228_v59 = vld [vmem:[%s2789_s1 + $0x90] sm:$0xff] }
  0x6b   : > { %695 = vmatpush.msra.mxu2 %v219_v61  ;;  %715 = vmatpush.msra.mxu3 %v283_v26  ;;  %v292_v60 = vld [vmem:[%s2789_s1 + $0x290] sm:$0xff]  ;;  %v229_v61 = vld [vmem:[%s2789_s1 + $0x98] sm:$0xff] }
  0x6c   : > { %656 = vmatpush.msra.mxu0 %v214_v62  ;;  %676 = vmatpush.msra.mxu1 %v278_v63  ;;  %v293_v26 = vld [vmem:[%s2789_s1 + $0x298] sm:$0xff]  ;;  %v224_v62 = vld [vmem:[%s2789_s1 + $0x70] sm:$0xff] }
  0x6d   : > { %696 = vmatpush.msra.mxu2 %v215_v4  ;;  %716 = vmatpush.msra.mxu3 %v279_v5  ;;  %v288_v63 = vld [vmem:[%s2789_s1 + $0x270] sm:$0xff]  ;;  %v221_v4 = vld [vmem:[%s2789_s1 + $0x58] sm:$0xff] }
  0x6e   : > { %657 = vmatpush.msra.mxu0 %v210_v29  ;;  %677 = vmatpush.msra.mxu1 %v274_v6  ;;  %v285_v5 = vld [vmem:[%s2789_s1 + $0x258] sm:$0xff]  ;;  %v216_v29 = vld [vmem:[%s2789_s1 + $0x30] sm:$0xff] }
  0x6f   : > { %697 = vmatpush.msra.mxu2 %v211_v7  ;;  %717 = vmatpush.msra.mxu3 %v275_v8  ;;  %v280_v6 = vld [vmem:[%s2789_s1 + $0x230] sm:$0xff]  ;;  %v217_v7 = vld [vmem:[%s2789_s1 + $0x38] sm:$0xff] }
  0x70   : > { %658 = vmatmul.f32.vlgmr.msra.gmra.mxu0 %v2162_v11  ;;  %698 = vmatmul.f32.vlgmr.msra.gmra.mxu2 %v2162_v11  ;;  %v281_v8 = vld [vmem:[%s2789_s1 + $0x238] sm:$0xff]  ;;  %v276_v10 = vld [vmem:[%s2789_s1 + $0x210] sm:$0xff] }
  0x71   : > { %722 = vmatpush.msrb.mxu0 %v272_v12  ;;  %742 = vmatpush.msrb.mxu1 %v336_v13  ;;  %v213_v12 = vld [vmem:[%s2789_s1 + $0x18] sm:$0xff] }
  0x72   : > { %762 = vmatpush.msrb.mxu2 %v273_v14  ;;  %782 = vmatpush.msrb.mxu3 %v337_v15  ;;  %v277_v13 = vld [vmem:[%s2789_s1 + $0x218] sm:$0xff]  ;;  %v1420_v14 = vld [vmem:[%s2789_s1 + $0x9e0] sm:$0xff] }
  0x73   : > { %678 = vmatmul.f32.vlgmr.msra.gmra.mxu1 %v2179_v16  ;;  %718 = vmatmul.f32.vlgmr.msra.gmra.mxu3 %v2179_v16  ;;  %v1484_v15 = vld [vmem:[%s2789_s1 + $0xbe0] sm:$0xff] }
  0x74   : > { %723 = vmatpush.msrb.mxu0 %v268_v17  ;;  %743 = vmatpush.msrb.mxu1 %v332_v18  ;;  %v1421_v17 = vld [vmem:[%s2789_s1 + $0x9e8] sm:$0xff] }
  0x75   : > { %763 = vmatpush.msrb.mxu2 %v269_v19  ;;  %783 = vmatpush.msrb.mxu3 %v333_v20  ;;  %v1485_v18 = vld [vmem:[%s2789_s1 + $0xbe8] sm:$0xff]  ;;  %v1416_v19 = vld [vmem:[%s2789_s1 + $0x9c0] sm:$0xff] }
  0x76   : > { %724 = vmatpush.msrb.mxu0 %v264_v21  ;;  %744 = vmatpush.msrb.mxu1 %v328_v22  ;;  %v1480_v20 = vld [vmem:[%s2789_s1 + $0xbc0] sm:$0xff]  ;;  %v1417_v21 = vld [vmem:[%s2789_s1 + $0x9c8] sm:$0xff] }
  0x77   : > { %764 = vmatpush.msrb.mxu2 %v265_v23  ;;  %784 = vmatpush.msrb.mxu3 %v329_v24  ;;  %v1412_v22 = vld [vmem:[%s2789_s1 + $0x9a0] sm:$0xff]  ;;  %v1413_v24 = vld [vmem:[%s2789_s1 + $0x9a8] sm:$0xff] }
  0x78   : > { %725 = vmatpush.msrb.mxu0 %v260_v25  ;;  %745 = vmatpush.msrb.mxu1 %v324_v27  ;;  %v1476_v23 = vld [vmem:[%s2789_s1 + $0xba0] sm:$0xff]  ;;  %v1477_v25 = vld [vmem:[%s2789_s1 + $0xba8] sm:$0xff] }
  0x79   : > { %765 = vmatpush.msrb.mxu2 %v261_v28  ;;  %785 = vmatpush.msrb.mxu3 %v325_v30  ;;  %v1472_v27 = vld [vmem:[%s2789_s1 + $0xb80] sm:$0xff]  ;;  %v1409_v28 = vld [vmem:[%s2789_s1 + $0x988] sm:$0xff] }
  0x7a   : > { %726 = vmatpush.msrb.mxu0 %v256_v31  ;;  %746 = vmatpush.msrb.mxu1 %v320_v32  ;;  %v1473_v30 = vld [vmem:[%s2789_s1 + $0xb88] sm:$0xff]  ;;  %v1404_v31 = vld [vmem:[%s2789_s1 + $0x960] sm:$0xff] }
  0x7b   : > { %766 = vmatpush.msrb.mxu2 %v257_v33  ;;  %786 = vmatpush.msrb.mxu3 %v321_v34  ;;  %v1468_v32 = vld [vmem:[%s2789_s1 + $0xb60] sm:$0xff]  ;;  %v1405_v33 = vld [vmem:[%s2789_s1 + $0x968] sm:$0xff] }
  0x7c   : > { %727 = vmatpush.msrb.mxu0 %v252_v35  ;;  %747 = vmatpush.msrb.mxu1 %v316_v36  ;;  %v1469_v34 = vld [vmem:[%s2789_s1 + $0xb68] sm:$0xff]  ;;  %v1400_v35 = vld [vmem:[%s2789_s1 + $0x940] sm:$0xff] }
  0x7d   : > { %767 = vmatpush.msrb.mxu2 %v253_v37  ;;  %787 = vmatpush.msrb.mxu3 %v317_v38  ;;  %v1464_v36 = vld [vmem:[%s2789_s1 + $0xb40] sm:$0xff]  ;;  %v1401_v37 = vld [vmem:[%s2789_s1 + $0x948] sm:$0xff] }
  0x7e   : > { %728 = vmatpush.msrb.mxu0 %v248_v39  ;;  %748 = vmatpush.msrb.mxu1 %v312_v40  ;;  %v1465_v38 = vld [vmem:[%s2789_s1 + $0xb48] sm:$0xff]  ;;  %v1396_v39 = vld [vmem:[%s2789_s1 + $0x920] sm:$0xff] }
  0x7f   : > { %768 = vmatpush.msrb.mxu2 %v249_v41  ;;  %788 = vmatpush.msrb.mxu3 %v313_v42  ;;  %v1460_v40 = vld [vmem:[%s2789_s1 + $0xb20] sm:$0xff]  ;;  %v1397_v41 = vld [vmem:[%s2789_s1 + $0x928] sm:$0xff] }
  0x80   : > { %729 = vmatpush.msrb.mxu0 %v244_v43  ;;  %749 = vmatpush.msrb.mxu1 %v308_v44  ;;  %v1461_v42 = vld [vmem:[%s2789_s1 + $0xb28] sm:$0xff]  ;;  %v1392_v43 = vld [vmem:[%s2789_s1 + $0x900] sm:$0xff] }
  0x81   : > { %769 = vmatpush.msrb.mxu2 %v245_v45  ;;  %789 = vmatpush.msrb.mxu3 %v309_v46  ;;  %v1456_v44 = vld [vmem:[%s2789_s1 + $0xb00] sm:$0xff]  ;;  %v1393_v45 = vld [vmem:[%s2789_s1 + $0x908] sm:$0xff] }
  0x82   : > { %730 = vmatpush.msrb.mxu0 %v240_v47  ;;  %750 = vmatpush.msrb.mxu1 %v304_v48  ;;  %v1457_v46 = vld [vmem:[%s2789_s1 + $0xb08] sm:$0xff]  ;;  %v1388_v47 = vld [vmem:[%s2789_s1 + $0x8e0] sm:$0xff] }
  0x83   : > { %770 = vmatpush.msrb.mxu2 %v241_v49  ;;  %790 = vmatpush.msrb.mxu3 %v305_v50  ;;  %v1452_v48 = vld [vmem:[%s2789_s1 + $0xae0] sm:$0xff]  ;;  %v1389_v49 = vld [vmem:[%s2789_s1 + $0x8e8] sm:$0xff] }
  0x84   : > { %731 = vmatpush.msrb.mxu0 %v236_v51  ;;  %751 = vmatpush.msrb.mxu1 %v300_v52  ;;  %v1453_v50 = vld [vmem:[%s2789_s1 + $0xae8] sm:$0xff]  ;;  %v1384_v51 = vld [vmem:[%s2789_s1 + $0x8c0] sm:$0xff] }
  0x85   : > { %771 = vmatpush.msrb.mxu2 %v237_v53  ;;  %791 = vmatpush.msrb.mxu3 %v301_v54  ;;  %v1448_v52 = vld [vmem:[%s2789_s1 + $0xac0] sm:$0xff]  ;;  %v1385_v53 = vld [vmem:[%s2789_s1 + $0x8c8] sm:$0xff] }
  0x86   : > { %732 = vmatpush.msrb.mxu0 %v232_v55  ;;  %752 = vmatpush.msrb.mxu1 %v296_v56  ;;  %v1449_v54 = vld [vmem:[%s2789_s1 + $0xac8] sm:$0xff]  ;;  %v1380_v55 = vld [vmem:[%s2789_s1 + $0x8a0] sm:$0xff] }
  0x87   : > { %772 = vmatpush.msrb.mxu2 %v233_v57  ;;  %792 = vmatpush.msrb.mxu3 %v297_v58  ;;  %v1444_v56 = vld [vmem:[%s2789_s1 + $0xaa0] sm:$0xff]  ;;  %v1381_v57 = vld [vmem:[%s2789_s1 + $0x8a8] sm:$0xff] }
  0x88   : > { %733 = vmatpush.msrb.mxu0 %v228_v59  ;;  %753 = vmatpush.msrb.mxu1 %v292_v60  ;;  %v1445_v58 = vld [vmem:[%s2789_s1 + $0xaa8] sm:$0xff]  ;;  %v1376_v59 = vld [vmem:[%s2789_s1 + $0x880] sm:$0xff] }
  0x89   : > { %773 = vmatpush.msrb.mxu2 %v229_v61  ;;  %793 = vmatpush.msrb.mxu3 %v293_v26  ;;  %v1440_v60 = vld [vmem:[%s2789_s1 + $0xa80] sm:$0xff]  ;;  %v1377_v61 = vld [vmem:[%s2789_s1 + $0x888] sm:$0xff] }
  0x8a   : > { %734 = vmatpush.msrb.mxu0 %v224_v62  ;;  %754 = vmatpush.msrb.mxu1 %v288_v63  ;;  %v1441_v26 = vld [vmem:[%s2789_s1 + $0xa88] sm:$0xff]  ;;  %v1372_v62 = vld [vmem:[%s2789_s1 + $0x860] sm:$0xff] }
  0x8b   : > { %774 = vmatpush.msrb.mxu2 %v225_v0  ;;  %794 = vmatpush.msrb.mxu3 %v289_v1  ;;  %v1436_v63 = vld [vmem:[%s2789_s1 + $0xa60] sm:$0xff]  ;;  %v1373_v0 = vld [vmem:[%s2789_s1 + $0x868] sm:$0xff] }
  0x8c   : > { %735 = vmatpush.msrb.mxu0 %v220_v2  ;;  %755 = vmatpush.msrb.mxu1 %v284_v3  ;;  %v1437_v1 = vld [vmem:[%s2789_s1 + $0xa68] sm:$0xff] }
  0x8d   : > { %775 = vmatpush.msrb.mxu2 %v221_v4  ;;  %795 = vmatpush.msrb.mxu3 %v285_v5  ;;  %v802_v2 = vld [vmem:[#allocation2 + $0x28] sm:$0xfe]  ;;  %v804_v3 = vld [vmem:[#allocation2 + $0x8] sm:$0x1]  ;;  %v803_v4 = vld [vmem:[#allocation2 + $0x10] sm:$0xfe] }
  0x8e   : > { %736 = vmatpush.msrb.mxu0 %v216_v29  ;;  %756 = vmatpush.msrb.mxu1 %v280_v6  ;;  %v805_v5 = vld [vmem:[#allocation2] sm:$0x1] }
  0x8f   : > { %776 = vmatpush.msrb.mxu2 %v217_v7  ;;  %796 = vmatpush.msrb.mxu3 %v281_v8  ;;  %v1368_v29 = vld [vmem:[%s2789_s1 + $0x840] sm:$0xff]  ;;  %v1369_v7 = vld [vmem:[%s2789_s1 + $0x848] sm:$0xff] }
  0x90   : > { %737 = vmatpush.msrb.mxu0 %v212_v9  ;;  %757 = vmatpush.msrb.mxu1 %v276_v10  ;;  %v1432_v6 = vld [vmem:[%s2789_s1 + $0xa40] sm:$0xff]  ;;  %v1433_v8 = vld [vmem:[%s2789_s1 + $0xa48] sm:$0xff] }
  0x91   : > { %777 = vmatpush.msrb.mxu2 %v213_v12  ;;  %797 = vmatpush.msrb.mxu3 %v277_v13  ;;  %v1364_v9 = vld [vmem:[%s2789_s1 + $0x820] sm:$0xff]  ;;  %v940_v12 = vrot.slane %v802_v2, 1  ;;  %v941_v13 = vrot.slane %v804_v3, 1  ;;  %v1383_v2 = vld [vmem:[%s2789_s1 + $0x8b8] sm:$0xff] }
  0x92   : > { %738 = vmatmul.f32.vlgmr.msrb.gmra.mxu0 %v2162_v11  ;;  %778 = vmatmul.f32.vlgmr.msrb.gmra.mxu2 %v2162_v11  ;;  %v1481_v11 = vld [vmem:[%s2789_s1 + $0xbc8] sm:$0xff]  ;;  %v1428_v10 = vld [vmem:[%s2789_s1 + $0xa20] sm:$0xff]  ;;  %v1447_v3 = vld [vmem:[%s2789_s1 + $0xab8] sm:$0xff] }
  0x93   : > { %948 = vmatpush.msra.mxu0 %v1420_v14  ;;  %968 = vmatpush.msra.mxu1 %v1484_v15  ;;  %v943_v14 = vrot.slane %v803_v4, 1  ;;  %v944_v15 = vrot.slane %v805_v5, 1  ;;  %v1378_v4 = vld [vmem:[%s2789_s1 + $0x890] sm:$0xff] }
  0x94   : > { %988 = vmatpush.msra.mxu2 %v1421_v17  ;;  %1008 = vmatpush.msra.mxu3 %v1485_v18  ;;  %v1365_v17 = vld [vmem:[%s2789_s1 + $0x828] sm:$0xff]  ;;  %v1442_v5 = vld [vmem:[%s2789_s1 + $0xa90] sm:$0xff] }
  0x95   : > { %758 = vmatmul.f32.vlgmr.msrb.gmra.mxu1 %v2179_v16  ;;  %798 = vmatmul.f32.vlgmr.msrb.gmra.mxu3 %v2179_v16  ;;  %v1408_v16 = vld [vmem:[%s2789_s1 + $0x980] sm:$0xff]  ;;  %v1429_v18 = vld [vmem:[%s2789_s1 + $0xa28] sm:$0xff] }
  0x96   : > { %949 = vmatpush.msra.mxu0 %v1416_v19  ;;  %969 = vmatpush.msra.mxu1 %v1480_v20  ;;  %v1360_v19 = vld [vmem:[%s2789_s1 + $0x800] sm:$0xff] }
  0x97   : > { %989 = vmatpush.msra.mxu2 %v1417_v21  ;;  %1009 = vmatpush.msra.mxu3 %v1481_v11  ;;  %v1424_v20 = vld [vmem:[%s2789_s1 + $0xa00] sm:$0xff]  ;;  %v1361_v21 = vld [vmem:[%s2789_s1 + $0x808] sm:$0xff] }
  0x98   : > { %950 = vmatpush.msra.mxu0 %v1412_v22  ;;  %970 = vmatpush.msra.mxu1 %v1476_v23  ;;  %v1425_v11 = vld [vmem:[%s2789_s1 + $0xa08] sm:$0xff]  ;;  %v2559_v22 = vsel %vm939_vm1, %v940_v12, %v941_v13  ;;  %v2561_v23 = vsel %vm939_vm1, %v943_v14, %v944_v15  ;;  %v1370_v12 = vld [vmem:[%s2789_s1 + $0x850] sm:$0xff]  ;;  %v1371_v14 = vld [vmem:[%s2789_s1 + $0x858] sm:$0xff] }
  0x99   : > { %990 = vmatpush.msra.mxu2 %v1413_v24  ;;  %1010 = vmatpush.msra.mxu3 %v1477_v25  ;;  %v1422_v24 = vld [vmem:[%s2789_s1 + $0x9f0] sm:$0xff]  ;;  %v1435_v15 = vld [vmem:[%s2789_s1 + $0xa58] sm:$0xff] }
  0x9a   : > { %951 = vmatpush.msra.mxu0 %v1408_v16  ;;  %971 = vmatpush.msra.mxu1 %v1472_v27  ;;  %v1486_v25 = vld [vmem:[%s2789_s1 + $0xbf0] sm:$0xff]  ;;  %v1423_v16 = vld [vmem:[%s2789_s1 + $0x9f8] sm:$0xff] }
  0x9b   : > { %991 = vmatpush.msra.mxu2 %v1409_v28  ;;  %1011 = vmatpush.msra.mxu3 %v1473_v30  ;;  %v1487_v27 = vld [vmem:[%s2789_s1 + $0xbf8] sm:$0xff]  ;;  %v1418_v28 = vld [vmem:[%s2789_s1 + $0x9d0] sm:$0xff] }
  0x9c   : > { %952 = vmatpush.msra.mxu0 %v1404_v31  ;;  %972 = vmatpush.msra.mxu1 %v1468_v32  ;;  %v1482_v30 = vld [vmem:[%s2789_s1 + $0xbd0] sm:$0xff]  ;;  %v1419_v31 = vld [vmem:[%s2789_s1 + $0x9d8] sm:$0xff] }
  0x9d   : > { %992 = vmatpush.msra.mxu2 %v1405_v33  ;;  %1012 = vmatpush.msra.mxu3 %v1469_v34  ;;  %v1483_v32 = vld [vmem:[%s2789_s1 + $0xbd8] sm:$0xff]  ;;  %v1414_v33 = vld [vmem:[%s2789_s1 + $0x9b0] sm:$0xff] }
  0x9e   : > { %953 = vmatpush.msra.mxu0 %v1400_v35  ;;  %973 = vmatpush.msra.mxu1 %v1464_v36  ;;  %v1478_v34 = vld [vmem:[%s2789_s1 + $0xbb0] sm:$0xff]  ;;  %v1415_v35 = vld [vmem:[%s2789_s1 + $0x9b8] sm:$0xff] }
  0x9f   : > { %993 = vmatpush.msra.mxu2 %v1401_v37  ;;  %1013 = vmatpush.msra.mxu3 %v1465_v38  ;;  %v1479_v36 = vld [vmem:[%s2789_s1 + $0xbb8] sm:$0xff]  ;;  %v1410_v37 = vld [vmem:[%s2789_s1 + $0x990] sm:$0xff] }
  0xa0   : > { %954 = vmatpush.msra.mxu0 %v1396_v39  ;;  %974 = vmatpush.msra.mxu1 %v1460_v40  ;;  %v1474_v38 = vld [vmem:[%s2789_s1 + $0xb90] sm:$0xff]  ;;  %v1411_v39 = vld [vmem:[%s2789_s1 + $0x998] sm:$0xff] }
  0xa1   : > { %994 = vmatpush.msra.mxu2 %v1397_v41  ;;  %1014 = vmatpush.msra.mxu3 %v1461_v42  ;;  %v1475_v40 = vld [vmem:[%s2789_s1 + $0xb98] sm:$0xff]  ;;  %v1406_v41 = vld [vmem:[%s2789_s1 + $0x970] sm:$0xff] }
  0xa2   : > { %955 = vmatpush.msra.mxu0 %v1392_v43  ;;  %975 = vmatpush.msra.mxu1 %v1456_v44  ;;  %v1470_v42 = vld [vmem:[%s2789_s1 + $0xb70] sm:$0xff]  ;;  %v1407_v43 = vld [vmem:[%s2789_s1 + $0x978] sm:$0xff] }
  0xa3   : > { %995 = vmatpush.msra.mxu2 %v1393_v45  ;;  %1015 = vmatpush.msra.mxu3 %v1457_v46  ;;  %v1471_v44 = vld [vmem:[%s2789_s1 + $0xb78] sm:$0xff]  ;;  %v1402_v45 = vld [vmem:[%s2789_s1 + $0x950] sm:$0xff] }
  0xa4   : > { %956 = vmatpush.msra.mxu0 %v1388_v47  ;;  %976 = vmatpush.msra.mxu1 %v1452_v48  ;;  %v1466_v46 = vld [vmem:[%s2789_s1 + $0xb50] sm:$0xff]  ;;  %v1403_v47 = vld [vmem:[%s2789_s1 + $0x958] sm:$0xff] }
  0xa5   : > { %996 = vmatpush.msra.mxu2 %v1389_v49  ;;  %1016 = vmatpush.msra.mxu3 %v1453_v50  ;;  %v1467_v48 = vld [vmem:[%s2789_s1 + $0xb58] sm:$0xff]  ;;  %v1398_v49 = vld [vmem:[%s2789_s1 + $0x930] sm:$0xff] }
  0xa6   : > { %957 = vmatpush.msra.mxu0 %v1384_v51  ;;  %977 = vmatpush.msra.mxu1 %v1448_v52  ;;  %v1462_v50 = vld [vmem:[%s2789_s1 + $0xb30] sm:$0xff]  ;;  %v1399_v51 = vld [vmem:[%s2789_s1 + $0x938] sm:$0xff] }
  0xa7   : > { %997 = vmatpush.msra.mxu2 %v1385_v53  ;;  %1017 = vmatpush.msra.mxu3 %v1449_v54  ;;  %v1463_v52 = vld [vmem:[%s2789_s1 + $0xb38] sm:$0xff]  ;;  %v1394_v53 = vld [vmem:[%s2789_s1 + $0x910] sm:$0xff] }
  0xa8   : > { %958 = vmatpush.msra.mxu0 %v1380_v55  ;;  %978 = vmatpush.msra.mxu1 %v1444_v56  ;;  %v1458_v54 = vld [vmem:[%s2789_s1 + $0xb10] sm:$0xff]  ;;  %v1395_v55 = vld [vmem:[%s2789_s1 + $0x918] sm:$0xff] }
  0xa9   : > { %998 = vmatpush.msra.mxu2 %v1381_v57  ;;  %1018 = vmatpush.msra.mxu3 %v1445_v58  ;;  %v1459_v56 = vld [vmem:[%s2789_s1 + $0xb18] sm:$0xff]  ;;  %v1390_v57 = vld [vmem:[%s2789_s1 + $0x8f0] sm:$0xff] }
  0xaa   : > { %959 = vmatpush.msra.mxu0 %v1376_v59  ;;  %979 = vmatpush.msra.mxu1 %v1440_v60  ;;  %v1454_v58 = vld [vmem:[%s2789_s1 + $0xaf0] sm:$0xff]  ;;  %v1391_v59 = vld [vmem:[%s2789_s1 + $0x8f8] sm:$0xff] }
  0xab   : > { %999 = vmatpush.msra.mxu2 %v1377_v61  ;;  %1019 = vmatpush.msra.mxu3 %v1441_v26  ;;  %v1455_v60 = vld [vmem:[%s2789_s1 + $0xaf8] sm:$0xff]  ;;  %v1386_v61 = vld [vmem:[%s2789_s1 + $0x8d0] sm:$0xff] }
  0xac   : > { %960 = vmatpush.msra.mxu0 %v1372_v62  ;;  %980 = vmatpush.msra.mxu1 %v1436_v63  ;;  %v1450_v26 = vld [vmem:[%s2789_s1 + $0xad0] sm:$0xff]  ;;  %v1387_v62 = vld [vmem:[%s2789_s1 + $0x8d8] sm:$0xff] }
  0xad   : > { %1000 = vmatpush.msra.mxu2 %v1373_v0  ;;  %1020 = vmatpush.msra.mxu3 %v1437_v1  ;;  %v1451_v63 = vld [vmem:[%s2789_s1 + $0xad8] sm:$0xff]  ;;  %v1382_v0 = vld [vmem:[%s2789_s1 + $0x8b0] sm:$0xff] }
  0xae   : > { %961 = vmatpush.msra.mxu0 %v1368_v29  ;;  %981 = vmatpush.msra.mxu1 %v1432_v6  ;;  %v1446_v1 = vld [vmem:[%s2789_s1 + $0xab0] sm:$0xff]  ;;  %v1379_v29 = vld [vmem:[%s2789_s1 + $0x898] sm:$0xff] }
  0xaf   : > { %1001 = vmatpush.msra.mxu2 %v1369_v7  ;;  %1021 = vmatpush.msra.mxu3 %v1433_v8  ;;  %v1443_v6 = vld [vmem:[%s2789_s1 + $0xa98] sm:$0xff]  ;;  %v1374_v7 = vld [vmem:[%s2789_s1 + $0x870] sm:$0xff] }
  0xb0   : > { %962 = vmatpush.msra.mxu0 %v1364_v9  ;;  %982 = vmatpush.msra.mxu1 %v1428_v10  ;;  %v1438_v8 = vld [vmem:[%s2789_s1 + $0xa70] sm:$0xff]  ;;  %v1375_v9 = vld [vmem:[%s2789_s1 + $0x878] sm:$0xff] }
  0xb1   : > { %1002 = vmatpush.msra.mxu2 %v1365_v17  ;;  %1022 = vmatpush.msra.mxu3 %v1429_v18  ;;  %v1439_v10 = vld [vmem:[%s2789_s1 + $0xa78] sm:$0xff]  ;;  %v1434_v13 = vld [vmem:[%s2789_s1 + $0xa50] sm:$0xff] }
  0xb2   : > { %963 = vmatpush.msra.mxu0 %v1360_v19  ;;  %983 = vmatpush.msra.mxu1 %v1424_v20  ;;  %v1366_v17 = vld [vmem:[%s2789_s1 + $0x830] sm:$0xff]  ;;  %v1367_v19 = vld [vmem:[%s2789_s1 + $0x838] sm:$0xff] }
  0xb3   : > { %1003 = vmatpush.msra.mxu2 %v1361_v21  ;;  %1023 = vmatpush.msra.mxu3 %v1425_v11  ;;  %v1430_v18 = vld [vmem:[%s2789_s1 + $0xa30] sm:$0xff]  ;;  %v1431_v20 = vld [vmem:[%s2789_s1 + $0xa38] sm:$0xff] }
  0xb4   : > { %964 = vmatmul.f32.vlgmr.msra.gmra.mxu0 %v2559_v22  ;;  %984 = vmatmul.f32.vlgmr.msra.gmra.mxu1 %v2561_v23  ;;  %v1362_v21 = vld [vmem:[%s2789_s1 + $0x810] sm:$0xff] }
  0xb5   : > { %1004 = vmatmul.f32.vlgmr.msra.gmra.mxu2 %v2559_v22  ;;  %1024 = vmatmul.f32.vlgmr.msra.gmra.mxu3 %v2561_v23  ;;  %v1426_v11 = vld [vmem:[%s2789_s1 + $0xa10] sm:$0xff] }
  0xb6   : > { %1028 = vmatpush.msrb.mxu0 %v1422_v24  ;;  %1048 = vmatpush.msrb.mxu1 %v1486_v25  ;;  %v1363_v24 = vld [vmem:[%s2789_s1 + $0x818] sm:$0xff] }
  0xb7   : > { %1068 = vmatpush.msrb.mxu2 %v1423_v16  ;;  %1088 = vmatpush.msrb.mxu3 %v1487_v27  ;;  %v1427_v25 = vld [vmem:[%s2789_s1 + $0xa18] sm:$0xff] }
  0xb8   : > { %1029 = vmatpush.msrb.mxu0 %v1418_v28  ;;  %1049 = vmatpush.msrb.mxu1 %v1482_v30 }
  0xb9   : > { %1069 = vmatpush.msrb.mxu2 %v1419_v31  ;;  %1089 = vmatpush.msrb.mxu3 %v1483_v32 }
  0xba   : > { %1030 = vmatpush.msrb.mxu0 %v1414_v33  ;;  %1050 = vmatpush.msrb.mxu1 %v1478_v34 }
  0xbb   : > { %1070 = vmatpush.msrb.mxu2 %v1415_v35  ;;  %1090 = vmatpush.msrb.mxu3 %v1479_v36 }
  0xbc   : > { %1031 = vmatpush.msrb.mxu0 %v1410_v37  ;;  %1051 = vmatpush.msrb.mxu1 %v1474_v38 }
  0xbd   : > { %1071 = vmatpush.msrb.mxu2 %v1411_v39  ;;  %1091 = vmatpush.msrb.mxu3 %v1475_v40 }
  0xbe   : > { %1032 = vmatpush.msrb.mxu0 %v1406_v41  ;;  %1052 = vmatpush.msrb.mxu1 %v1470_v42 }
  0xbf   : > { %1072 = vmatpush.msrb.mxu2 %v1407_v43  ;;  %1092 = vmatpush.msrb.mxu3 %v1471_v44 }
  0xc0   : > { %1033 = vmatpush.msrb.mxu0 %v1402_v45  ;;  %1053 = vmatpush.msrb.mxu1 %v1466_v46  ;;  %v1126_v46 = vld [vmem:[%s2791_s3] sm:$0xf] }
  0xc1   : > { %1073 = vmatpush.msrb.mxu2 %v1403_v47  ;;  %1093 = vmatpush.msrb.mxu3 %v1467_v48 }
  0xc2   : > { %1034 = vmatpush.msrb.mxu0 %v1398_v49  ;;  %1054 = vmatpush.msrb.mxu1 %v1462_v50 }
  0xc3   : > { %1074 = vmatpush.msrb.mxu2 %v1399_v51  ;;  %1094 = vmatpush.msrb.mxu3 %v1463_v52  ;;  %v1128_v52 = vperm.slane %v1126_v46, 0 }
  0xc4   : > { %1035 = vmatpush.msrb.mxu0 %v1394_v53  ;;  %1055 = vmatpush.msrb.mxu1 %v1458_v54 }
  0xc5   : > { %1075 = vmatpush.msrb.mxu2 %v1395_v55  ;;  %1095 = vmatpush.msrb.mxu3 %v1459_v56 }
  0xc6   : > { %1036 = vmatpush.msrb.mxu0 %v1390_v57  ;;  %1056 = vmatpush.msrb.mxu1 %v1454_v58 }
  0xc7   : > { %1076 = vmatpush.msrb.mxu2 %v1391_v59  ;;  %1096 = vmatpush.msrb.mxu3 %v1455_v60 }
  0xc8   : > { %1037 = vmatpush.msrb.mxu0 %v1386_v61  ;;  %1057 = vmatpush.msrb.mxu1 %v1450_v26 }
  0xc9   : > { %1077 = vmatpush.msrb.mxu2 %v1387_v62  ;;  %1097 = vmatpush.msrb.mxu3 %v1451_v63  ;;  %v486_v16 = vpop.f32.mrf.mxu0  ;;  %v506_v27 = vpop.f32.mrf.mxu1  ;;  %v1129_v62 = vperm.slane %v1126_v46, 1 }
  0xca   : > { %1038 = vmatpush.msrb.mxu0 %v1382_v0  ;;  %1058 = vmatpush.msrb.mxu1 %v1446_v1  ;;  %v507_v41 = vadd.f32 %v506_v27, %v486_v16 }
  0xcb   : > { %1078 = vmatpush.msrb.mxu2 %v1383_v2  ;;  %1098 = vmatpush.msrb.mxu3 %v1447_v3 }
  0xcc   : > { %1039 = vmatpush.msrb.mxu0 %v1378_v4  ;;  %1059 = vmatpush.msrb.mxu1 %v1442_v5 }
  0xcd   : > { %1079 = vmatpush.msrb.mxu2 %v1379_v29  ;;  %1099 = vmatpush.msrb.mxu3 %v1443_v6 }
  0xce   : > { %1040 = vmatpush.msrb.mxu0 %v1374_v7  ;;  %1060 = vmatpush.msrb.mxu1 %v1438_v8 }
  0xcf   : > { %1080 = vmatpush.msrb.mxu2 %v1375_v9  ;;  %1100 = vmatpush.msrb.mxu3 %v1439_v10 }
  0xd0   : > { %1041 = vmatpush.msrb.mxu0 %v1370_v12  ;;  %1061 = vmatpush.msrb.mxu1 %v1434_v13  ;;  %v526_v28 = vpop.f32.mrf.mxu2  ;;  %v546_v30 = vpop.f32.mrf.mxu3 }
  0xd1   : > { %1081 = vmatpush.msrb.mxu2 %v1371_v14  ;;  %1101 = vmatpush.msrb.mxu3 %v1435_v15  ;;  %v547_v50 = vadd.f32 %v546_v30, %v526_v28 }
  0xd2   : > { %1042 = vmatpush.msrb.mxu0 %v1366_v17  ;;  %1062 = vmatpush.msrb.mxu1 %v1430_v18 }
  0xd3   : > { %1082 = vmatpush.msrb.mxu2 %v1367_v19  ;;  %1102 = vmatpush.msrb.mxu3 %v1431_v20  ;;  %v1130_v20 = vperm.slane %v1126_v46, 2 }
  0xd4   : > { %1043 = vmatpush.msrb.mxu0 %v1362_v21  ;;  %1063 = vmatpush.msrb.mxu1 %v1426_v11 }
  0xd5   : > { %1083 = vmatpush.msrb.mxu2 %v1363_v24  ;;  %1103 = vmatpush.msrb.mxu3 %v1427_v25 }
  0xd6   : > { %1044 = vmatmul.f32.vlgmr.msrb.gmra.mxu0 %v2559_v22  ;;  %1064 = vmatmul.f32.vlgmr.msrb.gmra.mxu1 %v2561_v23 }
  0xd7   : > { %1084 = vmatmul.f32.vlgmr.msrb.gmra.mxu2 %v2559_v22  ;;  %1104 = vmatmul.f32.vlgmr.msrb.gmra.mxu3 %v2561_v23  ;;  %v2766_v22 = vld [vmem:[%s2790_s2] sm:$0xf] }
  0xd8   : > { %v1114_v49 = vperm.slane %v2766_v22, 0  ;;  %v1115_v60 = vperm.slane %v2766_v22, 1  ;;  %v1116_v17 = vperm.slane %v2766_v22, 2  ;;  %v1117_v30 = vperm.slane %v2766_v22, 3 }
  0xe3   : > { %v566_v31 = vpop.f32.mrf.mxu0 }
  0xe6   : > { %v586_v32 = vpop.f32.mrf.mxu1 }
  0xe7   : > { %v587_v8 = vadd.f32 %v586_v32, %v566_v31 }
  0xe9   : > { %v606_v33 = vpop.f32.mrf.mxu2 }
  0xec   : > { %v626_v34 = vpop.f32.mrf.mxu3 }
  0xed   : > { %v659_v35 = vpop.f32.mrf.mxu0  ;;  %v627_v18 = vadd.f32 %v626_v34, %v606_v33 }
  0xee   : > { %v660_v42 = vadd.f32 %v659_v35, %v507_v41  ;;  %v1131_v35 = vperm.slane %v1126_v46, 3 }
  0xf0   : > { %v679_v36 = vpop.f32.mrf.mxu1 }
  0xf1   : > { %v680_v47 = vadd.f32 %v679_v36, %v660_v42 }
  0xf3   : > { %v699_v37 = vpop.f32.mrf.mxu2 }
  0xf4   : > { %v700_v53 = vadd.f32 %v699_v37, %v547_v50 }
  0xf6   : > { %v719_v38 = vpop.f32.mrf.mxu3 }
  0xf7   : > { %v720_v58 = vadd.f32 %v719_v38, %v700_v53 }
 0x10f   : > { %v739_v39 = vpop.f32.mrf.mxu0 }
 0x110   : > { %v740_v10 = vadd.f32 %v739_v39, %v587_v8 }
 0x112   : > { %v759_v40 = vpop.f32.mrf.mxu1 }
 0x113   : > { %v760_v14 = vadd.f32 %v759_v40, %v740_v10 }
 0x115   : > { %v779_v23 = vpop.f32.mrf.mxu2 }
 0x116   : > { %v780_v21 = vadd.f32 %v779_v23, %v627_v18 }
 0x118   : > { %v799_v43 = vpop.f32.mrf.mxu3 }
 0x119   : > { %v800_v27 = vadd.f32 %v799_v43, %v780_v21 }
 0x131   : > { %v965_v44 = vpop.f32.mrf.mxu0  ;;  %v985_v45 = vpop.f32.mrf.mxu1 }
 0x132   : > { %v986_v48 = vadd.f32 %v985_v45, %v965_v44 }
 0x134   : > { %v1108_v51 = vadd.f32 %v986_v48, %v680_v47 }
 0x136   : > { %v1122_v54 = vmul.f32 %v1114_v49, %v1108_v51 }
 0x138   : > { %v1136_v55 = vadd.f32 %v1128_v52, %v1122_v54  ;;  %v1005_v56 = vpop.f32.mrf.mxu2  ;;  %v1025_v57 = vpop.f32.mrf.mxu3 }
 0x139   : > { %v1026_v59 = vadd.f32 %v1025_v57, %v1005_v56 }
 0x13a   : > { %v1144_v61 = vmin.f32 %v1136_v55, 0.0  ;;  %vm1140_vm2 = vcmp.gt.f32.partialorder %v1136_v55, 0.0 }
 0x13b   : > { %v1109_v26 = vadd.f32 %v1026_v59, %v720_v58 }
 0x13c   : > { %v1148_v63 = vmul.f32 1.442695, %v1144_v61 }
 0x13d   : > { %v1123_v0 = vmul.f32 %v1115_v60, %v1109_v26 }
 0x13e   : > { %1505 = vpow2.f32 %v1148_v63 }
 0x13f   : > { %v1137_v1 = vadd.f32 %v1129_v62, %v1123_v0 }
 0x141   : > { %v1145_v2 = vmin.f32 %v1137_v1, 0.0  ;;  %vm1141_vm3 = vcmp.gt.f32.partialorder %v1137_v1, 0.0 }
 0x143   : > { %v1150_v3 = vmul.f32 1.442695, %v1145_v2 }
 0x144   : > { %v1506_v4 = vpop.eup %1505 }
 0x145   : > { %v1488_v5 = vadd.f32 -1.0, %v1506_v4  ;;  %1507 = vpow2.f32 %v1150_v3 }
 0x147   : > { %v1160_v29 = vsel %vm1140_vm2, %v1136_v55, %v1488_v5 }
 0x148   : > { %1164 = vst [vmem:[%s2777_s29] sm:$0xff] %v1160_v29 }
 0x14b   : > { %v1508_v6 = vpop.eup %1507 }
 0x14c   : > { %v1489_v7 = vadd.f32 -1.0, %v1508_v6 }
 0x14e   : > { %v1161_v9 = vsel %vm1141_vm3, %v1137_v1, %v1489_v7 }
 0x14f   : > { %1165 = vst [vmem:[%s2777_s29 + $0x8] sm:$0xff] %v1161_v9 }
 0x153   : > { %v1045_v12 = vpop.f32.mrf.mxu0  ;;  %v1065_v13 = vpop.f32.mrf.mxu1 }
 0x154   : > { %v1066_v15 = vadd.f32 %v1065_v13, %v1045_v12 }
 0x156   : > { %v1110_v19 = vadd.f32 %v1066_v15, %v760_v14 }
 0x158   : > { %v1124_v11 = vmul.f32 %v1116_v17, %v1110_v19 }
 0x15a   : > { %v1138_v24 = vadd.f32 %v1130_v20, %v1124_v11  ;;  %v1085_v25 = vpop.f32.mrf.mxu2  ;;  %v1105_v16 = vpop.f32.mrf.mxu3 }
 0x15b   : > { %v1106_v28 = vadd.f32 %v1105_v16, %v1085_v25 }
 0x15c   : > { %v1146_v31 = vmin.f32 %v1138_v24, 0.0  ;;  %vm1142_vm4 = vcmp.gt.f32.partialorder %v1138_v24, 0.0 }
 0x15d   : > { %v1111_v32 = vadd.f32 %v1106_v28, %v800_v27 }
 0x15e   : > { %v1152_v36 = vmul.f32 1.442695, %v1146_v31 }
 0x15f   : > { %v1125_v37 = vmul.f32 %v1117_v30, %v1111_v32 }
 0x160   : > { %1509 = vpow2.f32 %v1152_v36 }
 0x161   : > { %v1139_v33 = vadd.f32 %v1131_v35, %v1125_v37 }
 0x163   : > { %v1147_v34 = vmin.f32 %v1139_v33, 0.0  ;;  %vm1143_vm5 = vcmp.gt.f32.partialorder %v1139_v33, 0.0 }
 0x165   : > { %v1154_v38 = vmul.f32 1.442695, %v1147_v34 }
 0x166   : > { %v1510_v39 = vpop.eup %1509 }
 0x167   : > { %v1490_v40 = vadd.f32 -1.0, %v1510_v39  ;;  %1511 = vpow2.f32 %v1154_v38 }
 0x169   : > { %v1162_v41 = vsel %vm1142_vm4, %v1138_v24, %v1490_v40 }
 0x16a   : > { %1166 = vst [vmem:[%s2777_s29 + $0x10] sm:$0xff] %v1162_v41 }
 0x16d   : > { %v1512_v42 = vpop.eup %1511 }
 0x16e   : > { %v1491_v23 = vadd.f32 -1.0, %v1512_v42 }
 0x170   : > { %v1163_v22 = vsel %vm1143_vm5, %v1139_v33, %v1491_v23 }
 0x171   : > { %1167 = vst [vmem:[%s2777_s29 + $0x18] sm:$0xff] %v1163_v22 }
 0x172 PF: > { %s14_s15 = sadd.s32 1, %s1519_s15  }
 0x173   : > { %p11_p4 = scmp.ge.s32.totalorder %s14_s15, 4  }
 0x175   :  { %13 = sbr.rel (!%p11_p4) target bundleno = 1 (0x1), region = 68 }

</bundles_post_ra>
